<compile_context>
chip_gen: v5e
topology: v5e:2x2
jax: 0.10.0
libtpu: 0.0.40
codegen_flags: <defaults>
</compile_context>

<pallas_src>
import functools

import jax
import jax.numpy as jnp
from jax.experimental import pallas as pl
from jax.experimental.pallas import tpu as pltpu


HIDDEN = 768        # hidden_size
NUM_TOKENS = 178    # mask_predictor out_features
NUM_VOCAB = 593     # word_predictor out_features
PHONEME_VOCAB = 64  # stand-in embedding table size

_LANE = 128
_SUBLANE = 8
NT_PAD = 256                 # round_up(NUM_TOKENS, 128)
NW_PAD = 640                 # round_up(NUM_VOCAB, 128)
NH_PAD = NT_PAD + NW_PAD     # 896: fused head output width


def _round_up(x, m):
    return ((x + m - 1) // m) * m


def _multitask_kernel(x_ref, we_ref, be_ref, wh_ref, bh_ref, tok_ref, word_ref):
    # Stand-in encoder dense layer: bf16 x bf16 -> f32 accumulate on the MXU,
    # bias add + tanh in f32 (VPU/EUP).
    h32 = jnp.tanh(
        jnp.dot(x_ref[...], we_ref[...], preferred_element_type=jnp.float32)
        + be_ref[...]
    )
    h = h32.astype(jnp.bfloat16)
    # Fused mask_predictor + word_predictor: one [rows, 768] @ [768, 896] matmul.
    z = (
        jnp.dot(h, wh_ref[...], preferred_element_type=jnp.float32)
        + bh_ref[...]
    )
    # 256 is a multiple of 128, so both slices are lane-tile aligned.
    tok_ref[...] = z[:, :NT_PAD]
    word_ref[...] = z[:, NT_PAD:]


def multitask_forward(x_emb, params, *, block_rows=256):
    """x_emb: [rows, HIDDEN] float32 (already embedded phonemes, flattened)."""
    M, H = x_emb.shape

    # Row tiling: MXU-aligned tiles; shrink to the (sublane-padded) problem size
    # for tiny inference shapes so a single grid step has no wasted rows.
    br = min(block_rows, _round_up(M, _SUBLANE))
    Mp = _round_up(M, br)

    # Pad activation rows and cast matmul operands to bf16.
    x_p = jnp.zeros((Mp, H), jnp.bfloat16).at[:M].set(x_emb.astype(jnp.bfloat16))
    we = params["we"].astype(jnp.bfloat16)
    be = params["be"]                                   # f32 [1, H]

    # Pad both heads to lane-dense widths and fuse into a single weight/bias slab.
    wh = jnp.zeros((H, NH_PAD), jnp.bfloat16)
    wh = wh.at[:, :NUM_TOKENS].set(params["wt"].astype(jnp.bfloat16))
    wh = wh.at[:, NT_PAD:NT_PAD + NUM_VOCAB].set(params["ww"].astype(jnp.bfloat16))
    bh = jnp.zeros((1, NH_PAD), jnp.float32)
    bh = bh.at[:, :NUM_TOKENS].set(params["bt"][0])
    bh = bh.at[:, NT_PAD:NT_PAD + NUM_VOCAB].set(params["bw"][0])

    tok_p, word_p = pl.pallas_call(
        _multitask_kernel,
        out_shape=(
            jax.ShapeDtypeStruct((Mp, NT_PAD), jnp.float32),
            jax.ShapeDtypeStruct((Mp, NW_PAD), jnp.float32),
        ),
        grid=(Mp // br,),
        in_specs=[
            pl.BlockSpec((br, H), lambda i: (i, 0)),      # activations (row-tiled)
            pl.BlockSpec((H, H), lambda i: (0, 0)),       # encoder dense weight (bf16)
            pl.BlockSpec((1, H), lambda i: (0, 0)),       # encoder dense bias  (f32)
            pl.BlockSpec((H, NH_PAD), lambda i: (0, 0)),  # fused head weight   (bf16)
            pl.BlockSpec((1, NH_PAD), lambda i: (0, 0)),  # fused head bias     (f32)
        ],
        out_specs=(
            pl.BlockSpec((br, NT_PAD), lambda i: (i, 0)),
            pl.BlockSpec((br, NW_PAD), lambda i: (i, 0)),
        ),
        compiler_params=pltpu.CompilerParams(
            dimension_semantics=("parallel",),     # shards rows across v7x's 2 TCs
            vmem_limit_bytes=32 * 1024 * 1024,     # headroom for 256-row tiles on v5e
        ),
    )(x_p, we, be, wh, bh)

    # Slice padded rows / lanes back to the logical output shapes.
    return tok_p[:M, :NUM_TOKENS], word_p[:M, :NUM_VOCAB]


def init_params(key):
    """Deterministic init mimicking nn.Linear default (U[-1/sqrt(in), 1/sqrt(in)])."""
    ks = jax.random.split(key, 7)

    def lin(kw, kb, fan_in, fan_out):
        bound = 1.0 / jnp.sqrt(fan_in)
        w = jax.random.uniform(kw, (fan_in, fan_out), jnp.float32, -bound, bound)
        b = jax.random.uniform(kb, (1, fan_out), jnp.float32, -bound, bound)
        return w, b

    emb = jax.random.normal(ks[0], (PHONEME_VOCAB, HIDDEN), jnp.float32) * 0.02
    we, be = lin(ks[1], ks[2], HIDDEN, HIDDEN)          # stand-in encoder dense
    wt, bt = lin(ks[3], ks[4], HIDDEN, NUM_TOKENS)      # mask_predictor
    ww, bw = lin(ks[5], ks[6], HIDDEN, NUM_VOCAB)       # word_predictor
    return {"emb": emb, "we": we, "be": be, "wt": wt, "bt": bt, "ww": ww, "bw": bw}


@functools.partial(jax.jit, static_argnames=())
def model_apply(phonemes, params):
    """Full MultiTaskModel forward. phonemes: [batch, seq] int32 ids."""
    B, S = phonemes.shape
    # glue: embedding lookup (part of the stand-in encoder)
    x_emb = jnp.take(params["emb"], phonemes.reshape(-1), axis=0)  # [B*S, HIDDEN]
    tok, word = multitask_forward(x_emb, params)
    tokens_pred = tok.reshape(B, S, NUM_TOKENS)
    words_pred = word.reshape(B, S, NUM_VOCAB)
    return tokens_pred, words_pred


def _reference(phonemes, params):
    B, S = phonemes.shape
    x = jnp.take(params["emb"], phonemes.reshape(-1), axis=0)
    h = jnp.tanh(x @ params["we"] + params["be"])
    tok = h @ params["wt"] + params["bt"]
    word = h @ params["ww"] + params["bw"]
    return tok.reshape(B, S, NUM_TOKENS), word.reshape(B, S, NUM_VOCAB)


if __name__ == "__main__":
    key = jax.random.PRNGKey(0)
    k_param, k_inp = jax.random.split(key)
    params = init_params(k_param)

    batch, seq = 2, 8
    phonemes = jax.random.randint(k_inp, (batch, seq), 0, PHONEME_VOCAB, jnp.int32)

    tokens_pred, words_pred = model_apply(phonemes, params)
    jax.block_until_ready((tokens_pred, words_pred))

    assert tokens_pred.shape == (batch, seq, NUM_TOKENS)
    assert words_pred.shape == (batch, seq, NUM_VOCAB)

    # Reference in f32; kernel uses bf16 operands with f32 accumulation, so use
    # a slightly loose tolerance (values here are O(0.1), errors are O(1e-4)).
    ref_tok, ref_word = _reference(phonemes, params)
    assert jnp.allclose(tokens_pred, ref_tok, rtol=2e-2, atol=1e-2)
    assert jnp.allclose(words_pred, ref_word, rtol=2e-2, atol=1e-2)

    print("KERNEL_OK")
</pallas_src>

<mosaic_0001>
module attributes {stable_mosaic.version = 11 : i64} {
  func.func @_multitask_kernel(%arg0: i32, %arg1: memref<16x768xbf16, #tpu.memory_space<vmem>>, %arg2: memref<768x768xbf16, #tpu.memory_space<vmem>>, %arg3: memref<1x768xf32, #tpu.memory_space<vmem>>, %arg4: memref<768x896xbf16, #tpu.memory_space<vmem>>, %arg5: memref<1x896xf32, #tpu.memory_space<vmem>>, %arg6: memref<16x256xf32, #tpu.memory_space<vmem>>, %arg7: memref<16x640xf32, #tpu.memory_space<vmem>>) attributes {dimension_semantics = [#tpu.dimension_semantics<parallel>], iteration_bounds = array<i64: 1>, scalar_prefetch = 0 : i64, scratch_operands = 0 : i64, tpu.core_type = #tpu.core_type<tc>, window_params = [{transform_indices = @transform_0, window_bounds = array<i64: 16, 768>}, {pipeline_mode = #tpu.pipeline_mode<synchronous>, transform_indices = @transform_1, window_bounds = array<i64: 768, 768>}, {pipeline_mode = #tpu.pipeline_mode<synchronous>, transform_indices = @transform_2, window_bounds = array<i64: 1, 768>}, {pipeline_mode = #tpu.pipeline_mode<synchronous>, transform_indices = @transform_3, window_bounds = array<i64: 768, 896>}, {pipeline_mode = #tpu.pipeline_mode<synchronous>, transform_indices = @transform_4, window_bounds = array<i64: 1, 896>}, {transform_indices = @transform_5, window_bounds = array<i64: 16, 256>}, {transform_indices = @transform_6, window_bounds = array<i64: 16, 640>}]} {
    %c0 = arith.constant 0 : index
    %c0_0 = arith.constant 0 : index
    %0 = vector.load %arg1[%c0, %c0_0] : memref<16x768xbf16, #tpu.memory_space<vmem>>, vector<16x768xbf16>
    %c0_1 = arith.constant 0 : index
    %c0_2 = arith.constant 0 : index
    %1 = vector.load %arg2[%c0_1, %c0_2] : memref<768x768xbf16, #tpu.memory_space<vmem>>, vector<768x768xbf16>
    %cst = arith.constant dense<0.000000e+00> : vector<16x768xf32>
    %2 = tpu.matmul %0, %1, %cst {dimension_numbers = #tpu.dot_dimension_numbers<[1], [0], [0], [1], [0, 0, 1, 1], [], []>} : vector<16x768xbf16>, vector<768x768xbf16>, vector<16x768xf32> -> vector<16x768xf32>
    %c0_3 = arith.constant 0 : index
    %c0_4 = arith.constant 0 : index
    %3 = vector.load %arg3[%c0_3, %c0_4] : memref<1x768xf32, #tpu.memory_space<vmem>>, vector<1x768xf32>
    %4 = vector.broadcast %3 : vector<1x768xf32> to vector<16x768xf32>
    %5 = arith.addf %2, %4 : vector<16x768xf32>
    %6 = math.tanh %5 : vector<16x768xf32>
    %7 = arith.truncf %6 : vector<16x768xf32> to vector<16x768xbf16>
    %c0_5 = arith.constant 0 : index
    %c0_6 = arith.constant 0 : index
    %8 = vector.load %arg4[%c0_5, %c0_6] : memref<768x896xbf16, #tpu.memory_space<vmem>>, vector<768x896xbf16>
    %cst_7 = arith.constant dense<0.000000e+00> : vector<16x896xf32>
    %9 = tpu.matmul %7, %8, %cst_7 {dimension_numbers = #tpu.dot_dimension_numbers<[1], [0], [0], [1], [0, 0, 1, 1], [], []>} : vector<16x768xbf16>, vector<768x896xbf16>, vector<16x896xf32> -> vector<16x896xf32>
    %c0_8 = arith.constant 0 : index
    %c0_9 = arith.constant 0 : index
    %10 = vector.load %arg5[%c0_8, %c0_9] : memref<1x896xf32, #tpu.memory_space<vmem>>, vector<1x896xf32>
    %11 = vector.broadcast %10 : vector<1x896xf32> to vector<16x896xf32>
    %12 = arith.addf %9, %11 : vector<16x896xf32>
    %13 = vector.extract_strided_slice %12 {offsets = [0, 0], sizes = [16, 256], strides = [1, 1]} : vector<16x896xf32> to vector<16x256xf32>
    %c0_10 = arith.constant 0 : index
    %c0_11 = arith.constant 0 : index
    %14 = vector.load %arg6[%c0_10, %c0_11] : memref<16x256xf32, #tpu.memory_space<vmem>>, vector<16x256xf32>
    tpu.vector_store %arg6[%c0_10, %c0_11], %13 {strides = array<i32>} : memref<16x256xf32, #tpu.memory_space<vmem>>, vector<16x256xf32>,
    %15 = vector.extract_strided_slice %12 {offsets = [0, 256], sizes = [16, 640], strides = [1, 1]} : vector<16x896xf32> to vector<16x640xf32>
    %c0_12 = arith.constant 0 : index
    %c0_13 = arith.constant 0 : index
    %16 = vector.load %arg7[%c0_12, %c0_13] : memref<16x640xf32, #tpu.memory_space<vmem>>, vector<16x640xf32>
    tpu.vector_store %arg7[%c0_12, %c0_13], %15 {strides = array<i32>} : memref<16x640xf32, #tpu.memory_space<vmem>>, vector<16x640xf32>,
    return
  }
  func.func @transform_0(%arg0: i32) -> (i32, i32) {
    %c0_i32 = arith.constant 0 : i32
    %c0_i32_0 = arith.constant 0 : i32
    return %arg0, %c0_i32 : i32, i32
  }
  func.func @transform_1(%arg0: i32) -> (i32, i32) {
    %c0_i32 = arith.constant 0 : i32
    %c0_i32_0 = arith.constant 0 : i32
    %c0_i32_1 = arith.constant 0 : i32
    return %c0_i32, %c0_i32_0 : i32, i32
  }
  func.func @transform_2(%arg0: i32) -> (i32, i32) {
    %c0_i32 = arith.constant 0 : i32
    %c0_i32_0 = arith.constant 0 : i32
    %c0_i32_1 = arith.constant 0 : i32
    return %c0_i32, %c0_i32_0 : i32, i32
  }
  func.func @transform_3(%arg0: i32) -> (i32, i32) {
    %c0_i32 = arith.constant 0 : i32
    %c0_i32_0 = arith.constant 0 : i32
    %c0_i32_1 = arith.constant 0 : i32
    return %c0_i32, %c0_i32_0 : i32, i32
  }
  func.func @transform_4(%arg0: i32) -> (i32, i32) {
    %c0_i32 = arith.constant 0 : i32
    %c0_i32_0 = arith.constant 0 : i32
    %c0_i32_1 = arith.constant 0 : i32
    return %c0_i32, %c0_i32_0 : i32, i32
  }
  func.func @transform_5(%arg0: i32) -> (i32, i32) {
    %c0_i32 = arith.constant 0 : i32
    %c0_i32_0 = arith.constant 0 : i32
    return %arg0, %c0_i32 : i32, i32
  }
  func.func @transform_6(%arg0: i32) -> (i32, i32) {
    %c0_i32 = arith.constant 0 : i32
    %c0_i32_0 = arith.constant 0 : i32
    return %arg0, %c0_i32 : i32, i32
  }
}

</mosaic_0001>

<bundles_post_ra>
// kernel: model_apply.1
= control target key start
LH: loop header
LB: loop body
LE: loop exit
PB: predicated region body
PF: predicated region fallthrough
CT: control target
= control target key end

     0   :  { %s12322_s1 = inlined_call_operand.vmem [shape: bf16[768,768], index: 1, kind: input, shape index: {}]   ;;  %s12323_s0 = inlined_call_operand.vmem [shape: bf16[16,768], index: 0, kind: input, shape index: {}]   ;;  %s12324_s2 = inlined_call_operand.vmem [shape: f32[1,768], index: 2, kind: input, shape index: {}]   ;;  %s12325_s3 = inlined_call_operand.vmem [shape: bf16[768,896], index: 3, kind: input, shape index: {}]   ;;  %s12326_s4 = inlined_call_operand.vmem [shape: f32[1,896], index: 4, kind: input, shape index: {}]   ;;  %s12327_s5 = inlined_call_operand.vmem [shape: f32[16,256], index: 5, kind: output, shape index: {0}]   ;;  %s12328_s6 = inlined_call_operand.vmem [shape: f32[16,640], index: 6, kind: output, shape index: {1}]  }
   0x1   :  { %v5254_v0 = vld [vmem:[%s12322_s1 + $0x150] sm:$0xf]  ;;  %v7631_v1 = vld [vmem:[%s12322_s1 + $0x164] sm:$0xf0]  ;;  %v5230_v11 = vld [vmem:[%s12322_s1 + $0x120] sm:$0xf] }
   0x2   :  { %v5446_v2 = vld [vmem:[%s12322_s1 + $0x2d0] sm:$0xf]  ;;  %v5255_v3 = vor.u32 %v7631_v1, %v5254_v0  ;;  %v7679_v4 = vld [vmem:[%s12322_s1 + $0x2e4] sm:$0xf0]  ;;  %v7625_v13 = vld [vmem:[%s12322_s1 + $0x134] sm:$0xf0] }
   0x3   :  { %v5638_v5 = vld [vmem:[%s12322_s1 + $0x450] sm:$0xf]  ;;  %v7727_v6 = vld [vmem:[%s12322_s1 + $0x464] sm:$0xf0]  ;;  %v5447_v7 = vor.u32 %v7679_v4, %v5446_v2  ;;  %v5422_v14 = vld [vmem:[%s12322_s1 + $0x2a0] sm:$0xf]  ;;  %v5231_v16 = vor.u32 %v7625_v13, %v5230_v11 }
   0x4   :  { %v5639_v8 = vor.u32 %v7727_v6, %v5638_v5  ;;  %v5830_v9 = vld [vmem:[%s12322_s1 + $0x5d0] sm:$0xf]  ;;  %v7775_v10 = vld [vmem:[%s12322_s1 + $0x5e4] sm:$0xf0]  ;;  %1800 = vmatpush.bf16.msra.mxu0 %v5255_v3  ;;  %v7673_v15 = vld [vmem:[%s12322_s1 + $0x2b4] sm:$0xf0] }
   0x5   :  { %v5831_v12 = vor.u32 %v7775_v10, %v5830_v9  ;;  %1814 = vmatpush.bf16.msra.mxu1 %v5447_v7  ;;  %v5423_v17 = vor.u32 %v7673_v15, %v5422_v14  ;;  %v5614_v18 = vld [vmem:[%s12322_s1 + $0x420] sm:$0xf]  ;;  %v7721_v19 = vld [vmem:[%s12322_s1 + $0x434] sm:$0xf0]  ;;  %v5206_v23 = vld [vmem:[%s12322_s1 + $0xf0] sm:$0xf] }
   0x6   :  { %1828 = vmatpush.bf16.msra.mxu2 %v5639_v8  ;;  %v5806_v20 = vld [vmem:[%s12322_s1 + $0x5a0] sm:$0xf]  ;;  %v5615_v21 = vor.u32 %v7721_v19, %v5614_v18  ;;  %v7769_v22 = vld [vmem:[%s12322_s1 + $0x5b4] sm:$0xf0]  ;;  %v7619_v24 = vld [vmem:[%s12322_s1 + $0x104] sm:$0xf0] }
   0x7   :  { %1842 = vmatpush.bf16.msra.mxu3 %v5831_v12  ;;  %v5807_v25 = vor.u32 %v7769_v22, %v5806_v20  ;;  %v5398_v26 = vld [vmem:[%s12322_s1 + $0x270] sm:$0xf]  ;;  %v7667_v27 = vld [vmem:[%s12322_s1 + $0x284] sm:$0xf0]  ;;  %v5207_v29 = vor.u32 %v7619_v24, %v5206_v23  ;;  %v5182_v35 = vld [vmem:[%s12322_s1 + $0xc0] sm:$0xf] }
   0x8   :  { %v5590_v28 = vld [vmem:[%s12322_s1 + $0x3f0] sm:$0xf]  ;;  %1801 = vmatpush.bf16.msra.mxu0 %v5231_v16  ;;  %v7715_v30 = vld [vmem:[%s12322_s1 + $0x404] sm:$0xf0]  ;;  %v5399_v33 = vor.u32 %v7667_v27, %v5398_v26  ;;  %v7613_v36 = vld [vmem:[%s12322_s1 + $0xd4] sm:$0xf0] }
   0x9   :  { %v5782_v31 = vld [vmem:[%s12322_s1 + $0x570] sm:$0xf]  ;;  %v7763_v32 = vld [vmem:[%s12322_s1 + $0x584] sm:$0xf0]  ;;  %1815 = vmatpush.bf16.msra.mxu1 %v5423_v17  ;;  %v5591_v34 = vor.u32 %v7715_v30, %v5590_v28  ;;  %v5374_v37 = vld [vmem:[%s12322_s1 + $0x240] sm:$0xf]  ;;  %v5183_v44 = vor.u32 %v7613_v36, %v5182_v35 }
   0xa   :  { %1829 = vmatpush.bf16.msra.mxu2 %v5615_v21  ;;  %v5783_v38 = vor.u32 %v7763_v32, %v5782_v31  ;;  %v7661_v39 = vld [vmem:[%s12322_s1 + $0x254] sm:$0xf0]  ;;  %v5566_v40 = vld [vmem:[%s12322_s1 + $0x3c0] sm:$0xf]  ;;  %v5158_v47 = vld [vmem:[%s12322_s1 + $0x90] sm:$0xf] }
   0xb   :  { %1843 = vmatpush.bf16.msra.mxu3 %v5807_v25  ;;  %v7709_v41 = vld [vmem:[%s12322_s1 + $0x3d4] sm:$0xf0]  ;;  %v5758_v42 = vld [vmem:[%s12322_s1 + $0x540] sm:$0xf]  ;;  %v5375_v45 = vor.u32 %v7661_v39, %v5374_v37  ;;  %v7607_v48 = vld [vmem:[%s12322_s1 + $0xa4] sm:$0xf0] }
   0xc   :  { %v7757_v43 = vld [vmem:[%s12322_s1 + $0x554] sm:$0xf0]  ;;  %1802 = vmatpush.bf16.msra.mxu0 %v5207_v29  ;;  %v5567_v46 = vor.u32 %v7709_v41, %v5566_v40  ;;  %v5350_v49 = vld [vmem:[%s12322_s1 + $0x210] sm:$0xf]  ;;  %v7655_v51 = vld [vmem:[%s12322_s1 + $0x224] sm:$0xf0]  ;;  %v5159_v56 = vor.u32 %v7607_v48, %v5158_v47 }
   0xd   :  { %1816 = vmatpush.bf16.msra.mxu1 %v5399_v33  ;;  %v5759_v50 = vor.u32 %v7757_v43, %v5758_v42  ;;  %v5542_v52 = vld [vmem:[%s12322_s1 + $0x390] sm:$0xf]  ;;  %v7703_v53 = vld [vmem:[%s12322_s1 + $0x3a4] sm:$0xf0]  ;;  %v5351_v57 = vor.u32 %v7655_v51, %v5350_v49  ;;  %v5134_v59 = vld [vmem:[%s12322_s1 + $0x60] sm:$0xf] }
   0xe   :  { %1830 = vmatpush.bf16.msra.mxu2 %v5591_v34  ;;  %v5734_v54 = vld [vmem:[%s12322_s1 + $0x510] sm:$0xf]  ;;  %v7751_v55 = vld [vmem:[%s12322_s1 + $0x524] sm:$0xf0]  ;;  %v5543_v58 = vor.u32 %v7703_v53, %v5542_v52  ;;  %v7601_v60 = vld [vmem:[%s12322_s1 + $0x74] sm:$0xf0] }
   0xf   :  { %1844 = vmatpush.bf16.msra.mxu3 %v5783_v38  ;;  %v5326_v61 = vld [vmem:[%s12322_s1 + $0x1e0] sm:$0xf]  ;;  %v5735_v62 = vor.u32 %v7751_v55, %v5734_v54  ;;  %v7649_v63 = vld [vmem:[%s12322_s1 + $0x1f4] sm:$0xf0]  ;;  %v5135_v4 = vor.u32 %v7601_v60, %v5134_v59  ;;  %v5110_v7 = vld [vmem:[%s12322_s1 + $0x30] sm:$0xf] }
  0x10   :  { %1803 = vmatpush.bf16.msra.mxu0 %v5183_v44  ;;  %v5518_v0 = vld [vmem:[%s12322_s1 + $0x360] sm:$0xf]  ;;  %v7697_v1 = vld [vmem:[%s12322_s1 + $0x374] sm:$0xf0]  ;;  %v5327_v5 = vor.u32 %v7649_v63, %v5326_v61  ;;  %v7595_v8 = vld [vmem:[%s12322_s1 + $0x44] sm:$0xf0] }
  0x11   :  { %1817 = vmatpush.bf16.msra.mxu1 %v5375_v45  ;;  %v5710_v2 = vld [vmem:[%s12322_s1 + $0x4e0] sm:$0xf]  ;;  %v7745_v3 = vld [vmem:[%s12322_s1 + $0x4f4] sm:$0xf0]  ;;  %v5519_v6 = vor.u32 %v7697_v1, %v5518_v0  ;;  %v5302_v9 = vld [vmem:[%s12322_s1 + $0x1b0] sm:$0xf]  ;;  %v5111_v16 = vor.u32 %v7595_v8, %v5110_v7 }
  0x12   :  { %1831 = vmatpush.bf16.msra.mxu2 %v5567_v46  ;;  %v5711_v10 = vor.u32 %v7745_v3, %v5710_v2  ;;  %v7643_v11 = vld [vmem:[%s12322_s1 + $0x1c4] sm:$0xf0]  ;;  %v5494_v12 = vld [vmem:[%s12322_s1 + $0x330] sm:$0xf]  ;;  %v5086_v17 = vld [vmem:[%s12322_s1] sm:$0xf] }
  0x13   :  { %1845 = vmatpush.bf16.msra.mxu3 %v5759_v50  ;;  %v7691_v13 = vld [vmem:[%s12322_s1 + $0x344] sm:$0xf0]  ;;  %v5686_v14 = vld [vmem:[%s12322_s1 + $0x4b0] sm:$0xf]  ;;  %v7589_v18 = vld [vmem:[%s12322_s1 + $0x14] sm:$0xf0]  ;;  %v5303_v19 = vor.u32 %v7643_v11, %v5302_v9 }
  0x14   :  { %1804 = vmatpush.bf16.msra.mxu0 %v5159_v56  ;;  %v7739_v15 = vld [vmem:[%s12322_s1 + $0x4c4] sm:$0xf0]  ;;  %v5495_v20 = vor.u32 %v7691_v13, %v5494_v12  ;;  %v5278_v21 = vld [vmem:[%s12322_s1 + $0x180] sm:$0xf]  ;;  %v7637_v22 = vld [vmem:[%s12322_s1 + $0x194] sm:$0xf0]  ;;  %v5087_v31 = vor.u32 %v7589_v18, %v5086_v17 }
  0x15   :  { %1818 = vmatpush.bf16.msra.mxu1 %v5351_v57  ;;  %v5470_v23 = vld [vmem:[%s12322_s1 + $0x300] sm:$0xf]  ;;  %v5687_v24 = vor.u32 %v7739_v15, %v5686_v14  ;;  %v7685_v25 = vld [vmem:[%s12322_s1 + $0x314] sm:$0xf0]  ;;  %v6022_v28 = vld [vmem:[%s12322_s1 + $0x750] sm:$0xf]  ;;  %v5279_v35 = vor.u32 %v7637_v22, %v5278_v21 }
  0x16   :  { %1832 = vmatpush.bf16.msra.mxu2 %v5543_v58  ;;  %v5662_v26 = vld [vmem:[%s12322_s1 + $0x480] sm:$0xf]  ;;  %v7733_v27 = vld [vmem:[%s12322_s1 + $0x494] sm:$0xf0]  ;;  %v7823_v29 = vld [vmem:[%s12322_s1 + $0x764] sm:$0xf0]  ;;  %v5471_v36 = vor.u32 %v7685_v25, %v5470_v23 }
  0x17   :  { %1846 = vmatpush.bf16.msra.mxu3 %v5735_v62  ;;  %v6214_v30 = vld [vmem:[%s12322_s1 + $0x8d0] sm:$0xf]  ;;  %v7871_v32 = vld [vmem:[%s12322_s1 + $0x8e4] sm:$0xf0]  ;;  %v7628_v33 = vld [vmem:[%s12322_s1 + $0x154] sm:$0xf]  ;;  %v5663_v39 = vor.u32 %v7733_v27, %v5662_v26  ;;  %v6023_v40 = vor.u32 %v7823_v29, %v6022_v28 }
  0x18   :  { %1805 = vmatpush.bf16.msra.mxu0 %v5135_v4  ;;  %v5256_v34 = vld [vmem:[%s12322_s1 + $0x168] sm:$0xf0]  ;;  %v7676_v37 = vld [vmem:[%s12322_s1 + $0x2d4] sm:$0xf]  ;;  %v5998_v41 = vld [vmem:[%s12322_s1 + $0x720] sm:$0xf]  ;;  %v6215_v42 = vor.u32 %v7871_v32, %v6214_v30 }
  0x19   :  { %1819 = vmatpush.bf16.msra.mxu1 %v5327_v5  ;;  %v5448_v38 = vld [vmem:[%s12322_s1 + $0x2e8] sm:$0xf0]  ;;  %v5259_v43 = vor.u32 %v7628_v33, %v5256_v34  ;;  %v7817_v44 = vld [vmem:[%s12322_s1 + $0x734] sm:$0xf0]  ;;  %v6190_v45 = vld [vmem:[%s12322_s1 + $0x8a0] sm:$0xf] }
  0x1a   :  { %1833 = vmatpush.bf16.msra.mxu2 %v5519_v6  ;;  %v7865_v46 = vld [vmem:[%s12322_s1 + $0x8b4] sm:$0xf0]  ;;  %v5451_v47 = vor.u32 %v7676_v37, %v5448_v38  ;;  %v7622_v48 = vld [vmem:[%s12322_s1 + $0x124] sm:$0xf]  ;;  %v5232_v49 = vld [vmem:[%s12322_s1 + $0x138] sm:$0xf0]  ;;  %v5999_v54 = vor.u32 %v7817_v44, %v5998_v41 }
  0x1b   :  { %1847 = vmatpush.bf16.msra.mxu3 %v5711_v10  ;;  %v7670_v50 = vld [vmem:[%s12322_s1 + $0x2a4] sm:$0xf]  ;;  %v5424_v51 = vld [vmem:[%s12322_s1 + $0x2b8] sm:$0xf0]  ;;  %v5062_v52 = vld [vmem:[%s12323_s0] sm:$0xf]  ;;  %v6191_v58 = vor.u32 %v7865_v46, %v6190_v45  ;;  %v5235_v59 = vor.u32 %v7622_v48, %v5232_v49 }
  0x1c   :  { %1806 = vmatpush.bf16.msra.mxu0 %v5111_v16  ;;  %v7583_v53 = vld [vmem:[%s12323_s0 + $0x14] sm:$0xf0]  ;;  %v5974_v55 = vld [vmem:[%s12322_s1 + $0x6f0] sm:$0xf]  ;;  %v7811_v56 = vld [vmem:[%s12322_s1 + $0x704] sm:$0xf0]  ;;  %v5427_v63 = vor.u32 %v7670_v50, %v5424_v51 }
  0x1d   :  { %1820 = vmatpush.bf16.msra.mxu1 %v5303_v19  ;;  %v8523_v57 = vor.u32 %v7583_v53, %v5062_v52  ;;  %v6166_v60 = vld [vmem:[%s12322_s1 + $0x870] sm:$0xf]  ;;  %v7859_v61 = vld [vmem:[%s12322_s1 + $0x884] sm:$0xf0]  ;;  %v7616_v62 = vld [vmem:[%s12322_s1 + $0xf4] sm:$0xf]  ;;  %v5975_v7 = vor.u32 %v7811_v56, %v5974_v55 }
  0x1e   :  { %1834 = vmatpush.bf16.msra.mxu2 %v5495_v20  ;;  %v5208_v0 = vld [vmem:[%s12322_s1 + $0x108] sm:$0xf0]  ;;  %v7580_v1 = vld [vmem:[%s12323_s0 + $0x4] sm:$0xf]  ;;  %v5064_v2 = vld [vmem:[%s12323_s0 + $0x18] sm:$0xf0]  ;;  %v6167_v11 = vor.u32 %v7859_v61, %v6166_v60 }
  0x1f   :  { %1848 = vmatpush.bf16.msra.mxu3 %v5687_v24  ;;  %v7664_v3 = vld [vmem:[%s12322_s1 + $0x274] sm:$0xf]  ;;  %v5400_v4 = vld [vmem:[%s12322_s1 + $0x288] sm:$0xf0]  ;;  %v5950_v5 = vld [vmem:[%s12322_s1 + $0x6c0] sm:$0xf]  ;;  %v8553_v6 = vor.u32 %v7580_v1, %v5064_v2  ;;  %v5211_v12 = vor.u32 %v7616_v62, %v5208_v0 }
  0x20   :  { %1807 = vmatpush.bf16.msra.mxu0 %v5087_v31  ;;  %v7805_v8 = vld [vmem:[%s12322_s1 + $0x6d4] sm:$0xf0]  ;;  %v6142_v9 = vld [vmem:[%s12322_s1 + $0x840] sm:$0xf]  ;;  %v7610_v13 = vld [vmem:[%s12322_s1 + $0xc4] sm:$0xf]  ;;  %v5403_v16 = vor.u32 %v7664_v3, %v5400_v4 }
  0x21   :  { %1821 = vmatpush.bf16.msra.mxu1 %v5279_v35  ;;  %v7853_v10 = vld [vmem:[%s12322_s1 + $0x854] sm:$0xf0]  ;;  %v5184_v14 = vld [vmem:[%s12322_s1 + $0xd8] sm:$0xf0]  ;;  %v5070_v15 = vld [vmem:[%s12323_s0 + $0x8] sm:$0xf]  ;;  %v5951_v24 = vor.u32 %v7805_v8, %v5950_v5 }
  0x22   :  { %1835 = vmatpush.bf16.msra.mxu2 %v5471_v36  ;;  %v7584_v17 = vld [vmem:[%s12323_s0 + $0x1c] sm:$0xf0]  ;;  %v7581_v18 = vld [vmem:[%s12323_s0 + $0xc] sm:$0xf]  ;;  %v5072_v19 = vld [vmem:[%s12323_s0 + $0x20] sm:$0xf0]  ;;  %v6143_v25 = vor.u32 %v7853_v10, %v6142_v9  ;;  %v5187_v26 = vor.u32 %v7610_v13, %v5184_v14 }
  0x23   :  { %1849 = vmatpush.bf16.msra.mxu3 %v5663_v39  ;;  %1808 = vmatmul.bf16.vlgmr.msra.gmra.mxu0 %v8523_v57  ;;  %v7658_v20 = vld [vmem:[%s12322_s1 + $0x244] sm:$0xf]  ;;  %v5376_v21 = vld [vmem:[%s12322_s1 + $0x258] sm:$0xf0]  ;;  %v8589_v22 = vor.u32 %v7584_v17, %v5070_v15  ;;  %v8591_v23 = vor.u32 %v7581_v18, %v5072_v19  ;;  %v5926_v27 = vld [vmem:[%s12322_s1 + $0x690] sm:$0xf] }
  0x24   :  { %1856 = vmatpush.bf16.msrb.mxu0 %v6023_v40  ;;  %1822 = vmatmul.bf16.vlgmr.msra.gmra.mxu1 %v8553_v6  ;;  %v7799_v28 = vld [vmem:[%s12322_s1 + $0x6a4] sm:$0xf0]  ;;  %v6118_v29 = vld [vmem:[%s12322_s1 + $0x810] sm:$0xf]  ;;  %v5379_v30 = vor.u32 %v7658_v20, %v5376_v21  ;;  %v7604_v32 = vld [vmem:[%s12322_s1 + $0x94] sm:$0xf] }
  0x25   :  { %1870 = vmatpush.bf16.msrb.mxu1 %v6215_v42  ;;  %v7847_v31 = vld [vmem:[%s12322_s1 + $0x824] sm:$0xf0]  ;;  %v5160_v33 = vld [vmem:[%s12322_s1 + $0xa8] sm:$0xf0]  ;;  %1836 = vmatmul.bf16.vlgmr.msra.gmra.mxu2 %v8589_v22  ;;  %v7652_v34 = vld [vmem:[%s12322_s1 + $0x214] sm:$0xf]  ;;  %v5927_v36 = vor.u32 %v7799_v28, %v5926_v27 }
  0x26   :  { %1884 = vmatpush.bf16.msrb.mxu2 %v5259_v43  ;;  %v5352_v35 = vld [vmem:[%s12322_s1 + $0x228] sm:$0xf0]  ;;  %1850 = vmatmul.bf16.vlgmr.msra.gmra.mxu3 %v8591_v23  ;;  %v6119_v37 = vor.u32 %v7847_v31, %v6118_v29  ;;  %v5163_v38 = vor.u32 %v7604_v32, %v5160_v33  ;;  %v5902_v39 = vld [vmem:[%s12322_s1 + $0x660] sm:$0xf]  ;;  %v7793_v40 = vld [vmem:[%s12322_s1 + $0x674] sm:$0xf0] }
  0x27   :  { %1898 = vmatpush.bf16.msrb.mxu3 %v5451_v47  ;;  %v6094_v41 = vld [vmem:[%s12322_s1 + $0x7e0] sm:$0xf]  ;;  %v5355_v42 = vor.u32 %v7652_v34, %v5352_v35  ;;  %v7841_v43 = vld [vmem:[%s12322_s1 + $0x7f4] sm:$0xf0]  ;;  %v7598_v44 = vld [vmem:[%s12322_s1 + $0x64] sm:$0xf]  ;;  %v5903_v48 = vor.u32 %v7793_v40, %v5902_v39 }
  0x28   :  { %1857 = vmatpush.bf16.msrb.mxu0 %v5999_v54  ;;  %v5136_v45 = vld [vmem:[%s12322_s1 + $0x78] sm:$0xf0]  ;;  %v7646_v46 = vld [vmem:[%s12322_s1 + $0x1e4] sm:$0xf]  ;;  %v6095_v49 = vor.u32 %v7841_v43, %v6094_v41  ;;  %v5878_v51 = vld [vmem:[%s12322_s1 + $0x630] sm:$0xf] }
  0x29   :  { %1871 = vmatpush.bf16.msrb.mxu1 %v6191_v58  ;;  %v5328_v47 = vld [vmem:[%s12322_s1 + $0x1f8] sm:$0xf0]  ;;  %v5139_v50 = vor.u32 %v7598_v44, %v5136_v45  ;;  %v7787_v52 = vld [vmem:[%s12322_s1 + $0x644] sm:$0xf0]  ;;  %v6070_v53 = vld [vmem:[%s12322_s1 + $0x7b0] sm:$0xf] }
  0x2a   :  { %1885 = vmatpush.bf16.msrb.mxu2 %v5235_v59  ;;  %v5331_v54 = vor.u32 %v7646_v46, %v5328_v47  ;;  %v7835_v55 = vld [vmem:[%s12322_s1 + $0x7c4] sm:$0xf0]  ;;  %v7592_v56 = vld [vmem:[%s12322_s1 + $0x34] sm:$0xf]  ;;  %v5112_v58 = vld [vmem:[%s12322_s1 + $0x48] sm:$0xf0]  ;;  %v5879_v61 = vor.u32 %v7787_v52, %v5878_v51 }
  0x2b   :  { %1899 = vmatpush.bf16.msrb.mxu3 %v5427_v63  ;;  %v7640_v59 = vld [vmem:[%s12322_s1 + $0x1b4] sm:$0xf]  ;;  %v5304_v60 = vld [vmem:[%s12322_s1 + $0x1c8] sm:$0xf0]  ;;  %v5854_v62 = vld [vmem:[%s12322_s1 + $0x600] sm:$0xf]  ;;  %v6071_v1 = vor.u32 %v7835_v55, %v6070_v53  ;;  %v5115_v2 = vor.u32 %v7592_v56, %v5112_v58 }
  0x2c   :  { %1858 = vmatpush.bf16.msrb.mxu0 %v5975_v7  ;;  %v7781_v63 = vld [vmem:[%s12322_s1 + $0x614] sm:$0xf0]  ;;  %v6046_v0 = vld [vmem:[%s12322_s1 + $0x780] sm:$0xf]  ;;  %v7586_v4 = vld [vmem:[%s12322_s1 + $0x4] sm:$0xf]  ;;  %v5307_v7 = vor.u32 %v7640_v59, %v5304_v60 }
  0x2d   :  { %1872 = vmatpush.bf16.msrb.mxu1 %v6167_v11  ;;  %v7829_v3 = vld [vmem:[%s12322_s1 + $0x794] sm:$0xf0]  ;;  %v5088_v5 = vld [vmem:[%s12322_s1 + $0x18] sm:$0xf0]  ;;  %v7634_v8 = vld [vmem:[%s12322_s1 + $0x184] sm:$0xf]  ;;  %v5855_v14 = vor.u32 %v7781_v63, %v5854_v62 }
  0x2e   :  { %1886 = vmatpush.bf16.msrb.mxu2 %v5211_v12  ;;  %v5280_v9 = vld [vmem:[%s12322_s1 + $0x198] sm:$0xf0]  ;;  %v7724_v10 = vld [vmem:[%s12322_s1 + $0x454] sm:$0xf]  ;;  %v5640_v11 = vld [vmem:[%s12322_s1 + $0x468] sm:$0xf0]  ;;  %v6047_v18 = vor.u32 %v7829_v3, %v6046_v0  ;;  %v5091_v19 = vor.u32 %v7586_v4, %v5088_v5 }
  0x2f   :  { %1900 = vmatpush.bf16.msrb.mxu3 %v5403_v16  ;;  %v7772_v12 = vld [vmem:[%s12322_s1 + $0x5d4] sm:$0xf]  ;;  %v5832_v13 = vld [vmem:[%s12322_s1 + $0x5e8] sm:$0xf0]  ;;  %v5078_v21 = vld [vmem:[%s12323_s0 + $0x10] sm:$0xf] }
  0x30   :  { %1859 = vmatpush.bf16.msrb.mxu0 %v5951_v24  ;;  %v7820_v15 = vld [vmem:[%s12322_s1 + $0x754] sm:$0xf]  ;;  %v6024_v16 = vld [vmem:[%s12322_s1 + $0x768] sm:$0xf0]  ;;  %v7585_v24 = vld [vmem:[%s12323_s0 + $0x24] sm:$0xf0]  ;;  %v5835_v29 = vor.u32 %v7772_v12, %v5832_v13 }
  0x31   :  { %1873 = vmatpush.bf16.msrb.mxu1 %v6143_v25  ;;  %v7868_v17 = vld [vmem:[%s12322_s1 + $0x8d4] sm:$0xf]  ;;  %v6216_v20 = vld [vmem:[%s12322_s1 + $0x8e8] sm:$0xf0]  ;;  %v5283_v25 = vor.u32 %v7634_v8, %v5280_v9  ;;  %v7718_v31 = vld [vmem:[%s12322_s1 + $0x424] sm:$0xf]  ;;  %v8736_v35 = vor.u32 %v7585_v24, %v5078_v21 }
  0x32   :  { %1887 = vmatpush.bf16.msrb.mxu2 %v5187_v26  ;;  %v5643_v26 = vor.u32 %v7724_v10, %v5640_v11  ;;  %v7582_v27 = vld [vmem:[%s12323_s0 + $0x14] sm:$0xf]  ;;  %v5080_v28 = vld [vmem:[%s12323_s0 + $0x28] sm:$0xf0]  ;;  %v5616_v32 = vld [vmem:[%s12322_s1 + $0x438] sm:$0xf0]  ;;  %v6219_v34 = vor.u32 %v7868_v17, %v6216_v20 }
  0x33   :  { %1901 = vmatpush.bf16.msrb.mxu3 %v5379_v30  ;;  %v6027_v30 = vor.u32 %v7820_v15, %v6024_v16  ;;  %v7766_v33 = vld [vmem:[%s12322_s1 + $0x5a4] sm:$0xf]  ;;  %v8747_v39 = vor.u32 %v7582_v27, %v5080_v28  ;;  %v6192_v41 = vld [vmem:[%s12322_s1 + $0x8b8] sm:$0xf0]  ;;  %v7712_v45 = vld [vmem:[%s12322_s1 + $0x3f4] sm:$0xf] }
  0x34   :  { %1860 = vmatpush.bf16.msrb.mxu0 %v5927_v36  ;;  %v5808_v36 = vld [vmem:[%s12322_s1 + $0x5b8] sm:$0xf0]  ;;  %v7862_v40 = vld [vmem:[%s12322_s1 + $0x8a4] sm:$0xf]  ;;  %v5592_v46 = vld [vmem:[%s12322_s1 + $0x408] sm:$0xf0] }
  0x35   :  { %1874 = vmatpush.bf16.msrb.mxu1 %v6119_v37  ;;  %v7814_v37 = vld [vmem:[%s12322_s1 + $0x724] sm:$0xf]  ;;  %v5811_v43 = vor.u32 %v7766_v33, %v5808_v36  ;;  %v7760_v47 = vld [vmem:[%s12322_s1 + $0x574] sm:$0xf]  ;;  %v5976_v51 = vld [vmem:[%s12322_s1 + $0x708] sm:$0xf0] }
  0x36   :  { %1888 = vmatpush.bf16.msrb.mxu2 %v5163_v38  ;;  %v6000_v38 = vld [vmem:[%s12322_s1 + $0x738] sm:$0xf0]  ;;  %v7856_v52 = vld [vmem:[%s12322_s1 + $0x874] sm:$0xf]  ;;  %v6168_v53 = vld [vmem:[%s12322_s1 + $0x888] sm:$0xf0] }
  0x37   :  { %1902 = vmatpush.bf16.msrb.mxu3 %v5355_v42  ;;  %v5619_v42 = vor.u32 %v7718_v31, %v5616_v32  ;;  %v6003_v44 = vor.u32 %v7814_v37, %v6000_v38  ;;  %v7706_v58 = vld [vmem:[%s12322_s1 + $0x3c4] sm:$0xf]  ;;  %v5568_v59 = vld [vmem:[%s12322_s1 + $0x3d8] sm:$0xf0]  ;;  %v5544_v8 = vld [vmem:[%s12322_s1 + $0x3a8] sm:$0xf0] }
  0x38   :  { %1861 = vmatpush.bf16.msrb.mxu0 %v5903_v48  ;;  %v6195_v48 = vor.u32 %v7862_v40, %v6192_v41  ;;  %v7754_v60 = vld [vmem:[%s12322_s1 + $0x544] sm:$0xf]  ;;  %v5760_v62 = vld [vmem:[%s12322_s1 + $0x558] sm:$0xf0]  ;;  %v5571_v3 = vor.u32 %v7706_v58, %v5568_v59  ;;  %v7748_v9 = vld [vmem:[%s12322_s1 + $0x514] sm:$0xf] }
  0x39   :  { %1875 = vmatpush.bf16.msrb.mxu1 %v6095_v49  ;;  %v5784_v49 = vld [vmem:[%s12322_s1 + $0x588] sm:$0xf0]  ;;  %v7802_v63 = vld [vmem:[%s12322_s1 + $0x6c4] sm:$0xf]  ;;  %v5952_v0 = vld [vmem:[%s12322_s1 + $0x6d8] sm:$0xf0]  ;;  %v5763_v4 = vor.u32 %v7754_v60, %v5760_v62 }
  0x3a   :  { %1889 = vmatpush.bf16.msrb.mxu2 %v5139_v50  ;;  %v7808_v50 = vld [vmem:[%s12322_s1 + $0x6f4] sm:$0xf]  ;;  %v5787_v55 = vor.u32 %v7760_v47, %v5784_v49  ;;  %v5955_v5 = vor.u32 %v7802_v63, %v5952_v0  ;;  %v5736_v11 = vld [vmem:[%s12322_s1 + $0x528] sm:$0xf0]  ;;  %v5520_v20 = vld [vmem:[%s12322_s1 + $0x378] sm:$0xf0] }
  0x3b   :  { %1903 = vmatpush.bf16.msrb.mxu3 %v5331_v54  ;;  %v5595_v54 = vor.u32 %v7712_v45, %v5592_v46  ;;  %v5979_v56 = vor.u32 %v7808_v50, %v5976_v51  ;;  %v7796_v12 = vld [vmem:[%s12322_s1 + $0x694] sm:$0xf]  ;;  %v5928_v13 = vld [vmem:[%s12322_s1 + $0x6a8] sm:$0xf0]  ;;  %v5739_v17 = vor.u32 %v7748_v9, %v5736_v11  ;;  %v7742_v21 = vld [vmem:[%s12322_s1 + $0x4e4] sm:$0xf] }
  0x3c   :  { %1862 = vmatpush.bf16.msrb.mxu0 %v5879_v61  ;;  %v6171_v61 = vor.u32 %v7856_v52, %v6168_v53  ;;  %v6120_v15 = vld [vmem:[%s12322_s1 + $0x828] sm:$0xf0]  ;;  %v5904_v27 = vld [vmem:[%s12322_s1 + $0x678] sm:$0xf0]  ;;  %v7838_v28 = vld [vmem:[%s12322_s1 + $0x7e4] sm:$0xf] }
  0x3d   :  { %1876 = vmatpush.bf16.msrb.mxu1 %v6071_v1  ;;  %v7850_v1 = vld [vmem:[%s12322_s1 + $0x844] sm:$0xf]  ;;  %v7688_v33 = vld [vmem:[%s12322_s1 + $0x334] sm:$0xf]  ;;  %v5688_v38 = vld [vmem:[%s12322_s1 + $0x4c8] sm:$0xf0] }
  0x3e   :  { %1890 = vmatpush.bf16.msrb.mxu2 %v5115_v2  ;;  %v6144_v2 = vld [vmem:[%s12322_s1 + $0x858] sm:$0xf0]  ;;  %v7736_v36 = vld [vmem:[%s12322_s1 + $0x4b4] sm:$0xf]  ;;  %v5880_v41 = vld [vmem:[%s12322_s1 + $0x648] sm:$0xf0] }
  0x3f   :  { %1904 = vmatpush.bf16.msrb.mxu3 %v5307_v7  ;;  %v7700_v7 = vld [vmem:[%s12322_s1 + $0x394] sm:$0xf]  ;;  %v6147_v10 = vor.u32 %v7850_v1, %v6144_v2  ;;  %v7682_v45 = vld [vmem:[%s12322_s1 + $0x304] sm:$0xf]  ;;  %v5472_v46 = vld [vmem:[%s12322_s1 + $0x318] sm:$0xf0]  ;;  %v5691_v47 = vor.u32 %v7736_v36, %v5688_v38 }
  0x40   :  { %1863 = vmatpush.bf16.msrb.mxu0 %v5855_v14  ;;  %v7844_v14 = vld [vmem:[%s12322_s1 + $0x814] sm:$0xf]  ;;  %v5547_v16 = vor.u32 %v7700_v7, %v5544_v8  ;;  %v7730_v49 = vld [vmem:[%s12322_s1 + $0x484] sm:$0xf]  ;;  %v5664_v50 = vld [vmem:[%s12322_s1 + $0x498] sm:$0xf0]  ;;  %v5475_v60 = vor.u32 %v7682_v45, %v5472_v46 }
  0x41   :  { %1877 = vmatpush.bf16.msrb.mxu1 %v6047_v18  ;;  %v5931_v18 = vor.u32 %v7796_v12, %v5928_v13  ;;  %v6123_v24 = vor.u32 %v7844_v14, %v6120_v15  ;;  %v7784_v40 = vld [vmem:[%s12322_s1 + $0x634] sm:$0xf]  ;;  %v7778_v51 = vld [vmem:[%s12322_s1 + $0x604] sm:$0xf]  ;;  %v5856_v53 = vld [vmem:[%s12322_s1 + $0x618] sm:$0xf0]  ;;  %v5667_v0 = vor.u32 %v7730_v49, %v5664_v50 }
  0x42   :  { %1891 = vmatpush.bf16.msrb.mxu2 %v5091_v19  ;;  %v7694_v19 = vld [vmem:[%s12322_s1 + $0x364] sm:$0xf]  ;;  %v7632_v58 = vld [vmem:[%s12322_s1 + $0x16c] sm:$0xf0]  ;;  %v5454_v59 = vld [vmem:[%s12322_s1 + $0x2d8] sm:$0xf]  ;;  %v5859_v1 = vor.u32 %v7778_v51, %v5856_v53 }
  0x43   :  { %1905 = vmatpush.bf16.msrb.mxu3 %v5283_v25  ;;  %1864 = vmatmul.bf16.vlgmr.msrb.gmra.mxu0 %v8736_v35  ;;  %v5712_v25 = vld [vmem:[%s12322_s1 + $0x4f8] sm:$0xf0]  ;;  %v5646_v62 = vld [vmem:[%s12322_s1 + $0x458] sm:$0xf]  ;;  %v7728_v63 = vld [vmem:[%s12322_s1 + $0x46c] sm:$0xf0] }
  0x44   :  { %1912 = vmatpush.bf16.msra.mxu0 %v5643_v26  ;;  %1878 = vmatmul.bf16.vlgmr.msrb.gmra.mxu1 %v8747_v39  ;;  %v7790_v26 = vld [vmem:[%s12322_s1 + $0x664] sm:$0xf]  ;;  %v5715_v31 = vor.u32 %v7742_v21, %v5712_v25  ;;  %v5838_v2 = vld [vmem:[%s12322_s1 + $0x5d8] sm:$0xf]  ;;  %v5647_v8 = vor.u32 %v7728_v63, %v5646_v62  ;;  %v5238_v9 = vld [vmem:[%s12322_s1 + $0x128] sm:$0xf] }
  0x45   :  { %1926 = vmatpush.bf16.msra.mxu1 %v5835_v29  ;;  %1892 = vmatmul.bf16.vlgmr.msrb.gmra.mxu2 %v8523_v57  ;;  %v6096_v29 = vld [vmem:[%s12322_s1 + $0x7f8] sm:$0xf0]  ;;  %v5907_v32 = vor.u32 %v7790_v26, %v5904_v27  ;;  %v5430_v11 = vld [vmem:[%s12322_s1 + $0x2a8] sm:$0xf]  ;;  %v7674_v13 = vld [vmem:[%s12322_s1 + $0x2bc] sm:$0xf0] }
  0x46   :  { %1940 = vmatpush.bf16.msra.mxu2 %v6027_v30  ;;  %1906 = vmatmul.bf16.vlgmr.msrb.gmra.mxu3 %v8553_v6  ;;  %v5523_v30 = vor.u32 %v7694_v19, %v5520_v20  ;;  %v6099_v37 = vor.u32 %v7838_v28, %v6096_v29  ;;  %v5622_v14 = vld [vmem:[%s12322_s1 + $0x428] sm:$0xf]  ;;  %v7722_v15 = vld [vmem:[%s12322_s1 + $0x43c] sm:$0xf0]  ;;  %v5431_v19 = vor.u32 %v7674_v13, %v5430_v11  ;;  %v5214_v21 = vld [vmem:[%s12322_s1 + $0xf8] sm:$0xf] }
  0x47   :  { %1954 = vmatpush.bf16.msra.mxu3 %v6219_v34  ;;  %v5496_v34 = vld [vmem:[%s12322_s1 + $0x348] sm:$0xf0]  ;;  %v5623_v20 = vor.u32 %v7722_v15, %v5622_v14  ;;  %v5406_v25 = vld [vmem:[%s12322_s1 + $0x278] sm:$0xf]  ;;  %v7668_v27 = vld [vmem:[%s12322_s1 + $0x28c] sm:$0xf0] }
  0x48   :  { %1913 = vmatpush.bf16.msra.mxu0 %v5619_v42  ;;  %v7832_v42 = vld [vmem:[%s12322_s1 + $0x7b4] sm:$0xf]  ;;  %v5598_v28 = vld [vmem:[%s12322_s1 + $0x3f8] sm:$0xf]  ;;  %v7716_v29 = vld [vmem:[%s12322_s1 + $0x40c] sm:$0xf0] }
  0x49   :  { %1927 = vmatpush.bf16.msra.mxu1 %v5811_v43  ;;  %v6072_v43 = vld [vmem:[%s12322_s1 + $0x7c8] sm:$0xf0]  ;;  %v5190_v36 = vld [vmem:[%s12322_s1 + $0xc8] sm:$0xf]  ;;  %v7758_v45 = vld [vmem:[%s12322_s1 + $0x55c] sm:$0xf0] }
  0x4a   :  { %1941 = vmatpush.bf16.msra.mxu2 %v6003_v44  ;;  %v5499_v44 = vor.u32 %v7688_v33, %v5496_v34  ;;  %v6075_v52 = vor.u32 %v7832_v42, %v6072_v43  ;;  %v5407_v33 = vor.u32 %v7668_v27, %v5406_v25  ;;  %v5599_v34 = vor.u32 %v7716_v29, %v5598_v28  ;;  %v5382_v38 = vld [vmem:[%s12322_s1 + $0x248] sm:$0xf]  ;;  %v7710_v43 = vld [vmem:[%s12322_s1 + $0x3dc] sm:$0xf0]  ;;  %v5166_v49 = vld [vmem:[%s12322_s1 + $0x98] sm:$0xf] }
  0x4b   :  { %1955 = vmatpush.bf16.msra.mxu3 %v6195_v48  ;;  %v5883_v48 = vor.u32 %v7784_v40, %v5880_v41  ;;  %v7662_v41 = vld [vmem:[%s12322_s1 + $0x25c] sm:$0xf0]  ;;  %v5574_v42 = vld [vmem:[%s12322_s1 + $0x3c8] sm:$0xf]  ;;  %v7608_v50 = vld [vmem:[%s12322_s1 + $0xac] sm:$0xf0] }
  0x4c   :  { %1914 = vmatpush.bf16.msra.mxu0 %v5595_v54  ;;  %v7826_v54 = vld [vmem:[%s12322_s1 + $0x784] sm:$0xf]  ;;  %v5358_v51 = vld [vmem:[%s12322_s1 + $0x218] sm:$0xf]  ;;  %v7656_v53 = vld [vmem:[%s12322_s1 + $0x22c] sm:$0xf0] }
  0x4d   :  { %1928 = vmatpush.bf16.msra.mxu1 %v5787_v55  ;;  %v6048_v55 = vld [vmem:[%s12322_s1 + $0x798] sm:$0xf0]  ;;  %v5142_v62 = vld [vmem:[%s12322_s1 + $0x68] sm:$0xf]  ;;  %v7602_v63 = vld [vmem:[%s12322_s1 + $0x7c] sm:$0xf0] }
  0x4e   :  { %1942 = vmatpush.bf16.msra.mxu2 %v5979_v56  ;;  %v5262_v56 = vld [vmem:[%s12322_s1 + $0x158] sm:$0xf]  ;;  %v7644_v15 = vld [vmem:[%s12322_s1 + $0x1cc] sm:$0xf0]  ;;  %v5286_v27 = vld [vmem:[%s12322_s1 + $0x188] sm:$0xf] }
  0x4f   :  { %1956 = vmatpush.bf16.msra.mxu3 %v6171_v61  ;;  %v7680_v61 = vld [vmem:[%s12322_s1 + $0x2ec] sm:$0xf0]  ;;  %v5118_v11 = vld [vmem:[%s12322_s1 + $0x38] sm:$0xf]  ;;  %v7638_v28 = vld [vmem:[%s12322_s1 + $0x19c] sm:$0xf0] }
  0x50   :  { %1915 = vmatpush.bf16.msra.mxu0 %v5571_v3  ;;  %v7776_v3 = vld [vmem:[%s12322_s1 + $0x5ec] sm:$0xf0]  ;;  %v5455_v7 = vor.u32 %v7680_v61, %v5454_v59  ;;  %v5167_v59 = vor.u32 %v7608_v50, %v5166_v49  ;;  %v5310_v13 = vld [vmem:[%s12322_s1 + $0x1b8] sm:$0xf]  ;;  %v5478_v29 = vld [vmem:[%s12322_s1 + $0x308] sm:$0xf] }
  0x51   :  { %1929 = vmatpush.bf16.msra.mxu1 %v5763_v4  ;;  %v6051_v4 = vor.u32 %v7826_v54, %v6048_v55  ;;  %v5839_v12 = vor.u32 %v7776_v3, %v5838_v2  ;;  %v5550_v54 = vld [vmem:[%s12322_s1 + $0x398] sm:$0xf]  ;;  %v7704_v55 = vld [vmem:[%s12322_s1 + $0x3ac] sm:$0xf0]  ;;  %v7650_v2 = vld [vmem:[%s12322_s1 + $0x1fc] sm:$0xf0]  ;;  %v5311_v25 = vor.u32 %v7644_v15, %v5310_v13 }
  0x52   :  { %1943 = vmatpush.bf16.msra.mxu2 %v5955_v5  ;;  %v5263_v5 = vor.u32 %v7632_v58, %v5262_v56  ;;  %v5742_v56 = vld [vmem:[%s12322_s1 + $0x518] sm:$0xf]  ;;  %v7752_v58 = vld [vmem:[%s12322_s1 + $0x52c] sm:$0xf0]  ;;  %v5551_v61 = vor.u32 %v7704_v55, %v5550_v54  ;;  %v5526_v3 = vld [vmem:[%s12322_s1 + $0x368] sm:$0xf] }
  0x53   :  { %1957 = vmatpush.bf16.msra.mxu3 %v6147_v10  ;;  %v7626_v10 = vld [vmem:[%s12322_s1 + $0x13c] sm:$0xf0]  ;;  %v5958_v13 = vld [vmem:[%s12322_s1 + $0x6c8] sm:$0xf] }
  0x54   :  { %1916 = vmatpush.bf16.msra.mxu0 %v5547_v16  ;;  %v5814_v16 = vld [vmem:[%s12322_s1 + $0x5a8] sm:$0xf]  ;;  %v7866_v55 = vld [vmem:[%s12322_s1 + $0x8bc] sm:$0xf0] }
  0x55   :  { %1930 = vmatpush.bf16.msra.mxu1 %v5739_v17  ;;  %v7770_v17 = vld [vmem:[%s12322_s1 + $0x5bc] sm:$0xf0]  ;;  %v6150_v15 = vld [vmem:[%s12322_s1 + $0x848] sm:$0xf] }
  0x56   :  { %1944 = vmatpush.bf16.msra.mxu2 %v5931_v18  ;;  %v5239_v18 = vor.u32 %v7626_v10, %v5238_v9  ;;  %v5815_v26 = vor.u32 %v7770_v17, %v5814_v16  ;;  %v5502_v16 = vld [vmem:[%s12322_s1 + $0x338] sm:$0xf]  ;;  %v7692_v17 = vld [vmem:[%s12322_s1 + $0x34c] sm:$0xf0] }
  0x57   :  { %1958 = vmatpush.bf16.msra.mxu3 %v6123_v24  ;;  %v7620_v24 = vld [vmem:[%s12322_s1 + $0x10c] sm:$0xf0] }
  0x58   :  { %1917 = vmatpush.bf16.msra.mxu0 %v5523_v30  ;;  %v5790_v30 = vld [vmem:[%s12322_s1 + $0x578] sm:$0xf] }
  0x59   :  { %1931 = vmatpush.bf16.msra.mxu1 %v5715_v31  ;;  %v7764_v31 = vld [vmem:[%s12322_s1 + $0x58c] sm:$0xf0] }
  0x5a   :  { %1945 = vmatpush.bf16.msra.mxu2 %v5907_v32  ;;  %v5215_v32 = vor.u32 %v7620_v24, %v5214_v21  ;;  %v5791_v40 = vor.u32 %v7764_v31, %v5790_v30  ;;  %v5094_v21 = vld [vmem:[%s12322_s1 + $0x8] sm:$0xf]  ;;  %v7590_v24 = vld [vmem:[%s12322_s1 + $0x1c] sm:$0xf0] }
  0x5b   :  { %1959 = vmatpush.bf16.msra.mxu3 %v6099_v37  ;;  %v7614_v37 = vld [vmem:[%s12322_s1 + $0xdc] sm:$0xf0] }
  0x5c   :  { %1918 = vmatpush.bf16.msra.mxu0 %v5499_v44  ;;  %v5766_v44 = vld [vmem:[%s12322_s1 + $0x548] sm:$0xf]  ;;  %v5191_v46 = vor.u32 %v7614_v37, %v5190_v36  ;;  %v7686_v31 = vld [vmem:[%s12322_s1 + $0x31c] sm:$0xf0]  ;;  %v7824_v36 = vld [vmem:[%s12322_s1 + $0x76c] sm:$0xf0] }
  0x5d   :  { %1932 = vmatpush.bf16.msra.mxu1 %v5691_v47  ;;  %v5383_v47 = vor.u32 %v7662_v41, %v5382_v38  ;;  %v6222_v37 = vld [vmem:[%s12322_s1 + $0x8d8] sm:$0xf]  ;;  %v5095_v38 = vor.u32 %v7590_v24, %v5094_v21  ;;  %v7629_v41 = vld [vmem:[%s12322_s1 + $0x15c] sm:$0xf]  ;;  %v5384_v21 = vld [vmem:[%s12322_s1 + $0x260] sm:$0xf0] }
  0x5e   :  { %1946 = vmatpush.bf16.msra.mxu2 %v5883_v48  ;;  %v5575_v48 = vor.u32 %v7710_v43, %v5574_v42  ;;  %v5264_v42 = vld [vmem:[%s12322_s1 + $0x170] sm:$0xf0]  ;;  %v5287_v43 = vor.u32 %v7638_v28, %v5286_v27  ;;  %v5934_v27 = vld [vmem:[%s12322_s1 + $0x698] sm:$0xf]  ;;  %v7800_v28 = vld [vmem:[%s12322_s1 + $0x6ac] sm:$0xf0] }
  0x5f   :  { %1960 = vmatpush.bf16.msra.mxu3 %v6075_v52  ;;  %v5767_v52 = vor.u32 %v7758_v45, %v5766_v44  ;;  %v5479_v44 = vor.u32 %v7686_v31, %v5478_v29  ;;  %v7677_v45 = vld [vmem:[%s12322_s1 + $0x2dc] sm:$0xf]  ;;  %v5267_v50 = vor.u32 %v7629_v41, %v5264_v42  ;;  %v6126_v29 = vld [vmem:[%s12322_s1 + $0x818] sm:$0xf]  ;;  %v7848_v31 = vld [vmem:[%s12322_s1 + $0x82c] sm:$0xf0] }
  0x60   :  { %1919 = vmatpush.bf16.msra.mxu0 %v5475_v60  ;;  %v5359_v60 = vor.u32 %v7656_v53, %v5358_v51  ;;  %v6006_v51 = vld [vmem:[%s12322_s1 + $0x728] sm:$0xf]  ;;  %v7794_v42 = vld [vmem:[%s12322_s1 + $0x67c] sm:$0xf0] }
  0x61   :  { %1933 = vmatpush.bf16.msra.mxu1 %v5667_v0  ;;  %v5334_v0 = vld [vmem:[%s12322_s1 + $0x1e8] sm:$0xf] }
  0x62   :  { %1947 = vmatpush.bf16.msra.mxu2 %v5859_v1  ;;  %v5743_v1 = vor.u32 %v7752_v58, %v5742_v56  ;;  %v5335_v9 = vor.u32 %v7650_v2, %v5334_v0  ;;  %v6198_v53 = vld [vmem:[%s12322_s1 + $0x8a8] sm:$0xf]  ;;  %v7623_v56 = vld [vmem:[%s12322_s1 + $0x12c] sm:$0xf]  ;;  %v5240_v58 = vld [vmem:[%s12322_s1 + $0x140] sm:$0xf0] }
  0x63   :  { %1961 = vmatpush.bf16.msra.mxu3 %v6051_v4  ;;  %1920 = vmatmul.bf16.vlgmr.msra.gmra.mxu0 %v8589_v22  ;;  %v7698_v4 = vld [vmem:[%s12322_s1 + $0x37c] sm:$0xf0]  ;;  %v5982_v0 = vld [vmem:[%s12322_s1 + $0x6f8] sm:$0xf]  ;;  %v5910_v41 = vld [vmem:[%s12322_s1 + $0x668] sm:$0xf] }
  0x64   :  { %1968 = vmatpush.bf16.msrb.mxu0 %v5263_v5  ;;  %1934 = vmatmul.bf16.vlgmr.msra.gmra.mxu1 %v8591_v23  ;;  %v5718_v5 = vld [vmem:[%s12322_s1 + $0x4e8] sm:$0xf]  ;;  %v5527_v10 = vor.u32 %v7698_v4, %v5526_v3  ;;  %v6174_v2 = vld [vmem:[%s12322_s1 + $0x878] sm:$0xf]  ;;  %v7860_v4 = vld [vmem:[%s12322_s1 + $0x88c] sm:$0xf0] }
  0x65   :  { %1982 = vmatpush.bf16.msrb.mxu1 %v5455_v7  ;;  %1948 = vmatmul.bf16.vlgmr.msra.gmra.mxu2 %v8736_v35  ;;  %v7746_v7 = vld [vmem:[%s12322_s1 + $0x4fc] sm:$0xf0] }
  0x66   :  { %1996 = vmatpush.bf16.msrb.mxu2 %v5647_v8  ;;  %1962 = vmatmul.bf16.vlgmr.msra.gmra.mxu3 %v8747_v39  ;;  %v5143_v8 = vor.u32 %v7602_v63, %v5142_v62  ;;  %v5719_v14 = vor.u32 %v7746_v7, %v5718_v5  ;;  %v6199_v62 = vor.u32 %v7866_v55, %v6198_v53  ;;  %v7617_v5 = vld [vmem:[%s12322_s1 + $0xfc] sm:$0xf]  ;;  %v5216_v7 = vld [vmem:[%s12322_s1 + $0x110] sm:$0xf0]  ;;  %v5886_v53 = vld [vmem:[%s12322_s1 + $0x638] sm:$0xf] }
  0x67   :  { %2010 = vmatpush.bf16.msrb.mxu3 %v5839_v12  ;;  %v7596_v12 = vld [vmem:[%s12322_s1 + $0x4c] sm:$0xf0]  ;;  %v5243_v63 = vor.u32 %v7623_v56, %v5240_v58  ;;  %v6078_v55 = vld [vmem:[%s12322_s1 + $0x7b8] sm:$0xf] }
  0x68   :  { %1969 = vmatpush.bf16.msrb.mxu0 %v5239_v18  ;;  %v5694_v18 = vld [vmem:[%s12322_s1 + $0x4b8] sm:$0xf]  ;;  %v7836_v58 = vld [vmem:[%s12322_s1 + $0x7cc] sm:$0xf0] }
  0x69   :  { %1983 = vmatpush.bf16.msrb.mxu1 %v5431_v19  ;;  %v7740_v19 = vld [vmem:[%s12322_s1 + $0x4cc] sm:$0xf0] }
  0x6a   :  { %1997 = vmatpush.bf16.msrb.mxu2 %v5623_v20  ;;  %v5119_v20 = vor.u32 %v7596_v12, %v5118_v11  ;;  %v5695_v30 = vor.u32 %v7740_v19, %v5694_v18  ;;  %v6175_v11 = vor.u32 %v7860_v4, %v6174_v2  ;;  %v5219_v12 = vor.u32 %v7617_v5, %v5216_v7  ;;  %v7611_v18 = vld [vmem:[%s12322_s1 + $0xcc] sm:$0xf]  ;;  %v5192_v19 = vld [vmem:[%s12322_s1 + $0xe0] sm:$0xf0]  ;;  %v6054_v4 = vld [vmem:[%s12322_s1 + $0x788] sm:$0xf] }
  0x6b   :  { %2011 = vmatpush.bf16.msrb.mxu3 %v5815_v26  ;;  %v5503_v26 = vor.u32 %v7692_v17, %v5502_v16  ;;  %v7854_v17 = vld [vmem:[%s12322_s1 + $0x85c] sm:$0xf0]  ;;  %v6079_v2 = vor.u32 %v7836_v58, %v6078_v55  ;;  %v7587_v7 = vld [vmem:[%s12322_s1 + $0xc] sm:$0xf] }
  0x6c   :  { %1970 = vmatpush.bf16.msrb.mxu0 %v5215_v32  ;;  %v5670_v32 = vld [vmem:[%s12322_s1 + $0x488] sm:$0xf]  ;;  %v7830_v5 = vld [vmem:[%s12322_s1 + $0x79c] sm:$0xf0]  ;;  %v7707_v55 = vld [vmem:[%s12322_s1 + $0x3cc] sm:$0xf] }
  0x6d   :  { %1984 = vmatpush.bf16.msrb.mxu1 %v5407_v33  ;;  %v7734_v33 = vld [vmem:[%s12322_s1 + $0x49c] sm:$0xf0]  ;;  %v7755_v58 = vld [vmem:[%s12322_s1 + $0x54c] sm:$0xf] }
  0x6e   :  { %1998 = vmatpush.bf16.msrb.mxu2 %v5599_v34  ;;  %v6030_v34 = vld [vmem:[%s12322_s1 + $0x758] sm:$0xf] }
  0x6f   :  { %2012 = vmatpush.bf16.msrb.mxu3 %v5791_v40  ;;  %v7872_v40 = vld [vmem:[%s12322_s1 + $0x8ec] sm:$0xf0] }
  0x70   :  { %1971 = vmatpush.bf16.msrb.mxu0 %v5191_v46  ;;  %v5456_v46 = vld [vmem:[%s12322_s1 + $0x2f0] sm:$0xf0]  ;;  %v6223_v49 = vor.u32 %v7872_v40, %v6222_v37  ;;  %v5935_v37 = vor.u32 %v7800_v28, %v5934_v27 }
  0x71   :  { %1985 = vmatpush.bf16.msrb.mxu1 %v5383_v47  ;;  %v5671_v47 = vor.u32 %v7734_v33, %v5670_v32  ;;  %v5459_v54 = vor.u32 %v7677_v45, %v5456_v46  ;;  %v7605_v32 = vld [vmem:[%s12322_s1 + $0x9c] sm:$0xf]  ;;  %v5168_v33 = vld [vmem:[%s12322_s1 + $0xb0] sm:$0xf0]  ;;  %v7842_v45 = vld [vmem:[%s12322_s1 + $0x7fc] sm:$0xf0] }
  0x72   :  { %1999 = vmatpush.bf16.msrb.mxu2 %v5575_v48  ;;  %v6031_v48 = vor.u32 %v7824_v36, %v6030_v34  ;;  %v7653_v34 = vld [vmem:[%s12322_s1 + $0x21c] sm:$0xf]  ;;  %v5360_v36 = vld [vmem:[%s12322_s1 + $0x230] sm:$0xf0]  ;;  %v5171_v40 = vor.u32 %v7605_v32, %v5168_v33  ;;  %v7599_v46 = vld [vmem:[%s12322_s1 + $0x6c] sm:$0xf] }
  0x73   :  { %2013 = vmatpush.bf16.msrb.mxu3 %v5767_v52  ;;  %v7818_v52 = vld [vmem:[%s12322_s1 + $0x73c] sm:$0xf0]  ;;  %v5816_v33 = vld [vmem:[%s12322_s1 + $0x5c0] sm:$0xf0] }
  0x74   :  { %1972 = vmatpush.bf16.msrb.mxu0 %v5167_v59  ;;  %v7671_v59 = vld [vmem:[%s12322_s1 + $0x2ac] sm:$0xf] }
  0x75   :  { %1986 = vmatpush.bf16.msrb.mxu1 %v5359_v60  ;;  %v5432_v60 = vld [vmem:[%s12322_s1 + $0x2c0] sm:$0xf0] }
  0x76   :  { %2000 = vmatpush.bf16.msrb.mxu2 %v5551_v61  ;;  %v6007_v61 = vor.u32 %v7818_v52, %v6006_v51  ;;  %v5435_v3 = vor.u32 %v7671_v59, %v5432_v60  ;;  %v7593_v59 = vld [vmem:[%s12322_s1 + $0x3c] sm:$0xf]  ;;  %v5120_v60 = vld [vmem:[%s12322_s1 + $0x50] sm:$0xf0] }
  0x77   :  { %2014 = vmatpush.bf16.msrb.mxu3 %v5743_v1  ;;  %v7812_v1 = vld [vmem:[%s12322_s1 + $0x70c] sm:$0xf0] }
  0x78   :  { %1973 = vmatpush.bf16.msrb.mxu0 %v5143_v8  ;;  %v7665_v8 = vld [vmem:[%s12322_s1 + $0x27c] sm:$0xf] }
  0x79   :  { %1987 = vmatpush.bf16.msrb.mxu1 %v5335_v9  ;;  %v5408_v9 = vld [vmem:[%s12322_s1 + $0x290] sm:$0xf0] }
  0x7a   :  { %2001 = vmatpush.bf16.msrb.mxu2 %v5527_v10  ;;  %v5983_v10 = vor.u32 %v7812_v1, %v5982_v0  ;;  %v5411_v16 = vor.u32 %v7665_v8, %v5408_v9  ;;  %v5862_v0 = vld [vmem:[%s12322_s1 + $0x608] sm:$0xf]  ;;  %v7782_v1 = vld [vmem:[%s12322_s1 + $0x61c] sm:$0xf0]  ;;  %v5096_v9 = vld [vmem:[%s12322_s1 + $0x20] sm:$0xf0] }
  0x7b   :  { %2015 = vmatpush.bf16.msrb.mxu3 %v5719_v14  ;;  %v7806_v14 = vld [vmem:[%s12322_s1 + $0x6dc] sm:$0xf0] }
  0x7c   :  { %1974 = vmatpush.bf16.msrb.mxu0 %v5119_v20  ;;  %v7659_v20 = vld [vmem:[%s12322_s1 + $0x24c] sm:$0xf]  ;;  %v5959_v24 = vor.u32 %v7806_v14, %v5958_v13  ;;  %v5648_v13 = vld [vmem:[%s12322_s1 + $0x470] sm:$0xf0]  ;;  %v7773_v14 = vld [vmem:[%s12322_s1 + $0x5dc] sm:$0xf] }
  0x7d   :  { %1988 = vmatpush.bf16.msrb.mxu1 %v5311_v25  ;;  %v6151_v25 = vor.u32 %v7854_v17, %v6150_v15  ;;  %v5863_v15 = vor.u32 %v7782_v1, %v5862_v0  ;;  %v7821_v17 = vld [vmem:[%s12322_s1 + $0x75c] sm:$0xf]  ;;  %v6152_v0 = vld [vmem:[%s12322_s1 + $0x860] sm:$0xf0] }
  0x7e   :  { %2002 = vmatpush.bf16.msrb.mxu2 %v5503_v26  ;;  %v5195_v26 = vor.u32 %v7611_v18, %v5192_v19  ;;  %v6032_v18 = vld [vmem:[%s12322_s1 + $0x770] sm:$0xf0]  ;;  %v6055_v19 = vor.u32 %v7830_v5, %v6054_v4  ;;  %v7701_v4 = vld [vmem:[%s12322_s1 + $0x39c] sm:$0xf] }
  0x7f   :  { %2016 = vmatpush.bf16.msrb.mxu3 %v5695_v30  ;;  %v5387_v30 = vor.u32 %v7659_v20, %v5384_v21  ;;  %v5099_v20 = vor.u32 %v7587_v7, %v5096_v9  ;;  %v7869_v21 = vld [vmem:[%s12322_s1 + $0x8dc] sm:$0xf]  ;;  %v6035_v28 = vor.u32 %v7821_v17, %v6032_v18  ;;  %v5552_v5 = vld [vmem:[%s12322_s1 + $0x3b0] sm:$0xf0]  ;;  %v7695_v17 = vld [vmem:[%s12322_s1 + $0x36c] sm:$0xf] }
  0x80   :  { %1975 = vmatpush.bf16.msrb.mxu0 %v5095_v38  ;;  %v6127_v38 = vor.u32 %v7848_v31, %v6126_v29  ;;  %v7719_v29 = vld [vmem:[%s12322_s1 + $0x42c] sm:$0xf]  ;;  %v7749_v7 = vld [vmem:[%s12322_s1 + $0x51c] sm:$0xf]  ;;  %v5744_v9 = vld [vmem:[%s12322_s1 + $0x530] sm:$0xf0] }
  0x81   :  { %1989 = vmatpush.bf16.msrb.mxu1 %v5287_v43  ;;  %v6102_v43 = vld [vmem:[%s12322_s1 + $0x7e8] sm:$0xf]  ;;  %v7767_v31 = vld [vmem:[%s12322_s1 + $0x5ac] sm:$0xf]  ;;  %v5528_v18 = vld [vmem:[%s12322_s1 + $0x380] sm:$0xf0] }
  0x82   :  { %2003 = vmatpush.bf16.msrb.mxu2 %v5479_v44  ;;  %v5363_v44 = vor.u32 %v7653_v34, %v5360_v36  ;;  %v6103_v51 = vor.u32 %v7842_v45, %v6102_v43  ;;  %v7815_v34 = vld [vmem:[%s12322_s1 + $0x72c] sm:$0xf]  ;;  %v6008_v36 = vld [vmem:[%s12322_s1 + $0x740] sm:$0xf0]  ;;  %v7713_v43 = vld [vmem:[%s12322_s1 + $0x3fc] sm:$0xf] }
  0x83   :  { %2017 = vmatpush.bf16.msrb.mxu3 %v5671_v47  ;;  %1976 = vmatmul.bf16.vlgmr.msrb.gmra.mxu0 %v8523_v57  ;;  %v5144_v47 = vld [vmem:[%s12322_s1 + $0x80] sm:$0xf0]  ;;  %v7761_v45 = vld [vmem:[%s12322_s1 + $0x57c] sm:$0xf] }
  0x84   :  { %2024 = vmatpush.bf16.msra.mxu0 %v6031_v48  ;;  %1990 = vmatmul.bf16.vlgmr.msrb.gmra.mxu1 %v8553_v6  ;;  %v7647_v48 = vld [vmem:[%s12322_s1 + $0x1ec] sm:$0xf]  ;;  %v5147_v52 = vor.u32 %v7599_v46, %v5144_v47  ;;  %v5792_v47 = vld [vmem:[%s12322_s1 + $0x590] sm:$0xf0] }
  0x85   :  { %2038 = vmatpush.bf16.msra.mxu1 %v6223_v49  ;;  %2004 = vmatmul.bf16.vlgmr.msrb.gmra.mxu2 %v8589_v22  ;;  %v5336_v49 = vld [vmem:[%s12322_s1 + $0x200] sm:$0xf0] }
  0x86   :  { %2052 = vmatpush.bf16.msra.mxu2 %v5267_v50  ;;  %2018 = vmatmul.bf16.vlgmr.msrb.gmra.mxu3 %v8591_v23  ;;  %v5911_v50 = vor.u32 %v7794_v42, %v5910_v41  ;;  %v5339_v56 = vor.u32 %v7647_v48, %v5336_v49  ;;  %v5819_v41 = vor.u32 %v7767_v31, %v5816_v33  ;;  %v7809_v48 = vld [vmem:[%s12322_s1 + $0x6fc] sm:$0xf]  ;;  %v5984_v49 = vld [vmem:[%s12322_s1 + $0x710] sm:$0xf0] }
  0x87   :  { %2066 = vmatpush.bf16.msra.mxu3 %v5459_v54  ;;  %v7788_v54 = vld [vmem:[%s12322_s1 + $0x64c] sm:$0xf0]  ;;  %v6011_v42 = vor.u32 %v7815_v34, %v6008_v36  ;;  %v7689_v31 = vld [vmem:[%s12322_s1 + $0x33c] sm:$0xf]  ;;  %v5696_v36 = vld [vmem:[%s12322_s1 + $0x4d0] sm:$0xf0] }
  0x88   :  { %2025 = vmatpush.bf16.msra.mxu0 %v6007_v61  ;;  %v7641_v61 = vld [vmem:[%s12322_s1 + $0x1bc] sm:$0xf] }
  0x89   :  { %2039 = vmatpush.bf16.msra.mxu1 %v6199_v62  ;;  %v5312_v62 = vld [vmem:[%s12322_s1 + $0x1d0] sm:$0xf0]  ;;  %v7737_v33 = vld [vmem:[%s12322_s1 + $0x4bc] sm:$0xf] }
  0x8a   :  { %2053 = vmatpush.bf16.msra.mxu2 %v5243_v63  ;;  %v5887_v63 = vor.u32 %v7788_v54, %v5886_v53  ;;  %v5315_v8 = vor.u32 %v7641_v61, %v5312_v62  ;;  %v5795_v53 = vor.u32 %v7761_v45, %v5792_v47  ;;  %v5987_v54 = vor.u32 %v7809_v48, %v5984_v49  ;;  %v7803_v61 = vld [vmem:[%s12322_s1 + $0x6cc] sm:$0xf]  ;;  %v5960_v62 = vld [vmem:[%s12322_s1 + $0x6e0] sm:$0xf0] }
  0x8b   :  { %2067 = vmatpush.bf16.msra.mxu3 %v5435_v3  ;;  %v5123_v3 = vor.u32 %v7593_v59, %v5120_v60  ;;  %v5768_v60 = vld [vmem:[%s12322_s1 + $0x560] sm:$0xf0]  ;;  %v5699_v45 = vor.u32 %v7737_v33, %v5696_v36  ;;  %v7731_v47 = vld [vmem:[%s12322_s1 + $0x48c] sm:$0xf]  ;;  %v5198_v33 = vld [vmem:[%s12322_s1 + $0xd0] sm:$0xf] }
  0x8c   :  { %2026 = vmatpush.bf16.msra.mxu0 %v5983_v10  ;;  %v7635_v10 = vld [vmem:[%s12322_s1 + $0x18c] sm:$0xf]  ;;  %v5672_v48 = vld [vmem:[%s12322_s1 + $0x4a0] sm:$0xf0]  ;;  %v5390_v36 = vld [vmem:[%s12322_s1 + $0x250] sm:$0xf] }
  0x8d   :  { %2040 = vmatpush.bf16.msra.mxu1 %v6175_v11  ;;  %v5288_v11 = vld [vmem:[%s12322_s1 + $0x1a0] sm:$0xf0]  ;;  %v7779_v49 = vld [vmem:[%s12322_s1 + $0x60c] sm:$0xf] }
  0x8e   :  { %2054 = vmatpush.bf16.msra.mxu2 %v5219_v12  ;;  %v7725_v12 = vld [vmem:[%s12322_s1 + $0x45c] sm:$0xf] }
  0x8f   :  { %2068 = vmatpush.bf16.msra.mxu3 %v5411_v16  ;;  %v5840_v16 = vld [vmem:[%s12322_s1 + $0x5f0] sm:$0xf0] }
  0x90   :  { %2027 = vmatpush.bf16.msra.mxu0 %v5959_v24  ;;  %v6224_v24 = vld [vmem:[%s12322_s1 + $0x8f0] sm:$0xf0]  ;;  %v5843_v27 = vor.u32 %v7773_v14, %v5840_v16  ;;  %v5555_v14 = vor.u32 %v7701_v4, %v5552_v5 }
  0x91   :  { %2041 = vmatpush.bf16.msra.mxu1 %v6151_v25  ;;  %v5291_v25 = vor.u32 %v7635_v10, %v5288_v11  ;;  %v6227_v32 = vor.u32 %v7869_v21, %v6224_v24  ;;  %v7797_v10 = vld [vmem:[%s12322_s1 + $0x69c] sm:$0xf]  ;;  %v5936_v11 = vld [vmem:[%s12322_s1 + $0x6b0] sm:$0xf0]  ;;  %v5720_v21 = vld [vmem:[%s12322_s1 + $0x500] sm:$0xf0] }
  0x92   :  { %2055 = vmatpush.bf16.msra.mxu2 %v5195_v26  ;;  %v5651_v26 = vor.u32 %v7725_v12, %v5648_v13  ;;  %v7845_v12 = vld [vmem:[%s12322_s1 + $0x81c] sm:$0xf]  ;;  %v6128_v13 = vld [vmem:[%s12322_s1 + $0x830] sm:$0xf0]  ;;  %v5939_v16 = vor.u32 %v7797_v10, %v5936_v11  ;;  %v7791_v24 = vld [vmem:[%s12322_s1 + $0x66c] sm:$0xf] }
  0x93   :  { %2069 = vmatpush.bf16.msra.mxu3 %v5387_v30  ;;  %v5624_v30 = vld [vmem:[%s12322_s1 + $0x440] sm:$0xf0]  ;;  %v7675_v11 = vld [vmem:[%s12322_s1 + $0x2c4] sm:$0xf0] }
  0x94   :  { %2028 = vmatpush.bf16.msra.mxu0 %v5935_v37  ;;  %v7863_v37 = vld [vmem:[%s12322_s1 + $0x8ac] sm:$0xf] }
  0x95   :  { %2042 = vmatpush.bf16.msra.mxu1 %v6127_v38  ;;  %v6200_v38 = vld [vmem:[%s12322_s1 + $0x8c0] sm:$0xf0] }
  0x96   :  { %2056 = vmatpush.bf16.msra.mxu2 %v5171_v40  ;;  %v5627_v40 = vor.u32 %v7719_v29, %v5624_v30  ;;  %v6203_v46 = vor.u32 %v7863_v37, %v6200_v38  ;;  %v7785_v37 = vld [vmem:[%s12322_s1 + $0x63c] sm:$0xf]  ;;  %v5888_v38 = vld [vmem:[%s12322_s1 + $0x650] sm:$0xf0] }
  0x97   :  { %2070 = vmatpush.bf16.msra.mxu3 %v5363_v44  ;;  %v5600_v44 = vld [vmem:[%s12322_s1 + $0x410] sm:$0xf0] }
  0x98   :  { %2029 = vmatpush.bf16.msra.mxu0 %v5911_v50  ;;  %v7857_v50 = vld [vmem:[%s12322_s1 + $0x87c] sm:$0xf] }
  0x99   :  { %2043 = vmatpush.bf16.msra.mxu1 %v6103_v51  ;;  %v6176_v51 = vld [vmem:[%s12322_s1 + $0x890] sm:$0xf0] }
  0x9a   :  { %2057 = vmatpush.bf16.msra.mxu2 %v5147_v52  ;;  %v5603_v52 = vor.u32 %v7713_v43, %v5600_v44  ;;  %v6179_v59 = vor.u32 %v7857_v50, %v6176_v51  ;;  %v7683_v43 = vld [vmem:[%s12322_s1 + $0x30c] sm:$0xf]  ;;  %v5480_v44 = vld [vmem:[%s12322_s1 + $0x320] sm:$0xf0] }
  0x9b   :  { %2071 = vmatpush.bf16.msra.mxu3 %v5339_v56  ;;  %v5576_v56 = vld [vmem:[%s12322_s1 + $0x3e0] sm:$0xf0] }
  0x9c   :  { %2030 = vmatpush.bf16.msra.mxu0 %v5887_v63  ;;  %v7851_v63 = vld [vmem:[%s12322_s1 + $0x84c] sm:$0xf]  ;;  %v5579_v1 = vor.u32 %v7707_v55, %v5576_v56  ;;  %v5864_v51 = vld [vmem:[%s12322_s1 + $0x620] sm:$0xf0]  ;;  %v7633_v55 = vld [vmem:[%s12322_s1 + $0x174] sm:$0xf0] }
  0x9d   :  { %2044 = vmatpush.bf16.msra.mxu1 %v6079_v2  ;;  %v5771_v2 = vor.u32 %v7755_v58, %v5768_v60  ;;  %v5462_v56 = vld [vmem:[%s12322_s1 + $0x2e0] sm:$0xf]  ;;  %v5483_v58 = vor.u32 %v7683_v43, %v5480_v44  ;;  %v7759_v43 = vld [vmem:[%s12322_s1 + $0x564] sm:$0xf0] }
  0x9e   :  { %2058 = vmatpush.bf16.msra.mxu2 %v5123_v3  ;;  %v5963_v3 = vor.u32 %v7803_v61, %v5960_v62  ;;  %v5654_v60 = vld [vmem:[%s12322_s1 + $0x460] sm:$0xf]  ;;  %v7729_v61 = vld [vmem:[%s12322_s1 + $0x474] sm:$0xf0]  ;;  %v5675_v62 = vor.u32 %v7731_v47, %v5672_v48 }
  0x9f   :  { %2072 = vmatpush.bf16.msra.mxu3 %v5315_v8  ;;  %v6155_v8 = vor.u32 %v7851_v63, %v6152_v0  ;;  %v5867_v63 = vor.u32 %v7779_v49, %v5864_v51  ;;  %v5846_v0 = vld [vmem:[%s12322_s1 + $0x5e0] sm:$0xf]  ;;  %v5655_v5 = vor.u32 %v7729_v61, %v5654_v60  ;;  %v7609_v48 = vld [vmem:[%s12322_s1 + $0xb4] sm:$0xf0]  ;;  %v5150_v60 = vld [vmem:[%s12322_s1 + $0x70] sm:$0xf] }
  0xa0   :  { %2031 = vmatpush.bf16.msra.mxu0 %v5863_v15  ;;  %v5747_v15 = vor.u32 %v7749_v7, %v5744_v9  ;;  %v5246_v7 = vld [vmem:[%s12322_s1 + $0x130] sm:$0xf]  ;;  %v5174_v47 = vld [vmem:[%s12322_s1 + $0xa0] sm:$0xf]  ;;  %v7657_v51 = vld [vmem:[%s12322_s1 + $0x234] sm:$0xf0] }
  0xa1   :  { %2045 = vmatpush.bf16.msra.mxu1 %v6055_v19  ;;  %v7743_v19 = vld [vmem:[%s12322_s1 + $0x4ec] sm:$0xf]  ;;  %v5438_v9 = vld [vmem:[%s12322_s1 + $0x2b0] sm:$0xf]  ;;  %v5366_v49 = vld [vmem:[%s12322_s1 + $0x220] sm:$0xf] }
  0xa2   :  { %2059 = vmatpush.bf16.msra.mxu2 %v5099_v20  ;;  %v6131_v20 = vor.u32 %v7845_v12, %v6128_v13  ;;  %v5723_v29 = vor.u32 %v7743_v19, %v5720_v21  ;;  %v5630_v12 = vld [vmem:[%s12322_s1 + $0x430] sm:$0xf]  ;;  %v7723_v13 = vld [vmem:[%s12322_s1 + $0x444] sm:$0xf0]  ;;  %v5222_v19 = vld [vmem:[%s12322_s1 + $0x100] sm:$0xf] }
  0xa3   :  { %2073 = vmatpush.bf16.msra.mxu3 %v5291_v25  ;;  %2032 = vmatmul.bf16.vlgmr.msra.gmra.mxu0 %v8736_v35  ;;  %v5912_v25 = vld [vmem:[%s12322_s1 + $0x680] sm:$0xf0]  ;;  %v5414_v21 = vld [vmem:[%s12322_s1 + $0x280] sm:$0xf]  ;;  %v7603_v61 = vld [vmem:[%s12322_s1 + $0x84] sm:$0xf0] }
  0xa4   :  { %2080 = vmatpush.bf16.msrb.mxu0 %v5651_v26  ;;  %2046 = vmatmul.bf16.vlgmr.msra.gmra.mxu1 %v8747_v39  ;;  %v7839_v26 = vld [vmem:[%s12322_s1 + $0x7ec] sm:$0xf]  ;;  %v5915_v30 = vor.u32 %v7791_v24, %v5912_v25  ;;  %v7669_v25 = vld [vmem:[%s12322_s1 + $0x294] sm:$0xf0] }
  0xa5   :  { %2094 = vmatpush.bf16.msrb.mxu1 %v5843_v27  ;;  %2060 = vmatmul.bf16.vlgmr.msra.gmra.mxu2 %v8523_v57  ;;  %v6104_v27 = vld [vmem:[%s12322_s1 + $0x800] sm:$0xf0] }
  0xa6   :  { %2108 = vmatpush.bf16.msrb.mxu2 %v6035_v28  ;;  %2074 = vmatmul.bf16.vlgmr.msra.gmra.mxu3 %v8553_v6  ;;  %v5531_v28 = vor.u32 %v7695_v17, %v5528_v18  ;;  %v6107_v34 = vor.u32 %v7839_v26, %v6104_v27  ;;  %v5439_v17 = vor.u32 %v7675_v11, %v5438_v9  ;;  %v5606_v26 = vld [vmem:[%s12322_s1 + $0x400] sm:$0xf]  ;;  %v7717_v27 = vld [vmem:[%s12322_s1 + $0x414] sm:$0xf0] }
  0xa7   :  { %2122 = vmatpush.bf16.msrb.mxu3 %v6227_v32  ;;  %v5504_v32 = vld [vmem:[%s12322_s1 + $0x350] sm:$0xf0]  ;;  %v5631_v18 = vor.u32 %v7723_v13, %v5630_v12  ;;  %v5126_v9 = vld [vmem:[%s12322_s1 + $0x40] sm:$0xf]  ;;  %v7645_v13 = vld [vmem:[%s12322_s1 + $0x1d4] sm:$0xf0] }
  0xa8   :  { %2081 = vmatpush.bf16.msrb.mxu0 %v5627_v40  ;;  %v7833_v40 = vld [vmem:[%s12322_s1 + $0x7bc] sm:$0xf]  ;;  %v5318_v11 = vld [vmem:[%s12322_s1 + $0x1c0] sm:$0xf] }
  0xa9   :  { %2095 = vmatpush.bf16.msrb.mxu1 %v5819_v41  ;;  %v6080_v41 = vld [vmem:[%s12322_s1 + $0x7d0] sm:$0xf0] }
  0xaa   :  { %2109 = vmatpush.bf16.msrb.mxu2 %v6011_v42  ;;  %v5507_v42 = vor.u32 %v7689_v31, %v5504_v32  ;;  %v6083_v50 = vor.u32 %v7833_v40, %v6080_v41  ;;  %v5415_v31 = vor.u32 %v7669_v25, %v5414_v21  ;;  %v5607_v32 = vor.u32 %v7717_v27, %v5606_v26  ;;  %v5582_v40 = vld [vmem:[%s12322_s1 + $0x3d0] sm:$0xf]  ;;  %v7711_v41 = vld [vmem:[%s12322_s1 + $0x3e4] sm:$0xf0]  ;;  %v9669_v21 = vpop.f32.mrf.mxu0 }
  0xab   :  { %2123 = vmatpush.bf16.msrb.mxu3 %v6203_v46  ;;  %v5891_v46 = vor.u32 %v7785_v37, %v5888_v38  ;;  %v7663_v38 = vld [vmem:[%s12322_s1 + $0x264] sm:$0xf0]  ;;  %v5294_v26 = vld [vmem:[%s12322_s1 + $0x190] sm:$0xf] }
  0xac   :  { %2082 = vmatpush.bf16.msrb.mxu0 %v5603_v52  ;;  %v7827_v52 = vld [vmem:[%s12322_s1 + $0x78c] sm:$0xf]  ;;  %v7639_v27 = vld [vmem:[%s12322_s1 + $0x1a4] sm:$0xf0] }
  0xad   :  { %2096 = vmatpush.bf16.msrb.mxu1 %v5795_v53  ;;  %v6056_v53 = vld [vmem:[%s12322_s1 + $0x7a0] sm:$0xf0] }
  0xae   :  { %2110 = vmatpush.bf16.msrb.mxu2 %v5987_v54  ;;  %v5270_v54 = vld [vmem:[%s12322_s1 + $0x160] sm:$0xf] }
  0xaf   :  { %2124 = vmatpush.bf16.msrb.mxu3 %v6179_v59  ;;  %v7681_v59 = vld [vmem:[%s12322_s1 + $0x2f4] sm:$0xf0] }
  0xb0   :  { %2083 = vmatpush.bf16.msrb.mxu0 %v5579_v1  ;;  %v7777_v1 = vld [vmem:[%s12322_s1 + $0x5f4] sm:$0xf0]  ;;  %v5463_v4 = vor.u32 %v7681_v59, %v5462_v56  ;;  %v5175_v56 = vor.u32 %v7609_v48, %v5174_v47 }
  0xb1   :  { %2097 = vmatpush.bf16.msrb.mxu1 %v5771_v2  ;;  %v6059_v2 = vor.u32 %v7827_v52, %v6056_v53  ;;  %v5847_v10 = vor.u32 %v7777_v1, %v5846_v0  ;;  %v5558_v52 = vld [vmem:[%s12322_s1 + $0x3a0] sm:$0xf]  ;;  %v7705_v53 = vld [vmem:[%s12322_s1 + $0x3b4] sm:$0xf0]  ;;  %v7651_v0 = vld [vmem:[%s12322_s1 + $0x204] sm:$0xf0] }
  0xb2   :  { %2111 = vmatpush.bf16.msrb.mxu2 %v5963_v3  ;;  %v5271_v3 = vor.u32 %v7633_v55, %v5270_v54  ;;  %v5750_v54 = vld [vmem:[%s12322_s1 + $0x520] sm:$0xf]  ;;  %v7753_v55 = vld [vmem:[%s12322_s1 + $0x534] sm:$0xf0]  ;;  %v5559_v59 = vor.u32 %v7705_v53, %v5558_v52  ;;  %v5534_v1 = vld [vmem:[%s12322_s1 + $0x370] sm:$0xf] }
  0xb3   :  { %2125 = vmatpush.bf16.msrb.mxu3 %v6155_v8  ;;  %v7627_v8 = vld [vmem:[%s12322_s1 + $0x144] sm:$0xf0]  ;;  %v6206_v53 = vld [vmem:[%s12322_s1 + $0x8b0] sm:$0xf] }
  0xb4   :  { %2084 = vmatpush.bf16.msrb.mxu0 %v5555_v14  ;;  %v5822_v14 = vld [vmem:[%s12322_s1 + $0x5b0] sm:$0xf]  ;;  %v7819_v52 = vld [vmem:[%s12322_s1 + $0x744] sm:$0xf0] }
  0xb5   :  { %2098 = vmatpush.bf16.msrb.mxu1 %v5747_v15  ;;  %v7771_v15 = vld [vmem:[%s12322_s1 + $0x5c4] sm:$0xf0] }
  0xb6   :  { %2112 = vmatpush.bf16.msrb.mxu2 %v5939_v16  ;;  %v5247_v16 = vor.u32 %v7627_v8, %v5246_v7  ;;  %v5823_v24 = vor.u32 %v7771_v15, %v5822_v14  ;;  %v5510_v14 = vld [vmem:[%s12322_s1 + $0x340] sm:$0xf]  ;;  %v7693_v15 = vld [vmem:[%s12322_s1 + $0x354] sm:$0xf0] }
  0xb7   :  { %2126 = vmatpush.bf16.msrb.mxu3 %v6131_v20  ;;  %v7621_v20 = vld [vmem:[%s12322_s1 + $0x114] sm:$0xf0]  ;;  %v5511_v25 = vor.u32 %v7693_v15, %v5510_v14 }
  0xb8   :  { %2085 = vmatpush.bf16.msrb.mxu0 %v5531_v28  ;;  %v5798_v28 = vld [vmem:[%s12322_s1 + $0x580] sm:$0xf] }
  0xb9   :  { %2099 = vmatpush.bf16.msrb.mxu1 %v5723_v29  ;;  %v7765_v29 = vld [vmem:[%s12322_s1 + $0x594] sm:$0xf0] }
  0xba   :  { %2113 = vmatpush.bf16.msrb.mxu2 %v5915_v30  ;;  %v5223_v30 = vor.u32 %v7621_v20, %v5222_v19  ;;  %v5799_v37 = vor.u32 %v7765_v29, %v5798_v28  ;;  %v5102_v19 = vld [vmem:[%s12322_s1 + $0x10] sm:$0xf]  ;;  %v7591_v20 = vld [vmem:[%s12322_s1 + $0x24] sm:$0xf0]  ;;  %v9680_v29 = vpop.f32.mrf.mxu1 }
  0xbb   :  { %2127 = vmatpush.bf16.msrb.mxu3 %v6107_v34  ;;  %v7615_v34 = vld [vmem:[%s12322_s1 + $0xe4] sm:$0xf0]  ;;  %v5486_v28 = vld [vmem:[%s12322_s1 + $0x310] sm:$0xf] }
  0xbc   :  { %2086 = vmatpush.bf16.msrb.mxu0 %v5507_v42  ;;  %v5774_v42 = vld [vmem:[%s12322_s1 + $0x550] sm:$0xf]  ;;  %v5199_v44 = vor.u32 %v7615_v34, %v5198_v33  ;;  %v7735_v33 = vld [vmem:[%s12322_s1 + $0x4a4] sm:$0xf0]  ;;  %v6038_v34 = vld [vmem:[%s12322_s1 + $0x760] sm:$0xf] }
  0xbd   :  { %2100 = vmatpush.bf16.msrb.mxu1 %v5699_v45  ;;  %v5391_v45 = vor.u32 %v7663_v38, %v5390_v36  ;;  %v7825_v36 = vld [vmem:[%s12322_s1 + $0x774] sm:$0xf0]  ;;  %v5103_v38 = vor.u32 %v7591_v20, %v5102_v19  ;;  %v6158_v19 = vld [vmem:[%s12322_s1 + $0x850] sm:$0xf] }
  0xbe   :  { %2114 = vmatpush.bf16.msrb.mxu2 %v5891_v46  ;;  %v5583_v46 = vor.u32 %v7711_v41, %v5582_v40  ;;  %v7873_v40 = vld [vmem:[%s12322_s1 + $0x8f4] sm:$0xf0]  ;;  %v7630_v41 = vld [vmem:[%s12322_s1 + $0x164] sm:$0xf]  ;;  %v6039_v48 = vor.u32 %v7825_v36, %v6038_v34  ;;  %v5942_v34 = vld [vmem:[%s12322_s1 + $0x6a0] sm:$0xf] }
  0xbf   :  { %2128 = vmatpush.bf16.msrb.mxu3 %v6083_v50  ;;  %v5775_v50 = vor.u32 %v7759_v43, %v5774_v42  ;;  %v5272_v42 = vld [vmem:[%s12322_s1 + $0x178] sm:$0xf0]  ;;  %v5295_v43 = vor.u32 %v7639_v27, %v5294_v26  ;;  %v5200_v26 = vld [vmem:[%s12322_s1 + $0xe8] sm:$0xf0]  ;;  %v7660_v27 = vld [vmem:[%s12322_s1 + $0x254] sm:$0xf] }
  0xc0   :  { %2087 = vmatpush.bf16.msrb.mxu0 %v5483_v58  ;;  %v5367_v58 = vor.u32 %v7657_v51, %v5366_v49  ;;  %v6014_v51 = vld [vmem:[%s12322_s1 + $0x730] sm:$0xf]  ;;  %v7801_v36 = vld [vmem:[%s12322_s1 + $0x6b4] sm:$0xf0] }
  0xc1   :  { %2101 = vmatpush.bf16.msrb.mxu1 %v5675_v62  ;;  %v5342_v62 = vld [vmem:[%s12322_s1 + $0x1f0] sm:$0xf] }
  0xc2   :  { %2115 = vmatpush.bf16.msrb.mxu2 %v5867_v63  ;;  %v5751_v63 = vor.u32 %v7753_v55, %v5750_v54  ;;  %v5343_v7 = vor.u32 %v7651_v0, %v5342_v62  ;;  %v7867_v55 = vld [vmem:[%s12322_s1 + $0x8c4] sm:$0xf0]  ;;  %v6015_v62 = vor.u32 %v7819_v52, %v6014_v51  ;;  %v5918_v51 = vld [vmem:[%s12322_s1 + $0x670] sm:$0xf] }
  0xc3   :  { %2129 = vmatpush.bf16.msrb.mxu3 %v6059_v2  ;;  %2088 = vmatmul.bf16.vlgmr.msrb.gmra.mxu0 %v8589_v22  ;;  %v7699_v2 = vld [vmem:[%s12322_s1 + $0x384] sm:$0xf0]  ;;  %v6207_v0 = vor.u32 %v7867_v55, %v6206_v53  ;;  %v6110_v53 = vld [vmem:[%s12322_s1 + $0x7f0] sm:$0xf] }
  0xc4   :  { %2136 = vmatpush.bf16.msra.mxu0 %v5271_v3  ;;  %2102 = vmatmul.bf16.vlgmr.msrb.gmra.mxu1 %v8591_v23  ;;  %v5726_v3 = vld [vmem:[%s12322_s1 + $0x4f0] sm:$0xf]  ;;  %v5535_v8 = vor.u32 %v7699_v2, %v5534_v1  ;;  %v5990_v2 = vld [vmem:[%s12322_s1 + $0x700] sm:$0xf]  ;;  %v7795_v52 = vld [vmem:[%s12322_s1 + $0x684] sm:$0xf0] }
  0xc5   :  { %2150 = vmatpush.bf16.msra.mxu1 %v5463_v4  ;;  %2116 = vmatmul.bf16.vlgmr.msrb.gmra.mxu2 %v8736_v35  ;;  %v7747_v4 = vld [vmem:[%s12322_s1 + $0x504] sm:$0xf0] }
  0xc6   :  { %2164 = vmatpush.bf16.msra.mxu2 %v5655_v5  ;;  %2130 = vmatmul.bf16.vlgmr.msrb.gmra.mxu3 %v8747_v39  ;;  %v5151_v5 = vor.u32 %v7603_v61, %v5150_v60  ;;  %v5727_v12 = vor.u32 %v7747_v4, %v5726_v3  ;;  %v7672_v60 = vld [vmem:[%s12322_s1 + $0x2b4] sm:$0xf]  ;;  %v5440_v61 = vld [vmem:[%s12322_s1 + $0x2c8] sm:$0xf0]  ;;  %v7813_v3 = vld [vmem:[%s12322_s1 + $0x714] sm:$0xf0] }
  0xc7   :  { %2178 = vmatpush.bf16.msra.mxu3 %v5847_v10  ;;  %v7597_v10 = vld [vmem:[%s12322_s1 + $0x54] sm:$0xf0]  ;;  %v6182_v4 = vld [vmem:[%s12322_s1 + $0x880] sm:$0xf]  ;;  %v5991_v14 = vor.u32 %v7813_v3, %v5990_v2  ;;  %v7843_v55 = vld [vmem:[%s12322_s1 + $0x804] sm:$0xf0] }
  0xc8   :  { %2137 = vmatpush.bf16.msra.mxu0 %v5247_v16  ;;  %v5702_v16 = vld [vmem:[%s12322_s1 + $0x4c0] sm:$0xf] }
  0xc9   :  { %2151 = vmatpush.bf16.msra.mxu1 %v5439_v17  ;;  %v7741_v17 = vld [vmem:[%s12322_s1 + $0x4d4] sm:$0xf0]  ;;  %v5894_v3 = vld [vmem:[%s12322_s1 + $0x640] sm:$0xf] }
  0xca   :  { %2165 = vmatpush.bf16.msra.mxu2 %v5631_v18  ;;  %v5127_v18 = vor.u32 %v7597_v10, %v5126_v9  ;;  %v7618_v9 = vld [vmem:[%s12322_s1 + $0x104] sm:$0xf]  ;;  %v5224_v10 = vld [vmem:[%s12322_s1 + $0x118] sm:$0xf0] }
  0xcb   :  { %2179 = vmatpush.bf16.msra.mxu3 %v5823_v24  ;;  %v5319_v24 = vor.u32 %v7645_v13, %v5318_v11  ;;  %v9764_v11 = vpop.f32.mrf.mxu3  ;;  %v5416_v13 = vld [vmem:[%s12322_s1 + $0x298] sm:$0xf0] }
  0xcc   :  { %2138 = vmatpush.bf16.msra.mxu0 %v5223_v30  ;;  %v5703_v30 = vor.u32 %v7741_v17, %v5702_v16  ;;  %v5227_v16 = vor.u32 %v7618_v9, %v5224_v10  ;;  %v5966_v17 = vld [vmem:[%s12322_s1 + $0x6d0] sm:$0xf]  ;;  %v7837_v9 = vld [vmem:[%s12322_s1 + $0x7d4] sm:$0xf0]  ;;  %v7594_v10 = vld [vmem:[%s12322_s1 + $0x44] sm:$0xf] }
  0xcd   :  { %2152 = vmatpush.bf16.msra.mxu1 %v5415_v31  ;;  %v7687_v31 = vld [vmem:[%s12322_s1 + $0x324] sm:$0xf0] }
  0xce   :  { %2166 = vmatpush.bf16.msra.mxu2 %v5607_v32  ;;  %v5678_v32 = vld [vmem:[%s12322_s1 + $0x490] sm:$0xf] }
  0xcf   :  { %2180 = vmatpush.bf16.msra.mxu3 %v5799_v37  ;;  %v6230_v37 = vld [vmem:[%s12322_s1 + $0x8e0] sm:$0xf]  ;;  %v5679_v47 = vor.u32 %v7735_v33, %v5678_v32 }
  0xd0   :  { %2139 = vmatpush.bf16.msra.mxu0 %v5199_v44  ;;  %v5487_v44 = vor.u32 %v7687_v31, %v5486_v28  ;;  %v6231_v49 = vor.u32 %v7873_v40, %v6230_v37  ;;  %v5392_v28 = vld [vmem:[%s12322_s1 + $0x268] sm:$0xf0]  ;;  %v6134_v37 = vld [vmem:[%s12322_s1 + $0x820] sm:$0xf]  ;;  %v7849_v40 = vld [vmem:[%s12322_s1 + $0x834] sm:$0xf0] }
  0xd1   :  { %2153 = vmatpush.bf16.msra.mxu1 %v5391_v45  ;;  %v7678_v45 = vld [vmem:[%s12322_s1 + $0x2e4] sm:$0xf] }
  0xd2   :  { %2167 = vmatpush.bf16.msra.mxu2 %v5583_v46  ;;  %v5464_v46 = vld [vmem:[%s12322_s1 + $0x2f8] sm:$0xf0] }
  0xd3   :  { %2181 = vmatpush.bf16.msra.mxu3 %v5775_v50  ;;  %v5275_v50 = vor.u32 %v7630_v41, %v5272_v42  ;;  %v5467_v54 = vor.u32 %v7678_v45, %v5464_v46  ;;  %v7606_v41 = vld [vmem:[%s12322_s1 + $0xa4] sm:$0xf]  ;;  %v5176_v42 = vld [vmem:[%s12322_s1 + $0xb8] sm:$0xf0] }
  0xd4   :  { %2140 = vmatpush.bf16.msra.mxu0 %v5175_v56  ;;  %v7624_v56 = vld [vmem:[%s12322_s1 + $0x134] sm:$0xf]  ;;  %v5368_v45 = vld [vmem:[%s12322_s1 + $0x238] sm:$0xf0] }
  0xd5   :  { %2154 = vmatpush.bf16.msra.mxu1 %v5367_v58  ;;  %v5248_v58 = vld [vmem:[%s12322_s1 + $0x148] sm:$0xf0] }
  0xd6   :  { %2168 = vmatpush.bf16.msra.mxu2 %v5559_v59  ;;  %v9733_v59 = vpop.f32.mrf.mxu2  ;;  %v5251_v1 = vor.u32 %v7624_v56, %v5248_v58  ;;  %v7600_v56 = vld [vmem:[%s12322_s1 + $0x74] sm:$0xf]  ;;  %v5152_v58 = vld [vmem:[%s12322_s1 + $0x88] sm:$0xf0] }
  0xd7   :  { %2182 = vmatpush.bf16.msra.mxu3 %v5751_v63  ;;  %v9741_v63 = vpop.f32.mrf.mxu0  ;;  %v5155_v2 = vor.u32 %v7600_v56, %v5152_v58  ;;  %v7720_v56 = vld [vmem:[%s12322_s1 + $0x434] sm:$0xf]  ;;  %v5632_v58 = vld [vmem:[%s12322_s1 + $0x448] sm:$0xf0] }
  0xd8   :  { %2141 = vmatpush.bf16.msra.mxu0 %v5151_v5  ;;  %v9752_v5 = vpop.f32.mrf.mxu1 }
  0xd9   :  { %2155 = vmatpush.bf16.msra.mxu1 %v5343_v7  ;;  %v5443_v7 = vor.u32 %v7672_v60, %v5440_v61  ;;  %v7648_v60 = vld [vmem:[%s12322_s1 + $0x1f4] sm:$0xf]  ;;  %v5344_v61 = vld [vmem:[%s12322_s1 + $0x208] sm:$0xf0] }
  0xda   :  { %2169 = vmatpush.bf16.msra.mxu2 %v5535_v8  ;;  %v7861_v8 = vld [vmem:[%s12322_s1 + $0x894] sm:$0xf0] }
  0xdb   :  { %2183 = vmatpush.bf16.msra.mxu3 %v5727_v12  ;;  %v7666_v12 = vld [vmem:[%s12322_s1 + $0x284] sm:$0xf]  ;;  %v6183_v15 = vor.u32 %v7861_v8, %v6182_v4  ;;  %v7789_v4 = vld [vmem:[%s12322_s1 + $0x654] sm:$0xf0]  ;;  %v5347_v8 = vor.u32 %v7648_v60, %v5344_v61  ;;  %v7768_v60 = vld [vmem:[%s12322_s1 + $0x5b4] sm:$0xf] }
  0xdc   :  { %2142 = vmatpush.bf16.msra.mxu0 %v5127_v18  ;;  %v7807_v18 = vld [vmem:[%s12322_s1 + $0x6e4] sm:$0xf0]  ;;  %v5419_v20 = vor.u32 %v7666_v12, %v5416_v13  ;;  %v5128_v12 = vld [vmem:[%s12322_s1 + $0x58] sm:$0xf0]  ;;  %v7642_v13 = vld [vmem:[%s12322_s1 + $0x1c4] sm:$0xf] }
  0xdd   :  { %2156 = vmatpush.bf16.msra.mxu1 %v5319_v24  ;;  %v7855_v24 = vld [vmem:[%s12322_s1 + $0x864] sm:$0xf0] }
  0xde   :  { %2170 = vmatpush.bf16.msra.mxu2 %v5511_v25  ;;  %v7612_v25 = vld [vmem:[%s12322_s1 + $0xd4] sm:$0xf]  ;;  %v9799_v31 = vpop.f32.mrf.mxu2  ;;  %v6159_v32 = vor.u32 %v7855_v24, %v6158_v19  ;;  %v5131_v24 = vor.u32 %v7594_v10, %v5128_v12 }
  0xdf   :  { %2184 = vmatpush.bf16.msra.mxu3 %v5703_v30  ;;  %v5967_v30 = vor.u32 %v7807_v18, %v5966_v17  ;;  %v5203_v33 = vor.u32 %v7612_v25, %v5200_v26  ;;  %v7783_v17 = vld [vmem:[%s12322_s1 + $0x624] sm:$0xf0]  ;;  %v6062_v25 = vld [vmem:[%s12322_s1 + $0x790] sm:$0xf] }
  0xe0   :  { %2143 = vmatpush.bf16.msra.mxu0 %v5103_v38  ;;  %v5395_v38 = vor.u32 %v7660_v27, %v5392_v28  ;;  %v9827_v46 = vpop.f32.mrf.mxu1  ;;  %v7831_v26 = vld [vmem:[%s12322_s1 + $0x7a4] sm:$0xf0]  ;;  %v7588_v27 = vld [vmem:[%s12322_s1 + $0x14] sm:$0xf] }
  0xe1   :  { %2157 = vmatpush.bf16.msra.mxu1 %v5295_v43  ;;  %v9819_v43 = vpop.f32.mrf.mxu0 }
  0xe2   :  { %2171 = vmatpush.bf16.msra.mxu2 %v5487_v44  ;;  %v7654_v44 = vld [vmem:[%s12322_s1 + $0x224] sm:$0xf] }
  0xe3   :  { %2185 = vmatpush.bf16.msra.mxu3 %v5679_v47  ;;  %2144 = vmatmul.bf16.vlgmr.msra.gmra.mxu0 %v8523_v57  ;;  %v5943_v47 = vor.u32 %v7801_v36, %v5942_v34  ;;  %v5296_v34 = vld [vmem:[%s12322_s1 + $0x1a8] sm:$0xf0]  ;;  %v7726_v36 = vld [vmem:[%s12322_s1 + $0x464] sm:$0xf] }
  0xe4   :  { %2192 = vmatpush.bf16.msrb.mxu0 %v6039_v48  ;;  %2158 = vmatmul.bf16.vlgmr.msra.gmra.mxu1 %v8553_v6  ;;  %v9829_v48 = vpop.f32.mrf.mxu3 }
  0xe5   :  { %2206 = vmatpush.bf16.msrb.mxu1 %v6231_v49  ;;  %2172 = vmatmul.bf16.vlgmr.msra.gmra.mxu2 %v8589_v22  ;;  %v6135_v49 = vor.u32 %v7849_v40, %v6134_v37  ;;  %v5656_v37 = vld [vmem:[%s12322_s1 + $0x478] sm:$0xf0] }
  0xe6   :  { %2220 = vmatpush.bf16.msrb.mxu2 %v5275_v50  ;;  %2186 = vmatmul.bf16.vlgmr.msra.gmra.mxu3 %v8591_v23  ;;  %v5179_v50 = vor.u32 %v7606_v41, %v5176_v42  ;;  %v5848_v41 = vld [vmem:[%s12322_s1 + $0x5f8] sm:$0xf0]  ;;  %v7822_v42 = vld [vmem:[%s12322_s1 + $0x764] sm:$0xf] }
  0xe7   :  { %2234 = vmatpush.bf16.msrb.mxu3 %v5467_v54  ;;  %v5371_v54 = vor.u32 %v7654_v44, %v5368_v45  ;;  %v6040_v44 = vld [vmem:[%s12322_s1 + $0x778] sm:$0xf0]  ;;  %v6063_v45 = vor.u32 %v7831_v26, %v6062_v25  ;;  %v7858_v26 = vld [vmem:[%s12322_s1 + $0x884] sm:$0xf] }
  0xe8   :  { %2193 = vmatpush.bf16.msrb.mxu0 %v6015_v62  ;;  %v5919_v62 = vor.u32 %v7795_v52, %v5918_v51  ;;  %v9900_v28 = vpop.f32.mrf.mxu1  ;;  %v5659_v52 = vor.u32 %v7726_v36, %v5656_v37  ;;  %v5992_v25 = vld [vmem:[%s12322_s1 + $0x718] sm:$0xf0]  ;;  %v7756_v36 = vld [vmem:[%s12322_s1 + $0x554] sm:$0xf] }
  0xe9   :  { %2207 = vmatpush.bf16.msrb.mxu1 %v6207_v0  ;;  %v9855_v0 = vpop.f32.mrf.mxu2  ;;  %v9887_v18 = vpop.f32.mrf.mxu0 }
  0xea   :  { %2221 = vmatpush.bf16.msrb.mxu2 %v5251_v1  ;;  %v6111_v1 = vor.u32 %v7843_v55, %v6110_v53  ;;  %v6043_v55 = vor.u32 %v7822_v42, %v6040_v44  ;;  %v7852_v42 = vld [vmem:[%s12322_s1 + $0x854] sm:$0xf]  ;;  %v6160_v44 = vld [vmem:[%s12322_s1 + $0x868] sm:$0xf0] }
  0xeb   :  { %2235 = vmatpush.bf16.msrb.mxu3 %v5443_v7  ;;  %v6086_v7 = vld [vmem:[%s12322_s1 + $0x7c0] sm:$0xf] }
  0xec   :  { %2194 = vmatpush.bf16.msrb.mxu0 %v5991_v14  ;;  %v5320_v14 = vld [vmem:[%s12322_s1 + $0x1d8] sm:$0xf0]  ;;  %v9889_v19 = vpop.f32.mrf.mxu3 }
  0xed   :  { %2208 = vmatpush.bf16.msrb.mxu1 %v6183_v15  ;;  %v5895_v15 = vor.u32 %v7789_v4, %v5894_v3  ;;  %v7864_v4 = vld [vmem:[%s12322_s1 + $0x8b4] sm:$0xf] }
  0xee   :  { %2222 = vmatpush.bf16.msrb.mxu2 %v5227_v16  ;;  %v5870_v16 = vld [vmem:[%s12322_s1 + $0x610] sm:$0xf] }
  0xef   :  { %2236 = vmatpush.bf16.msrb.mxu3 %v5419_v20  ;;  %v6087_v20 = vor.u32 %v7837_v9, %v6086_v7  ;;  %v5871_v40 = vor.u32 %v7783_v17, %v5870_v16  ;;  %v6208_v7 = vld [vmem:[%s12322_s1 + $0x8c8] sm:$0xf0]  ;;  %v5635_v9 = vor.u32 %v7720_v56, %v5632_v58  ;;  %v7762_v16 = vld [vmem:[%s12322_s1 + $0x584] sm:$0xf]  ;;  %v6163_v56 = vor.u32 %v7852_v42, %v6160_v44  ;;  %v5752_v58 = vld [vmem:[%s12322_s1 + $0x538] sm:$0xf0] }
  0xf0   :  { %2195 = vmatpush.bf16.msrb.mxu0 %v5967_v30  ;;  %v5323_v30 = vor.u32 %v7642_v13, %v5320_v14  ;;  %v7714_v14 = vld [vmem:[%s12322_s1 + $0x404] sm:$0xf]  ;;  %v6211_v17 = vor.u32 %v7864_v4, %v6208_v7  ;;  %v5896_v44 = vld [vmem:[%s12322_s1 + $0x658] sm:$0xf0] }
  0xf1   :  { %2209 = vmatpush.bf16.msrb.mxu1 %v6159_v32  ;;  %v5104_v32 = vld [vmem:[%s12322_s1 + $0x28] sm:$0xf0]  ;;  %v9935_v53 = vpop.f32.mrf.mxu2  ;;  %v9955_v3 = vpop.f32.mrf.mxu0  ;;  %v10054_v4 = vld [vmem:[%s12324_s2] sm:$0x3f] }
  0xf2   :  { %2223 = vmatpush.bf16.msrb.mxu2 %v5203_v33  ;;  %v7636_v33 = vld [vmem:[%s12322_s1 + $0x194] sm:$0xf]  ;;  %v7786_v42 = vld [vmem:[%s12322_s1 + $0x644] sm:$0xf] }
  0xf3   :  { %2237 = vmatpush.bf16.msrb.mxu3 %v5395_v38  ;;  %v7774_v38 = vld [vmem:[%s12322_s1 + $0x5e4] sm:$0xf]  ;;  %v5299_v51 = vor.u32 %v7636_v33, %v5296_v34  ;;  %v5584_v34 = vld [vmem:[%s12322_s1 + $0x3e8] sm:$0xf0] }
  0xf4   :  { %2196 = vmatpush.bf16.msrb.mxu0 %v5943_v47  ;;  %v5107_v47 = vor.u32 %v7588_v27, %v5104_v32  ;;  %v9965_v10 = vpop.f32.mrf.mxu3  ;;  %v6184_v27 = vld [vmem:[%s12322_s1 + $0x898] sm:$0xf0] }
  0xf5   :  { %2210 = vmatpush.bf16.msrb.mxu1 %v6135_v49  ;;  %v7870_v49 = vld [vmem:[%s12322_s1 + $0x8e4] sm:$0xf]  ;;  %v6187_v37 = vor.u32 %v7858_v26, %v6184_v27  ;;  %v6112_v26 = vld [vmem:[%s12322_s1 + $0x808] sm:$0xf0]  ;;  %v318_v27 = vperm.slane %v10054_v4, 0 }
  0xf6   :  { %2224 = vmatpush.bf16.msrb.mxu2 %v5179_v50  ;;  %v6232_v50 = vld [vmem:[%s12322_s1 + $0x8f8] sm:$0xf0] }
  0xf7   :  { %2238 = vmatpush.bf16.msrb.mxu3 %v5371_v54  ;;  %v5851_v54 = vor.u32 %v7774_v38, %v5848_v41  ;;  %v6235_v61 = vor.u32 %v7870_v49, %v6232_v50  ;;  %v7804_v38 = vld [vmem:[%s12322_s1 + $0x6d4] sm:$0xf] }
  0xf8   :  { %2197 = vmatpush.bf16.msrb.mxu0 %v5919_v62  ;;  %v5824_v62 = vld [vmem:[%s12322_s1 + $0x5c8] sm:$0xf0] }
  0xf9   :  { %2211 = vmatpush.bf16.msrb.mxu1 %v6111_v1  ;;  %v7816_v1 = vld [vmem:[%s12322_s1 + $0x734] sm:$0xf]  ;;  %v5827_v12 = vor.u32 %v7768_v60, %v5824_v62  ;;  %v10013_v41 = vpop.f32.mrf.mxu2  ;;  %v7798_v60 = vld [vmem:[%s12322_s1 + $0x6a4] sm:$0xf] }
  0xfa   :  { %2225 = vmatpush.bf16.msrb.mxu2 %v5155_v2  ;;  %v6016_v2 = vld [vmem:[%s12322_s1 + $0x748] sm:$0xf0] }
  0xfb   :  { %2239 = vmatpush.bf16.msrb.mxu3 %v5347_v8  ;;  %v9963_v8 = vpop.f32.mrf.mxu1  ;;  %v6019_v13 = vor.u32 %v7816_v1, %v6016_v2  ;;  %v7846_v1 = vld [vmem:[%s12322_s1 + $0x824] sm:$0xf]  ;;  %v6136_v2 = vld [vmem:[%s12322_s1 + $0x838] sm:$0xf0] }
  0xfc   :  { %2198 = vmatpush.bf16.msrb.mxu0 %v5895_v15  ;;  %v5608_v15 = vld [vmem:[%s12322_s1 + $0x418] sm:$0xf0]  ;;  %v10043_v62 = vpop.f32.mrf.mxu3 }
  0xfd   :  { %2212 = vmatpush.bf16.msrb.mxu1 %v6087_v20  ;;  %v5800_v20 = vld [vmem:[%s12322_s1 + $0x598] sm:$0xf0] }
  0xfe   :  { %2226 = vmatpush.bf16.msrb.mxu2 %v5131_v24  ;;  %v7810_v24 = vld [vmem:[%s12322_s1 + $0x704] sm:$0xf]  ;;  %v5803_v32 = vor.u32 %v7762_v16, %v5800_v20  ;;  %v6139_v16 = vor.u32 %v7846_v1, %v6136_v2  ;;  %v7792_v20 = vld [vmem:[%s12322_s1 + $0x674] sm:$0xf]  ;;  %v5899_v1 = vor.u32 %v7786_v42, %v5896_v44  ;;  %v5680_v2 = vld [vmem:[%s12322_s1 + $0x4a8] sm:$0xf0] }
  0xff   :  { %2240 = vmatpush.bf16.msrb.mxu3 %v5323_v30  ;;  %v5611_v30 = vor.u32 %v7714_v14, %v5608_v15  ;;  %v5995_v33 = vor.u32 %v7810_v24, %v5992_v25  ;;  %v5536_v14 = vld [vmem:[%s12322_s1 + $0x388] sm:$0xf0]  ;;  %v7744_v15 = vld [vmem:[%s12322_s1 + $0x4f4] sm:$0xf] }
 0x100   :  { %2199 = vmatpush.bf16.msrb.mxu0 %v5871_v40  ;;  %v5968_v40 = vld [vmem:[%s12322_s1 + $0x6e8] sm:$0xf0]  ;;  %v7840_v25 = vld [vmem:[%s12322_s1 + $0x7f4] sm:$0xf] }
 0x101   :  { %2213 = vmatpush.bf16.msrb.mxu1 %v6063_v45  ;;  %v5971_v50 = vor.u32 %v7804_v38, %v5968_v40  ;;  %v5920_v24 = vld [vmem:[%s12322_s1 + $0x688] sm:$0xf0]  ;;  %v6115_v38 = vor.u32 %v7840_v25, %v6112_v26  ;;  %v5704_v40 = vld [vmem:[%s12322_s1 + $0x4d8] sm:$0xf0]  ;;  %v7982_v26 = vld [vmem:[%s12325_s3 + $0x360] sm:$0xf0] }
 0x102   :  { %2227 = vmatpush.bf16.msrb.mxu2 %v5107_v47  ;;  %v10021_v47 = vpop.f32.mrf.mxu0 }
 0x103   :  { %2241 = vmatpush.bf16.msrb.mxu3 %v5299_v51  ;;  %2200 = vmatmul.bf16.vlgmr.msrb.gmra.mxu0 %v8736_v35  ;;  %v7702_v51 = vld [vmem:[%s12322_s1 + $0x3a4] sm:$0xf] }
 0x104   :  { %2248 = vmatpush.bf16.msra.mxu0 %v5659_v52  ;;  %2214 = vmatmul.bf16.vlgmr.msrb.gmra.mxu1 %v8747_v39  ;;  %v5560_v52 = vld [vmem:[%s12322_s1 + $0x3b8] sm:$0xf0] }
 0x105   :  { %2262 = vmatpush.bf16.msra.mxu1 %v5851_v54  ;;  %2228 = vmatmul.bf16.vlgmr.msrb.gmra.mxu2 %v8523_v57  ;;  %v7708_v57 = vld [vmem:[%s12322_s1 + $0x3d4] sm:$0xf]  ;;  %v7750_v54 = vld [vmem:[%s12322_s1 + $0x524] sm:$0xf]  ;;  %v5563_v7 = vor.u32 %v7702_v51, %v5560_v52  ;;  %v1810_v51 = vadd.f32 %v9669_v21, %v318_v27  ;;  %v320_v52 = vperm.slane %v10054_v4, 2 }
 0x106   :  { %2276 = vmatpush.bf16.msra.mxu2 %v6043_v55  ;;  %2242 = vmatmul.bf16.vlgmr.msrb.gmra.mxu3 %v8553_v6  ;;  %v5776_v6 = vld [vmem:[%s12322_s1 + $0x568] sm:$0xf0]  ;;  %v5587_v45 = vor.u32 %v7708_v57, %v5584_v34  ;;  %v10032_v55 = vpop.f32.mrf.mxu1  ;;  %v5923_v57 = vor.u32 %v7792_v20, %v5920_v24  ;;  %v7732_v21 = vld [vmem:[%s12322_s1 + $0x494] sm:$0xf]  ;;  %v1812_v24 = vadd.f32 %v9741_v63, %v318_v27 }
 0x107   :  { %2290 = vmatpush.bf16.msra.mxu3 %v6235_v61  ;;  %v5779_v49 = vor.u32 %v7756_v36, %v5776_v6  ;;  %v5944_v61 = vld [vmem:[%s12322_s1 + $0x6b8] sm:$0xf0]  ;;  %v7690_v36 = vld [vmem:[%s12322_s1 + $0x344] sm:$0xf]  ;;  %v1824_v20 = vadd.f32 %v9680_v29, %v1810_v51  ;;  %v5683_v29 = vor.u32 %v7732_v21, %v5680_v2 }
 0x108   :  { %2249 = vmatpush.bf16.msra.mxu0 %v5635_v9  ;;  %v5755_v9 = vor.u32 %v7750_v54, %v5752_v58  ;;  %v7738_v6 = vld [vmem:[%s12322_s1 + $0x4c4] sm:$0xf]  ;;  %v5488_v58 = vld [vmem:[%s12322_s1 + $0x328] sm:$0xf0] }
 0x109   :  { %2263 = vmatpush.bf16.msra.mxu1 %v5827_v12  ;;  %v5947_v12 = vor.u32 %v7798_v60, %v5944_v61  ;;  %v10115_v60 = vpop.f32.mrf.mxu3  ;;  %v5707_v61 = vor.u32 %v7738_v6, %v5704_v40  ;;  %v7919_v40 = vld [vmem:[%s12325_s3 + $0x168] sm:$0xf0]  ;;  %v8094_v51 = vld [vmem:[%s12325_s3 + $0x6e0] sm:$0xf0] }
 0x10a   :  { %2277 = vmatpush.bf16.msra.mxu2 %v6019_v13  ;;  %v7696_v13 = vld [vmem:[%s12322_s1 + $0x374] sm:$0xf]  ;;  %v1977_v34 = vpop.f32.mrf.mxu0 }
 0x10b   :  { %2291 = vmatpush.bf16.msra.mxu3 %v6211_v17  ;;  %v5728_v17 = vld [vmem:[%s12322_s1 + $0x508] sm:$0xf0] }
 0x10c   :  { %2250 = vmatpush.bf16.msra.mxu0 %v5611_v30  ;;  %v5539_v30 = vor.u32 %v7696_v13, %v5536_v14  ;;  %v7828_v13 = vld [vmem:[%s12322_s1 + $0x794] sm:$0xf]  ;;  %v6064_v14 = vld [vmem:[%s12322_s1 + $0x7a8] sm:$0xf0] }
 0x10d   :  { %2264 = vmatpush.bf16.msra.mxu1 %v5803_v32  ;;  %v10081_v32 = vpop.f32.mrf.mxu2 }
 0x10e   :  { %2278 = vmatpush.bf16.msra.mxu2 %v5995_v33  ;;  %v5731_v33 = vor.u32 %v7744_v15, %v5728_v17  ;;  %v6434_v15 = vld [vmem:[%s12325_s3 + $0x188] sm:$0xf] }
 0x10f   :  { %2292 = vmatpush.bf16.msra.mxu3 %v6187_v37  ;;  %v5512_v37 = vld [vmem:[%s12322_s1 + $0x358] sm:$0xf0]  ;;  %v6658_v17 = vld [vmem:[%s12325_s3 + $0x348] sm:$0xf] }
 0x110   :  { %2251 = vmatpush.bf16.msra.mxu0 %v5587_v45  ;;  %v1991_v45 = vpop.f32.mrf.mxu1  ;;  %v5515_v54 = vor.u32 %v7690_v36, %v5512_v37  ;;  %v1978_v36 = vadd.f32 %v1977_v34, %v320_v52  ;;  %v6067_v37 = vor.u32 %v7828_v13, %v6064_v14  ;;  %v6659_v42 = vor.u32 %v7982_v26, %v6658_v17  ;;  %v6630_v34 = vld [vmem:[%s12325_s3 + $0x310] sm:$0xf]  ;;  %v6378_v13 = vld [vmem:[%s12325_s3 + $0x118] sm:$0xf]  ;;  %v7912_v14 = vld [vmem:[%s12325_s3 + $0x130] sm:$0xf0] }
 0x111   :  { %2265 = vmatpush.bf16.msra.mxu1 %v5779_v49  ;;  %v7834_v49 = vld [vmem:[%s12322_s1 + $0x7c4] sm:$0xf]  ;;  %v8024_v26 = vld [vmem:[%s12325_s3 + $0x4b0] sm:$0xf0] }
 0x112   :  { %2279 = vmatpush.bf16.msra.mxu2 %v5971_v50  ;;  %v6088_v50 = vld [vmem:[%s12322_s1 + $0x7d8] sm:$0xf0] }
 0x113   :  { %2293 = vmatpush.bf16.msra.mxu3 %v6163_v56  ;;  %v7684_v56 = vld [vmem:[%s12322_s1 + $0x314] sm:$0xf] }
 0x114   :  { %2252 = vmatpush.bf16.msra.mxu0 %v5563_v7  ;;  %v7780_v7 = vld [vmem:[%s12322_s1 + $0x614] sm:$0xf]  ;;  %v5491_v25 = vor.u32 %v7684_v56, %v5488_v58  ;;  %v1838_v56 = vadd.f32 %v9733_v59, %v1824_v20  ;;  %v7975_v58 = vld [vmem:[%s12325_s3 + $0x328] sm:$0xf0]  ;;  %v2019_v59 = vpop.f32.mrf.mxu3 }
 0x115   :  { %2266 = vmatpush.bf16.msra.mxu1 %v5755_v9  ;;  %v6091_v9 = vor.u32 %v7834_v49, %v6088_v50  ;;  %v2005_v27 = vpop.f32.mrf.mxu2  ;;  %v1979_v49 = vpop.f32.mrf.mxu0  ;;  %v7106_v50 = vld [vmem:[%s12325_s3 + $0x6c8] sm:$0xf] }
 0x116   :  { %2280 = vmatpush.bf16.msra.mxu2 %v5947_v12  ;;  %v5872_v12 = vld [vmem:[%s12322_s1 + $0x628] sm:$0xf0]  ;;  %v1852_v17 = vadd.f32 %v9764_v11, %v1838_v56  ;;  %v7898_v56 = vld [vmem:[%s12325_s3 + $0xc0] sm:$0xf0] }
 0x117   :  { %2294 = vmatpush.bf16.msra.mxu3 %v6139_v16  ;;  %v7926_v16 = vld [vmem:[%s12325_s3 + $0x1a0] sm:$0xf0]  ;;  %v5875_v63 = vor.u32 %v7780_v7, %v5872_v12  ;;  %v1992_v7 = vadd.f32 %v1991_v45, %v1978_v36  ;;  %v6602_v45 = vld [vmem:[%s12325_s3 + $0x2d8] sm:$0xf] }
 0x118   :  { %2253 = vmatpush.bf16.msra.mxu0 %v5539_v30  ;;  %v6882_v30 = vld [vmem:[%s12325_s3 + $0x508] sm:$0xf]  ;;  %v6435_v6 = vor.u32 %v7926_v16, %v6434_v15  ;;  %v1993_v21 = vpop.f32.mrf.mxu1  ;;  %v7107_v15 = vor.u32 %v8094_v51, %v7106_v50  ;;  %v8087_v16 = vld [vmem:[%s12325_s3 + $0x6a8] sm:$0xf0] }
 0x119   :  { %2267 = vmatpush.bf16.msra.mxu1 %v5731_v33  ;;  %v8038_v33 = vld [vmem:[%s12325_s3 + $0x520] sm:$0xf0] }
 0x11a   :  { %2281 = vmatpush.bf16.msra.mxu2 %v5923_v57  ;;  %v319_v57 = vperm.slane %v10054_v4, 1  ;;  %v6883_v44 = vor.u32 %v8038_v33, %v6882_v30  ;;  %v6379_v30 = vor.u32 %v7912_v14, %v6378_v13  ;;  %v6350_v33 = vld [vmem:[%s12325_s3 + $0xe0] sm:$0xf] }
 0x11b   :  { %2295 = vmatpush.bf16.msra.mxu3 %v6115_v38  ;;  %v6406_v38 = vld [vmem:[%s12325_s3 + $0x150] sm:$0xf] }
 0x11c   :  { %2254 = vmatpush.bf16.msra.mxu0 %v5515_v54  ;;  %v1826_v54 = vadd.f32 %v9752_v5, %v1812_v24  ;;  %v1894_v2 = vadd.f32 %v9855_v0, %v319_v57  ;;  %v1896_v5 = vadd.f32 %v9935_v53, %v319_v57  ;;  %v6407_v12 = vor.u32 %v7919_v40, %v6406_v38  ;;  %v7968_v24 = vld [vmem:[%s12325_s3 + $0x2f0] sm:$0xf0]  ;;  %v7905_v57 = vld [vmem:[%s12325_s3 + $0xf8] sm:$0xf0] }
 0x11d   :  { %2268 = vmatpush.bf16.msra.mxu1 %v5707_v61  ;;  %v6854_v61 = vld [vmem:[%s12325_s3 + $0x4d0] sm:$0xf]  ;;  %v6631_v0 = vor.u32 %v7975_v58, %v6630_v34  ;;  %v2007_v36 = vpop.f32.mrf.mxu2  ;;  %v8017_v38 = vld [vmem:[%s12325_s3 + $0x478] sm:$0xf0]  ;;  %v1866_v40 = vadd.f32 %v9819_v43, %v1852_v17  ;;  %v6351_v34 = vor.u32 %v7905_v57, %v6350_v33  ;;  %v6546_v58 = vld [vmem:[%s12325_s3 + $0x268] sm:$0xf] }
 0x11e   :  { %2282 = vmatpush.bf16.msra.mxu2 %v5899_v1  ;;  %v8031_v1 = vld [vmem:[%s12325_s3 + $0x4e8] sm:$0xf0]  ;;  %v1840_v20 = vadd.f32 %v9799_v31, %v1826_v54  ;;  %v1908_v11 = vadd.f32 %v9889_v19, %v1894_v2  ;;  %v1910_v31 = vadd.f32 %v9965_v10, %v1896_v5  ;;  %v6603_v10 = vor.u32 %v7968_v24, %v6602_v45  ;;  %v6322_v54 = vld [vmem:[%s12325_s3 + $0xa8] sm:$0xf]  ;;  %v7954_v5 = vld [vmem:[%s12325_s3 + $0x280] sm:$0xf0] }
 0x11f   :  { %2296 = vmatpush.bf16.msra.mxu3 %v6091_v9  ;;  %v1980_v9 = vadd.f32 %v1979_v49, %v320_v52  ;;  %v6855_v53 = vor.u32 %v8031_v1, %v6854_v61  ;;  %v7078_v52 = vld [vmem:[%s12325_s3 + $0x690] sm:$0xf]  ;;  %v2021_v61 = vpop.f32.mrf.mxu3  ;;  %v7022_v1 = vld [vmem:[%s12325_s3 + $0x620] sm:$0xf]  ;;  %v8066_v17 = vld [vmem:[%s12325_s3 + $0x600] sm:$0xf0] }
 0x120   :  { %2255 = vmatpush.bf16.msra.mxu0 %v5491_v25  ;;  %v6826_v25 = vld [vmem:[%s12325_s3 + $0x498] sm:$0xf]  ;;  %v7079_v19 = vor.u32 %v8087_v16, %v7078_v52  ;;  %v6518_v52 = vld [vmem:[%s12325_s3 + $0x230] sm:$0xf]  ;;  %v6994_v16 = vld [vmem:[%s12325_s3 + $0x5e8] sm:$0xf] }
 0x121   :  { %2269 = vmatpush.bf16.msra.mxu1 %v5683_v29  ;;  %v7050_v29 = vld [vmem:[%s12325_s3 + $0x658] sm:$0xf]  ;;  %v2047_v50 = vpop.f32.mrf.mxu1  ;;  %v6742_v24 = vld [vmem:[%s12325_s3 + $0x3f0] sm:$0xf]  ;;  %v7884_v33 = vld [vmem:[%s12325_s3 + $0x50] sm:$0xf0]  ;;  %v6995_v57 = vor.u32 %v8066_v17, %v6994_v16 }
 0x122   :  { %2283 = vmatpush.bf16.msra.mxu2 %v5875_v63  ;;  %v8080_v63 = vld [vmem:[%s12325_s3 + $0x670] sm:$0xf0] }
 0x123   :  { %2297 = vmatpush.bf16.msra.mxu3 %v6067_v37  ;;  %2256 = vmatmul.bf16.vlgmr.msra.gmra.mxu0 %v8589_v22  ;;  %v2006_v22 = vadd.f32 %v2005_v27, %v1992_v7  ;;  %v1854_v27 = vadd.f32 %v9829_v48, %v1840_v20  ;;  %v7961_v37 = vld [vmem:[%s12325_s3 + $0x2b8] sm:$0xf0]  ;;  %v2033_v48 = vpop.f32.mrf.mxu0  ;;  %v7051_v43 = vor.u32 %v8080_v63, %v7050_v29  ;;  %v6770_v7 = vld [vmem:[%s12325_s3 + $0x428] sm:$0xf]  ;;  %v6714_v63 = vld [vmem:[%s12325_s3 + $0x3b8] sm:$0xf] }
 0x124   :  { %4450 = vmatpush.bf16.msrb.mxu0 %v6435_v6  ;;  %2270 = vmatmul.bf16.vlgmr.msra.gmra.mxu1 %v8591_v23  ;;  %v1994_v23 = vadd.f32 %v1993_v21, %v1980_v9  ;;  %v6798_v6 = vld [vmem:[%s12325_s3 + $0x460] sm:$0xf]  ;;  %v8073_v21 = vld [vmem:[%s12325_s3 + $0x638] sm:$0xf0]  ;;  %v1880_v9 = vadd.f32 %v9827_v46, %v1866_v40 }
 0x125   :  { %4464 = vmatpush.bf16.msrb.mxu1 %v6659_v42  ;;  %2284 = vmatmul.bf16.vlgmr.msra.gmra.mxu2 %v8736_v35  ;;  %v6827_v35 = vor.u32 %v8024_v26, %v6826_v25  ;;  %v1922_v42 = vadd.f32 %v9955_v3, %v1908_v11  ;;  %v2020_v49 = vadd.f32 %v2019_v59, %v2006_v22  ;;  %v8010_v59 = vld [vmem:[%s12325_s3 + $0x440] sm:$0xf0]  ;;  %v8003_v25 = vld [vmem:[%s12325_s3 + $0x408] sm:$0xf0]  ;;  %v7877_v40 = vld [vmem:[%s12325_s3 + $0x18] sm:$0xf0] }
 0x126   :  { %4478 = vmatpush.bf16.msrb.mxu2 %v6883_v44  ;;  %2298 = vmatmul.bf16.vlgmr.msra.gmra.mxu3 %v8747_v39  ;;  %v6574_v39 = vld [vmem:[%s12325_s3 + $0x2a0] sm:$0xf]  ;;  %v1924_v44 = vadd.f32 %v10021_v47, %v1910_v31  ;;  %v2008_v51 = vadd.f32 %v2007_v36, %v1994_v23  ;;  %v6799_v47 = vor.u32 %v8017_v38, %v6798_v6  ;;  %8210 = vtanh.f32 %v1880_v9  ;;  %v8059_v36 = vld [vmem:[%s12325_s3 + $0x5c8] sm:$0xf0] }
 0x127   :  { %4492 = vmatpush.bf16.msrb.mxu3 %v7107_v15  ;;  %v6575_v3 = vor.u32 %v7961_v37, %v6574_v39  ;;  %v1868_v2 = vadd.f32 %v9887_v18, %v1854_v27  ;;  %v2034_v14 = vadd.f32 %v2033_v48, %v2020_v49  ;;  %v6323_v18 = vor.u32 %v7898_v56, %v6322_v54  ;;  %v6966_v39 = vld [vmem:[%s12325_s3 + $0x5b0] sm:$0xf]  ;;  %v7996_v27 = vld [vmem:[%s12325_s3 + $0x3d0] sm:$0xf0]  ;;  %v6238_v38 = vld [vmem:[%s12325_s3] sm:$0xf] }
 0x128   :  { %4451 = vmatpush.bf16.msrb.mxu0 %v6407_v12  ;;  %v1936_v12 = vadd.f32 %v9963_v8, %v1922_v42  ;;  %v1938_v13 = vadd.f32 %v10032_v55, %v1924_v44  ;;  %v2022_v15 = vadd.f32 %v2021_v61, %v2008_v51  ;;  %v7023_v45 = vor.u32 %v8073_v21, %v7022_v1  ;;  %v6938_v48 = vld [vmem:[%s12325_s3 + $0x578] sm:$0xf]  ;;  %v6686_v51 = vld [vmem:[%s12325_s3 + $0x380] sm:$0xf]  ;;  %v7989_v54 = vld [vmem:[%s12325_s3 + $0x398] sm:$0xf0]  ;;  %v2061_v61 = vpop.f32.mrf.mxu2 }
 0x129   :  { %4465 = vmatpush.bf16.msrb.mxu1 %v6631_v0  ;;  %v6294_v0 = vld [vmem:[%s12325_s3 + $0x70] sm:$0xf]  ;;  %v6547_v8 = vor.u32 %v7954_v5, %v6546_v58  ;;  %v6771_v55 = vor.u32 %v8010_v59, %v6770_v7  ;;  %v1882_v20 = vadd.f32 %v9900_v28, %v1868_v2  ;;  %v2048_v11 = vadd.f32 %v2047_v50, %v2034_v14  ;;  %v2049_v28 = vpop.f32.mrf.mxu1  ;;  %v7933_v50 = vld [vmem:[%s12325_s3 + $0x1d8] sm:$0xf0]  ;;  %v2075_v7 = vpop.f32.mrf.mxu3 }
 0x12a   :  { %4479 = vmatpush.bf16.msrb.mxu2 %v6855_v53  ;;  %v7891_v53 = vld [vmem:[%s12325_s3 + $0x88] sm:$0xf0]  ;;  %v1952_v46 = vadd.f32 %v10081_v32, %v1938_v13  ;;  %v1950_v26 = vadd.f32 %v10013_v41, %v1936_v12  ;;  %v6967_v42 = vor.u32 %v8059_v36, %v6966_v39  ;;  %v6715_v49 = vor.u32 %v7996_v27, %v6714_v63  ;;  %v7916_v12 = vld [vmem:[%s12325_s3 + $0x154] sm:$0xf]  ;;  %v6910_v13 = vld [vmem:[%s12325_s3 + $0x540] sm:$0xf] }
 0x12b   :  { %4493 = vmatpush.bf16.msrb.mxu3 %v7079_v19  ;;  %v7947_v32 = vld [vmem:[%s12325_s3 + $0x248] sm:$0xf0]  ;;  %v2035_v31 = vpop.f32.mrf.mxu0  ;;  %v6295_v23 = vor.u32 %v7891_v53, %v6294_v0  ;;  %8212 = vtanh.f32 %v1882_v20  ;;  %v6239_v58 = vor.u32 %v7877_v40, %v6238_v38  ;;  %v6687_v5 = vor.u32 %v7989_v54, %v6686_v51  ;;  %v8045_v14 = vld [vmem:[%s12325_s3 + $0x558] sm:$0xf0]  ;;  %v6660_v53 = vld [vmem:[%s12325_s3 + $0x364] sm:$0xf0] }
 0x12c   :  { %4452 = vmatpush.bf16.msrb.mxu0 %v6379_v30  ;;  %v2036_v22 = vadd.f32 %v2035_v31, %v2022_v15  ;;  %v6266_v30 = vld [vmem:[%s12325_s3 + $0x38] sm:$0xf]  ;;  %v1966_v19 = vadd.f32 %v10115_v60, %v1952_v46  ;;  %v6519_v41 = vor.u32 %v7947_v32, %v6518_v52  ;;  %v7940_v60 = vld [vmem:[%s12325_s3 + $0x210] sm:$0xf0]  ;;  %v1964_v37 = vadd.f32 %v10043_v62, %v1950_v26  ;;  %v6462_v62 = vld [vmem:[%s12325_s3 + $0x1c0] sm:$0xf]  ;;  %v8211_v56 = vpop.eup %8210 }
 0x12d   :  { %4466 = vmatpush.bf16.msrb.mxu1 %v6603_v10  ;;  %v6743_v10 = vor.u32 %v8003_v25, %v6742_v24  ;;  %8214 = vtanh.f32 %v2048_v11  ;;  %v6267_v6 = vor.u32 %v7884_v33, %v6266_v30  ;;  %v6463_v2 = vor.u32 %v7933_v50, %v6462_v62  ;;  %v6408_v15 = vld [vmem:[%s12325_s3 + $0x16c] sm:$0xf0]  ;;  %v7979_v0 = vld [vmem:[%s12325_s3 + $0x34c] sm:$0xf]  ;;  %v7909_v25 = vld [vmem:[%s12325_s3 + $0x11c] sm:$0xf] }
 0x12e   :  { %4480 = vmatpush.bf16.msrb.mxu2 %v6827_v35  ;;  %v6490_v35 = vld [vmem:[%s12325_s3 + $0x1f8] sm:$0xf]  ;;  %v2050_v29 = vadd.f32 %v2049_v28, %v2036_v22  ;;  %v321_v46 = vperm.slane %v10054_v4, 3  ;;  %v6911_v17 = vor.u32 %v8045_v14, %v6910_v13  ;;  %v6411_v24 = vor.u32 %v7916_v12, %v6408_v15  ;;  %v7972_v31 = vld [vmem:[%s12325_s3 + $0x314] sm:$0xf] }
 0x12f   :  { %4494 = vmatpush.bf16.msrb.mxu3 %v7051_v43  ;;  %v6491_v44 = vor.u32 %v7940_v60, %v6490_v35  ;;  %v7923_v43 = vld [vmem:[%s12325_s3 + $0x18c] sm:$0xf]  ;;  %v6663_v26 = vor.u32 %v7979_v0, %v6660_v53  ;;  %v6380_v11 = vld [vmem:[%s12325_s3 + $0x134] sm:$0xf0]  ;;  %v6632_v22 = vld [vmem:[%s12325_s3 + $0x32c] sm:$0xf0] }
 0x130   :  { %4453 = vmatpush.bf16.msrb.mxu0 %v6351_v34  ;;  %8216 = vtanh.f32 %v2050_v29  ;;  %v8052_v34 = vld [vmem:[%s12325_s3 + $0x590] sm:$0xf0]  ;;  %v7302_v28 = vld [vmem:[%s12325_s3 + $0x850] sm:$0xf]  ;;  %v8143_v30 = vld [vmem:[%s12325_s3 + $0x868] sm:$0xf0]  ;;  %v6635_v35 = vor.u32 %v7972_v31, %v6632_v22 }
 0x131   :  { %4467 = vmatpush.bf16.msrb.mxu1 %v6575_v3  ;;  %8218 = vtanh.f32 %v1966_v19  ;;  %v6436_v3 = vld [vmem:[%s12325_s3 + $0x1a4] sm:$0xf0]  ;;  %v6939_v1 = vor.u32 %v8052_v34, %v6938_v48  ;;  %v7303_v33 = vor.u32 %v8143_v30, %v7302_v28  ;;  %v2063_v19 = vpop.f32.mrf.mxu2  ;;  %v7274_v39 = vld [vmem:[%s12325_s3 + $0x818] sm:$0xf]  ;;  %v2077_v36 = vpop.f32.mrf.mxu3  ;;  %v7965_v29 = vld [vmem:[%s12325_s3 + $0x2dc] sm:$0xf] }
 0x132   :  { %4481 = vmatpush.bf16.msrb.mxu2 %v6799_v47  ;;  %8220 = vtanh.f32 %v1964_v37  ;;  %v8213_v47 = vpop.eup %8212  ;;  %v6439_v9 = vor.u32 %v7923_v43, %v6436_v3  ;;  %v6604_v60 = vld [vmem:[%s12325_s3 + $0x2f4] sm:$0xf0]  ;;  %v8136_v63 = vld [vmem:[%s12325_s3 + $0x830] sm:$0xf0]  ;;  %v8129_v62 = vld [vmem:[%s12325_s3 + $0x7f8] sm:$0xf0]  ;;  %v2064_v48 = vadd.f32 %v2063_v19, %v321_v46 }
 0x133   :  { %4495 = vmatpush.bf16.msrb.mxu3 %v7023_v45  ;;  %v8215_v21 = vpop.eup %8214  ;;  %v10382_v16 = vpack.c.bf16 %v8213_v47, %v8211_v56  ;;  %v6324_v34 = vld [vmem:[%s12325_s3 + $0xc4] sm:$0xf0]  ;;  %v7958_v50 = vld [vmem:[%s12325_s3 + $0x2a4] sm:$0xf]  ;;  %v6576_v51 = vld [vmem:[%s12325_s3 + $0x2bc] sm:$0xf0] }
 0x134   :  { %4454 = vmatpush.bf16.msrb.mxu0 %v6323_v18  ;;  %v7888_v3 = vld [vmem:[%s12325_s3 + $0x74] sm:$0xf]  ;;  %v6579_v47 = vor.u32 %v7958_v50, %v6576_v51  ;;  %v7190_v0 = vld [vmem:[%s12325_s3 + $0x770] sm:$0xf]  ;;  %v8115_v53 = vld [vmem:[%s12325_s3 + $0x788] sm:$0xf0] }
 0x135   :  { %4468 = vmatpush.bf16.msrb.mxu1 %v6547_v8  ;;  %v7330_v8 = vld [vmem:[%s12325_s3 + $0x888] sm:$0xf]  ;;  %v7162_v31 = vld [vmem:[%s12325_s3 + $0x738] sm:$0xf]  ;;  %v8108_v22 = vld [vmem:[%s12325_s3 + $0x750] sm:$0xf0] }
 0x136   :  { %4482 = vmatpush.bf16.msrb.mxu2 %v6771_v55  ;;  %v8217_v59 = vpop.eup %8216  ;;  %v8150_v55 = vld [vmem:[%s12325_s3 + $0x8a0] sm:$0xf0]  ;;  %v6240_v28 = vld [vmem:[%s12325_s3 + $0x1c] sm:$0xf0]  ;;  %v7937_v30 = vld [vmem:[%s12325_s3 + $0x1fc] sm:$0xf] }
 0x137   :  { %4496 = vmatpush.bf16.msrb.mxu3 %v6995_v57  ;;  %v8219_v18 = vpop.eup %8218  ;;  %v10373_v45 = vpack.c.bf16 %v8217_v59, %v8215_v21  ;;  %v7331_v20 = vor.u32 %v8150_v55, %v7330_v8  ;;  %v6383_v57 = vor.u32 %v7909_v25, %v6380_v11  ;;  %v6296_v21 = vld [vmem:[%s12325_s3 + $0x8c] sm:$0xf0]  ;;  %v6268_v8 = vld [vmem:[%s12325_s3 + $0x54] sm:$0xf0]  ;;  %v7944_v55 = vld [vmem:[%s12325_s3 + $0x234] sm:$0xf] }
 0x138   :  { %4455 = vmatpush.bf16.msrb.mxu0 %v6295_v23  ;;  %v8221_v52 = vpop.eup %8220  ;;  %v2062_v23 = vadd.f32 %v2061_v61, %v321_v46  ;;  %v8122_v61 = vld [vmem:[%s12325_s3 + $0x7c0] sm:$0xf0]  ;;  %v6299_v14 = vor.u32 %v7888_v3, %v6296_v21  ;;  %v6856_v3 = vld [vmem:[%s12325_s3 + $0x4ec] sm:$0xf0]  ;;  %v7556_v21 = vld [vmem:[%s12325_s3 + $0xa64] sm:$0xf0] }
 0x139   :  { %4469 = vmatpush.bf16.msrb.mxu1 %v6519_v41  ;;  %v10384_v32 = vpack.c.bf16 %v8219_v18, %v8221_v52  ;;  %v7902_v41 = vld [vmem:[%s12325_s3 + $0xe4] sm:$0xf]  ;;  %v7881_v18 = vld [vmem:[%s12325_s3 + $0x3c] sm:$0xf]  ;;  %v6520_v52 = vld [vmem:[%s12325_s3 + $0x24c] sm:$0xf0] }
 0x13a   :  { %4483 = vmatpush.bf16.msrb.mxu2 %v6743_v10  ;;  %v6352_v10 = vld [vmem:[%s12325_s3 + $0xfc] sm:$0xf0]  ;;  %v2076_v27 = vadd.f32 %v2075_v7, %v2062_v23  ;;  %v6271_v25 = vor.u32 %v7881_v18, %v6268_v8  ;;  %v6523_v11 = vor.u32 %v7944_v55, %v6520_v52  ;;  %v8021_v18 = vld [vmem:[%s12325_s3 + $0x49c] sm:$0xf]  ;;  %v8199_v8 = vld [vmem:[%s12325_s3 + $0xa28] sm:$0xf0] }
 0x13b   :  { %4497 = vmatpush.bf16.msrb.mxu3 %v6967_v42  ;;  %v6355_v38 = vor.u32 %v7902_v41, %v6352_v10  ;;  %v7895_v42 = vld [vmem:[%s12325_s3 + $0xac] sm:$0xf]  ;;  %v7332_v10 = vld [vmem:[%s12325_s3 + $0x8a4] sm:$0xf0]  ;;  %v8196_v55 = vld [vmem:[%s12325_s3 + $0xa14] sm:$0xf] }
 0x13c   :  { %4456 = vmatpush.bf16.msrb.mxu0 %v6267_v6  ;;  %v7275_v6 = vor.u32 %v8136_v63, %v7274_v39  ;;  %v6327_v43 = vor.u32 %v7895_v42, %v6324_v34  ;;  %v8147_v41 = vld [vmem:[%s12325_s3 + $0x88c] sm:$0xf]  ;;  %v7930_v63 = vld [vmem:[%s12325_s3 + $0x1c4] sm:$0xf]  ;;  %v8133_v34 = vld [vmem:[%s12325_s3 + $0x81c] sm:$0xf] }
 0x13d   :  { %4470 = vmatpush.bf16.msrb.mxu1 %v6491_v44  ;;  %v6607_v44 = vor.u32 %v7965_v29, %v6604_v60  ;;  %v8035_v42 = vld [vmem:[%s12325_s3 + $0x50c] sm:$0xf] }
 0x13e   :  { %4484 = vmatpush.bf16.msrb.mxu2 %v6715_v49  ;;  %v7246_v49 = vld [vmem:[%s12325_s3 + $0x7e0] sm:$0xf]  ;;  %v8119_v52 = vld [vmem:[%s12325_s3 + $0x7ac] sm:$0xf] }
 0x13f   :  { %4498 = vmatpush.bf16.msrb.mxu3 %v6939_v1  ;;  %v7247_v56 = vor.u32 %v8129_v62, %v7246_v49  ;;  %v2078_v1 = vadd.f32 %v2077_v36, %v2064_v48  ;;  %v7163_v36 = vor.u32 %v8108_v22, %v7162_v31  ;;  %v8140_v49 = vld [vmem:[%s12325_s3 + $0x854] sm:$0xf]  ;;  %v7304_v62 = vld [vmem:[%s12325_s3 + $0x86c] sm:$0xf0]  ;;  %v7498_v22 = vld [vmem:[%s12325_s3 + $0x9d8] sm:$0xf] }
 0x140   :  { %4457 = vmatpush.bf16.msrb.mxu0 %v6239_v58  ;;  %v2089_v37 = vpop.f32.mrf.mxu0  ;;  %v7218_v58 = vld [vmem:[%s12325_s3 + $0x7a8] sm:$0xf] }
 0x141   :  { %4471 = vmatpush.bf16.msrb.mxu1 %v6463_v2  ;;  %v2103_v40 = vpop.f32.mrf.mxu1  ;;  %v2090_v54 = vadd.f32 %v2089_v37, %v2076_v27  ;;  %v7951_v2 = vld [vmem:[%s12325_s3 + $0x26c] sm:$0xf]  ;;  %v7219_v13 = vor.u32 %v8122_v61, %v7218_v58  ;;  %v7134_v27 = vld [vmem:[%s12325_s3 + $0x700] sm:$0xf]  ;;  %v8101_v37 = vld [vmem:[%s12325_s3 + $0x718] sm:$0xf0] }
 0x142   :  { %4485 = vmatpush.bf16.msrb.mxu2 %v6687_v5  ;;  %v6548_v5 = vld [vmem:[%s12325_s3 + $0x284] sm:$0xf0]  ;;  %v7135_v48 = vor.u32 %v8101_v37, %v7134_v27  ;;  %v8206_v58 = vld [vmem:[%s12325_s3 + $0xa60] sm:$0xf0]  ;;  %v8203_v61 = vld [vmem:[%s12325_s3 + $0xa4c] sm:$0xf] }
 0x143   :  { %4458 = vmatmul.bf16.vlgmr.msrb.gmra.mxu0 %v10382_v16  ;;  %4499 = vmatpush.bf16.msrb.mxu3 %v6911_v17  ;;  %v2104_v7 = vadd.f32 %v2103_v40, %v2090_v54  ;;  %v6551_v15 = vor.u32 %v7951_v2, %v6548_v5  ;;  %v6464_v40 = vld [vmem:[%s12325_s3 + $0x1dc] sm:$0xf0]  ;;  %v7307_v54 = vor.u32 %v8140_v49, %v7304_v62  ;;  %v8182_v27 = vld [vmem:[%s12325_s3 + $0x9a4] sm:$0xf]  ;;  %v8105_v37 = vld [vmem:[%s12325_s3 + $0x73c] sm:$0xf] }
 0x144   :  { %4472 = vmatmul.bf16.vlgmr.msrb.gmra.mxu1 %v10384_v32  ;;  %4506 = vmatpush.bf16.msra.mxu0 %v7331_v20  ;;  %v6467_v50 = vor.u32 %v7930_v63, %v6464_v40  ;;  %v8185_v63 = vld [vmem:[%s12325_s3 + $0x9b8] sm:$0xf0]  ;;  %v7472_v40 = vld [vmem:[%s12325_s3 + $0x9bc] sm:$0xf0]  ;;  %v8000_v49 = vld [vmem:[%s12325_s3 + $0x3f4] sm:$0xf] }
 0x145   :  { %4486 = vmatmul.bf16.vlgmr.msrb.gmra.mxu2 %v10373_v45  ;;  %v6744_v62 = vld [vmem:[%s12325_s3 + $0x40c] sm:$0xf0] }
 0x146   :  { %4534 = vmatpush.bf16.msra.mxu2 %v6439_v9 }
 0x147   :  { %4548 = vmatpush.bf16.msra.mxu3 %v6663_v26  ;;  %v7874_v26 = vld [vmem:[%s12325_s3 + $0x4] sm:$0xf] }
 0x148   :  { %4507 = vmatpush.bf16.msra.mxu0 %v7303_v33  ;;  %v2117_v59 = vpop.f32.mrf.mxu2  ;;  %v2091_v9 = vpop.f32.mrf.mxu0  ;;  %v6492_v33 = vld [vmem:[%s12325_s3 + $0x214] sm:$0xf0]  ;;  %v6243_v29 = vor.u32 %v7874_v26, %v6240_v28  ;;  %v8014_v26 = vld [vmem:[%s12325_s3 + $0x464] sm:$0xf] }
 0x149   :  { %v2131_v12 = vpop.f32.mrf.mxu3  ;;  %v2092_v46 = vadd.f32 %v2091_v9, %v2078_v1  ;;  %v2118_v17 = vadd.f32 %v2117_v59, %v2104_v7  ;;  %v2105_v20 = vpop.f32.mrf.mxu1  ;;  %v6495_v60 = vor.u32 %v7937_v30, %v6492_v33  ;;  %v7559_v9 = vor.u32 %v8203_v61, %v7556_v21  ;;  %v8189_v33 = vld [vmem:[%s12325_s3 + $0x9dc] sm:$0xf]  ;;  %v7444_v61 = vld [vmem:[%s12325_s3 + $0x984] sm:$0xf0] }
 0x14a   :  { %4535 = vmatpush.bf16.msra.mxu2 %v6411_v24  ;;  %v7191_v24 = vor.u32 %v8115_v53, %v7190_v0 }
 0x14b   :  { %4549 = vmatpush.bf16.msra.mxu3 %v6635_v35  ;;  %v2106_v23 = vadd.f32 %v2105_v20, %v2092_v46  ;;  %v7526_v46 = vld [vmem:[%s12325_s3 + $0xa10] sm:$0xf] }
 0x14c   :  { %4508 = vmatpush.bf16.msra.mxu0 %v7275_v6  ;;  %v7527_v20 = vor.u32 %v8199_v8, %v7526_v46  ;;  %v7416_v46 = vld [vmem:[%s12325_s3 + $0x94c] sm:$0xf0] }
 0x14e   :  { %4536 = vmatpush.bf16.msra.mxu2 %v6383_v57  ;;  %v2132_v57 = vadd.f32 %v2131_v12, %v2118_v17  ;;  %v7220_v17 = vld [vmem:[%s12325_s3 + $0x7c4] sm:$0xf0] }
 0x14f   :  { %4550 = vmatpush.bf16.msra.mxu3 %v6607_v44  ;;  %v6884_v44 = vld [vmem:[%s12325_s3 + $0x524] sm:$0xf0]  ;;  %v7223_v28 = vor.u32 %v8119_v52, %v7220_v17  ;;  %v7986_v17 = vld [vmem:[%s12325_s3 + $0x384] sm:$0xf] }
 0x150   :  { %4509 = vmatpush.bf16.msra.mxu0 %v7247_v56  ;;  %v2119_v19 = vpop.f32.mrf.mxu2  ;;  %8222 = vtanh.f32 %v2132_v57  ;;  %v6887_v51 = vor.u32 %v8035_v42, %v6884_v44  ;;  %v7276_v56 = vld [vmem:[%s12325_s3 + $0x834] sm:$0xf0]  ;;  %v7475_v44 = vor.u32 %v8182_v27, %v7472_v40  ;;  %v7108_v40 = vld [vmem:[%s12325_s3 + $0x6e4] sm:$0xf0] }
 0x151   :  { %v2120_v35 = vadd.f32 %v2119_v19, %v2106_v23  ;;  %v2133_v39 = vpop.f32.mrf.mxu3  ;;  %v7279_v59 = vor.u32 %v8133_v34, %v7276_v56  ;;  %v8192_v23 = vld [vmem:[%s12325_s3 + $0x9f0] sm:$0xf0]  ;;  %v7500_v57 = vld [vmem:[%s12325_s3 + $0x9f4] sm:$0xf0]  ;;  %v7442_v56 = vld [vmem:[%s12325_s3 + $0x968] sm:$0xf] }
 0x152   :  { %4537 = vmatpush.bf16.msra.mxu2 %v6355_v38  ;;  %v7335_v38 = vor.u32 %v8147_v41, %v7332_v10  ;;  %v7499_v30 = vor.u32 %v8192_v23, %v7498_v22  ;;  %v8112_v19 = vld [vmem:[%s12325_s3 + $0x774] sm:$0xf]  ;;  %v7192_v41 = vld [vmem:[%s12325_s3 + $0x78c] sm:$0xf0]  ;;  %v7503_v10 = vor.u32 %v8189_v33, %v7500_v57  ;;  %v7386_v22 = vld [vmem:[%s12325_s3 + $0x8f8] sm:$0xf] }
 0x153   :  { %4551 = vmatpush.bf16.msra.mxu3 %v6579_v47  ;;  %v2134_v6 = vadd.f32 %v2133_v39, %v2120_v35  ;;  %v7554_v47 = vld [vmem:[%s12325_s3 + $0xa48] sm:$0xf]  ;;  %v8007_v35 = vld [vmem:[%s12325_s3 + $0x42c] sm:$0xf]  ;;  %v8164_v23 = vld [vmem:[%s12325_s3 + $0x910] sm:$0xf0] }
 0x154   :  { %4510 = vmatpush.bf16.msra.mxu0 %v7219_v13  ;;  %v7555_v1 = vor.u32 %v8206_v58, %v7554_v47  ;;  %v8126_v13 = vld [vmem:[%s12325_s3 + $0x7e4] sm:$0xf]  ;;  %v6772_v39 = vld [vmem:[%s12325_s3 + $0x444] sm:$0xf0]  ;;  %v6890_v47 = vld [vmem:[%s12325_s3 + $0x510] sm:$0xf] }
 0x155   :  { %8224 = vtanh.f32 %v2134_v6  ;;  %v7164_v6 = vld [vmem:[%s12325_s3 + $0x754] sm:$0xf0]  ;;  %v6834_v33 = vld [vmem:[%s12325_s3 + $0x4a0] sm:$0xf]  ;;  %v8025_v57 = vld [vmem:[%s12325_s3 + $0x4b8] sm:$0xf0] }
 0x156   :  { %4538 = vmatpush.bf16.msra.mxu2 %v6327_v43  ;;  %v8028_v43 = vld [vmem:[%s12325_s3 + $0x4d4] sm:$0xf]  ;;  %v8223_v2 = vpop.eup %8222  ;;  %4520 = vmatpush.bf16.msra.mxu1 %v7555_v1  ;;  %v8039_v1 = vld [vmem:[%s12325_s3 + $0x528] sm:$0xf0]  ;;  %v6835_v27 = vor.u32 %v8025_v57, %v6834_v33 }
 0x157   :  { %4552 = vmatpush.bf16.msra.mxu3 %v6551_v15  ;;  %v6859_v5 = vor.u32 %v8028_v43, %v6856_v3  ;;  %v6828_v15 = vld [vmem:[%s12325_s3 + $0x4b4] sm:$0xf0]  ;;  %v8178_v43 = vld [vmem:[%s12325_s3 + $0x980] sm:$0xf0]  ;;  %v7136_v3 = vld [vmem:[%s12325_s3 + $0x71c] sm:$0xf0] }
 0x158   :  { %4511 = vmatpush.bf16.msra.mxu0 %v7191_v24  ;;  %v6831_v0 = vor.u32 %v8021_v18, %v6828_v15  ;;  %v7528_v24 = vld [vmem:[%s12325_s3 + $0xa2c] sm:$0xf0]  ;;  %v7443_v58 = vor.u32 %v8178_v43, %v7442_v56  ;;  %v6891_v15 = vor.u32 %v8039_v1, %v6890_v47  ;;  %v8084_v43 = vld [vmem:[%s12325_s3 + $0x694] sm:$0xf] }
 0x15a   :  { %4539 = vmatpush.bf16.msra.mxu2 %v6299_v14  ;;  %v7248_v14 = vld [vmem:[%s12325_s3 + $0x7fc] sm:$0xf0]  ;;  %4521 = vmatpush.bf16.msra.mxu1 %v7527_v20 }
 0x15b   :  { %4553 = vmatpush.bf16.msra.mxu3 %v6523_v11  ;;  %v8225_v7 = vpop.eup %8224  ;;  %v7251_v53 = vor.u32 %v8126_v13, %v7248_v14  ;;  %v6800_v11 = vld [vmem:[%s12325_s3 + $0x47c] sm:$0xf0]  ;;  %v8171_v13 = vld [vmem:[%s12325_s3 + $0x948] sm:$0xf0]  ;;  %v8168_v14 = vld [vmem:[%s12325_s3 + $0x934] sm:$0xf] }
 0x15c   :  { %4512 = vmatpush.bf16.msra.mxu0 %v7163_v36  ;;  %v10552_v12 = vpack.c.bf16 %v8225_v7, %v8223_v2  ;;  %v6803_v31 = vor.u32 %v8014_v26, %v6800_v11  ;;  %v6775_v36 = vor.u32 %v8007_v35, %v6772_v39  ;;  %v7993_v2 = vld [vmem:[%s12325_s3 + $0x3bc] sm:$0xf]  ;;  %v7419_v52 = vor.u32 %v8168_v14, %v7416_v46  ;;  %v6688_v20 = vld [vmem:[%s12325_s3 + $0x39c] sm:$0xf0]  ;;  %v6806_v39 = vld [vmem:[%s12325_s3 + $0x468] sm:$0xf] }
 0x15d   :  { %v8077_v14 = vld [vmem:[%s12325_s3 + $0x65c] sm:$0xf] }
 0x15e   :  { %4540 = vmatpush.bf16.msra.mxu2 %v6271_v25  ;;  %4500 = vmatmul.bf16.vlgmr.msrb.gmra.mxu3 %v10552_v12  ;;  %v7531_v25 = vor.u32 %v8196_v55, %v7528_v24  ;;  %v8032_v55 = vld [vmem:[%s12325_s3 + $0x4f0] sm:$0xf0]  ;;  %v6691_v24 = vor.u32 %v7986_v17, %v6688_v20 }
 0x15f   :  { %4554 = vmatpush.bf16.msra.mxu3 %v6495_v60  ;;  %4522 = vmatpush.bf16.msra.mxu1 %v7499_v30  ;;  %v7470_v60 = vld [vmem:[%s12325_s3 + $0x9a0] sm:$0xf] }
 0x160   :  { %4513 = vmatpush.bf16.msra.mxu0 %v7135_v48  ;;  %v2145_v42 = vpop.f32.mrf.mxu0  ;;  %v322_v48 = vperm.slane %v10054_v4, 4  ;;  %v8175_v4 = vld [vmem:[%s12325_s3 + $0x96c] sm:$0xf] }
 0x161   :  { %v2159_v34 = vpop.f32.mrf.mxu1  ;;  %v7447_v21 = vor.u32 %v8175_v4, %v7444_v61  ;;  %v7080_v4 = vld [vmem:[%s12325_s3 + $0x6ac] sm:$0xf0]  ;;  %v8011_v61 = vld [vmem:[%s12325_s3 + $0x448] sm:$0xf0] }
 0x162   :  { %4541 = vmatpush.bf16.msra.mxu2 %v6243_v29  ;;  %v7195_v29 = vor.u32 %v8112_v19, %v7192_v41  ;;  %v2146_v18 = vadd.f32 %v2145_v42, %v322_v48  ;;  %v7387_v19 = vor.u32 %v8164_v23, %v7386_v22  ;;  %v7388_v41 = vld [vmem:[%s12325_s3 + $0x914] sm:$0xf0]  ;;  %v8018_v42 = vld [vmem:[%s12325_s3 + $0x480] sm:$0xf0]  ;;  %v7083_v1 = vor.u32 %v8084_v43, %v7080_v4  ;;  %v7997_v22 = vld [vmem:[%s12325_s3 + $0x3d8] sm:$0xf0] }
 0x163   :  { %4555 = vmatpush.bf16.msra.mxu3 %v6467_v50  ;;  %v8098_v50 = vld [vmem:[%s12325_s3 + $0x704] sm:$0xf]  ;;  %v6807_v56 = vor.u32 %v8018_v42, %v6806_v39  ;;  %v7002_v39 = vld [vmem:[%s12325_s3 + $0x5f0] sm:$0xf] }
 0x164   :  { %4562 = vmatpush.bf16.msrb.mxu0 %v6887_v51  ;;  %v6747_v51 = vor.u32 %v8000_v49, %v6744_v62  ;;  %v2160_v26 = vadd.f32 %v2159_v34, %v2146_v18  ;;  %v7114_v62 = vld [vmem:[%s12325_s3 + $0x6d0] sm:$0xf]  ;;  %v7052_v18 = vld [vmem:[%s12325_s3 + $0x674] sm:$0xf0] }
 0x165   :  { %4542 = vmatmul.bf16.vlgmr.msra.gmra.mxu2 %v10382_v16  ;;  %v7055_v46 = vor.u32 %v8077_v14, %v7052_v18  ;;  %v6968_v42 = vld [vmem:[%s12325_s3 + $0x5cc] sm:$0xf0]  ;;  %v6386_v14 = vld [vmem:[%s12325_s3 + $0x120] sm:$0xf]  ;;  %v7913_v18 = vld [vmem:[%s12325_s3 + $0x138] sm:$0xf0] }
 0x166   :  { %4590 = vmatpush.bf16.msrb.mxu2 %v7335_v38  ;;  %v7471_v38 = vor.u32 %v8185_v63, %v7470_v60  ;;  %v8154_v60 = vld [vmem:[%s12325_s3 + $0x8c4] sm:$0xf] }
 0x167   :  { %4604 = vmatpush.bf16.msrb.mxu3 %v7559_v9  ;;  %v7414_v9 = vld [vmem:[%s12325_s3 + $0x930] sm:$0xf] }
 0x168   :  { %4563 = vmatpush.bf16.msrb.mxu0 %v6859_v5  ;;  %4523 = vmatpush.bf16.msra.mxu1 %v7471_v38  ;;  %v6716_v5 = vld [vmem:[%s12325_s3 + $0x3d4] sm:$0xf0]  ;;  %v2173_v8 = vpop.f32.mrf.mxu2  ;;  %v8091_v38 = vld [vmem:[%s12325_s3 + $0x6cc] sm:$0xf] }
 0x169   :  { %v6719_v7 = vor.u32 %v7993_v2, %v6716_v5  ;;  %v2161_v11 = vpop.f32.mrf.mxu1  ;;  %v2187_v30 = vpop.f32.mrf.mxu3  ;;  %v2174_v63 = vadd.f32 %v2173_v8, %v2160_v26  ;;  %v7111_v49 = vor.u32 %v8091_v38, %v7108_v40  ;;  %v8081_v8 = vld [vmem:[%s12325_s3 + $0x678] sm:$0xf0]  ;;  %v7030_v26 = vld [vmem:[%s12325_s3 + $0x628] sm:$0xf]  ;;  %v8056_v40 = vld [vmem:[%s12325_s3 + $0x5b4] sm:$0xf] }
 0x16a   :  { %4591 = vmatpush.bf16.msrb.mxu2 %v7307_v54  ;;  %v7167_v54 = vor.u32 %v8105_v37, %v7164_v6  ;;  %v7360_v6 = vld [vmem:[%s12325_s3 + $0x8dc] sm:$0xf0] }
 0x16b   :  { %4605 = vmatpush.bf16.msrb.mxu3 %v7531_v25  ;;  %v2147_v25 = vpop.f32.mrf.mxu0 }
 0x16c   :  { %4564 = vmatpush.bf16.msrb.mxu0 %v6831_v0  ;;  %4524 = vmatpush.bf16.msra.mxu1 %v7443_v58  ;;  %v6862_v0 = vld [vmem:[%s12325_s3 + $0x4d8] sm:$0xf]  ;;  %v6778_v58 = vld [vmem:[%s12325_s3 + $0x430] sm:$0xf] }
 0x16e   :  { %4592 = vmatpush.bf16.msrb.mxu2 %v7279_v59  ;;  %4556 = vmatmul.bf16.vlgmr.msra.gmra.mxu3 %v10384_v32  ;;  %v7139_v59 = vor.u32 %v8098_v50, %v7136_v3  ;;  %v7086_v3 = vld [vmem:[%s12325_s3 + $0x698] sm:$0xf] }
 0x16f   :  { %4606 = vmatpush.bf16.msrb.mxu3 %v7503_v10  ;;  %v2148_v10 = vadd.f32 %v2147_v25, %v322_v48  ;;  %v8095_v48 = vld [vmem:[%s12325_s3 + $0x6e8] sm:$0xf0]  ;;  %v7024_v25 = vld [vmem:[%s12325_s3 + $0x63c] sm:$0xf0] }
 0x170   :  { %4565 = vmatpush.bf16.msrb.mxu0 %v6803_v31  ;;  %v6863_v31 = vor.u32 %v8032_v55, %v6862_v0  ;;  %v7115_v50 = vor.u32 %v8095_v48, %v7114_v62  ;;  %v6750_v0 = vld [vmem:[%s12325_s3 + $0x3f8] sm:$0xf]  ;;  %v6444_v62 = vld [vmem:[%s12325_s3 + $0x1ac] sm:$0xf0]  ;;  %v6971_v48 = vor.u32 %v8056_v40, %v6968_v42 }
 0x171   :  { %v2162_v34 = vadd.f32 %v2161_v11, %v2148_v10  ;;  %v8063_v10 = vld [vmem:[%s12325_s3 + $0x5ec] sm:$0xf]  ;;  %v6302_v42 = vld [vmem:[%s12325_s3 + $0x78] sm:$0xf] }
 0x172   :  { %4593 = vmatpush.bf16.msrb.mxu2 %v7251_v53  ;;  %v7415_v53 = vor.u32 %v8171_v13, %v7414_v9  ;;  %v6779_v13 = vor.u32 %v8011_v61, %v6778_v58  ;;  %v7917_v61 = vld [vmem:[%s12325_s3 + $0x15c] sm:$0xf] }
 0x173   :  { %4607 = vmatpush.bf16.msrb.mxu3 %v7475_v44  ;;  %v7363_v44 = vor.u32 %v8154_v60, %v7360_v6  ;;  %v7927_v6 = vld [vmem:[%s12325_s3 + $0x1a8] sm:$0xf0] }
 0x174   :  { %4566 = vmatpush.bf16.msrb.mxu0 %v6775_v36  ;;  %4525 = vmatpush.bf16.msra.mxu1 %v7415_v53  ;;  %v7358_v36 = vld [vmem:[%s12325_s3 + $0x8c0] sm:$0xf]  ;;  %v8004_v53 = vld [vmem:[%s12325_s3 + $0x410] sm:$0xf0] }
 0x175   :  { %v6751_v20 = vor.u32 %v8004_v53, %v6750_v0  ;;  %v7910_v53 = vld [vmem:[%s12325_s3 + $0x124] sm:$0xf] }
 0x176   :  { %4594 = vmatpush.bf16.msrb.mxu2 %v7223_v28  ;;  %v8161_v28 = vld [vmem:[%s12325_s3 + $0x8fc] sm:$0xf] }
 0x177   :  { %4608 = vmatpush.bf16.msrb.mxu3 %v7447_v21  ;;  %v7391_v35 = vor.u32 %v8161_v28, %v7388_v41  ;;  %v8088_v21 = vld [vmem:[%s12325_s3 + $0x6b0] sm:$0xf0]  ;;  %v8074_v28 = vld [vmem:[%s12325_s3 + $0x640] sm:$0xf0] }
 0x178   :  { %4567 = vmatpush.bf16.msrb.mxu0 %v6747_v51  ;;  %4526 = vmatpush.bf16.msra.mxu1 %v7387_v19  ;;  %v2175_v51 = vpop.f32.mrf.mxu2  ;;  %v7031_v57 = vor.u32 %v8074_v28, %v7030_v26  ;;  %v7903_v28 = vld [vmem:[%s12325_s3 + $0xec] sm:$0xf] }
 0x179   :  { %v2176_v5 = vadd.f32 %v2175_v51, %v2162_v34  ;;  %v8060_v34 = vld [vmem:[%s12325_s3 + $0x5d0] sm:$0xf0] }
 0x17a   :  { %4595 = vmatpush.bf16.msrb.mxu2 %v7195_v29  ;;  %v8157_v29 = vld [vmem:[%s12325_s3 + $0x8d8] sm:$0xf0] }
 0x17b   :  { %4609 = vmatpush.bf16.msrb.mxu3 %v7419_v52  ;;  %v7359_v37 = vor.u32 %v8157_v29, %v7358_v36  ;;  %v6694_v36 = vld [vmem:[%s12325_s3 + $0x388] sm:$0xf]  ;;  %v7990_v29 = vld [vmem:[%s12325_s3 + $0x3a0] sm:$0xf0] }
 0x17c   :  { %4568 = vmatpush.bf16.msrb.mxu0 %v6719_v7  ;;  %v7087_v7 = vor.u32 %v8088_v21, %v7086_v3  ;;  %v6695_v38 = vor.u32 %v7990_v29, %v6694_v36  ;;  %v8049_v21 = vld [vmem:[%s12325_s3 + $0x57c] sm:$0xf]  ;;  %v7899_v36 = vld [vmem:[%s12325_s3 + $0xc8] sm:$0xf0]  ;;  %v7896_v29 = vld [vmem:[%s12325_s3 + $0xb4] sm:$0xf] }
 0x17d   :  { %4527 = vmatpush.bf16.msra.mxu1 %v7359_v37  ;;  %v6442_v37 = vld [vmem:[%s12325_s3 + $0x190] sm:$0xf] }
 0x17e   :  { %4596 = vmatpush.bf16.msrb.mxu2 %v7167_v54  ;;  %v2188_v54 = vadd.f32 %v2187_v30, %v2174_v63  ;;  %v8067_v63 = vld [vmem:[%s12325_s3 + $0x608] sm:$0xf0] }
 0x17f   :  { %4610 = vmatpush.bf16.msrb.mxu3 %v7391_v35  ;;  %v6996_v35 = vld [vmem:[%s12325_s3 + $0x604] sm:$0xf0] }
 0x180   :  { %4569 = vmatpush.bf16.msrb.mxu0 %v6691_v24  ;;  %v2201_v47 = vpop.f32.mrf.mxu0  ;;  %v8070_v24 = vld [vmem:[%s12325_s3 + $0x624] sm:$0xf]  ;;  %v6999_v60 = vor.u32 %v8063_v10, %v6996_v35 }
 0x181   :  { %4576 = vmatpush.bf16.msrb.mxu1 %v7111_v49  ;;  %v2215_v2 = vpop.f32.mrf.mxu1  ;;  %v2202_v9 = vadd.f32 %v2201_v47, %v2188_v54  ;;  %v7027_v23 = vor.u32 %v8070_v24, %v7024_v25  ;;  %v7924_v49 = vld [vmem:[%s12325_s3 + $0x194] sm:$0xf]  ;;  %v6414_v54 = vld [vmem:[%s12325_s3 + $0x158] sm:$0xf]  ;;  %v6443_v47 = vor.u32 %v7927_v6, %v6442_v37  ;;  %v8234_v24 = vld [vmem:[%s12324_s2] sm:$0x3f] }
 0x182   :  { %4597 = vmatpush.bf16.msrb.mxu2 %v7139_v59  ;;  %v2189_v59 = vpop.f32.mrf.mxu3  ;;  %v6447_v58 = vor.u32 %v7924_v49, %v6444_v62  ;;  %v323_v25 = vperm.slane %v8234_v24, 5  ;;  %v7889_v49 = vld [vmem:[%s12325_s3 + $0x7c] sm:$0xf]  ;;  %v6304_v62 = vld [vmem:[%s12325_s3 + $0x94] sm:$0xf0] }
 0x183   :  { %4611 = vmatpush.bf16.msrb.mxu3 %v7363_v44  ;;  %v2190_v55 = vadd.f32 %v2189_v59, %v2176_v5  ;;  %v2216_v17 = vadd.f32 %v2215_v2, %v2202_v9  ;;  %v6974_v44 = vld [vmem:[%s12325_s3 + $0x5b8] sm:$0xf]  ;;  %v8053_v59 = vld [vmem:[%s12325_s3 + $0x598] sm:$0xf0] }
 0x184   :  { %v6975_v51 = vor.u32 %v8060_v34, %v6974_v44  ;;  %v6940_v5 = vld [vmem:[%s12325_s3 + $0x594] sm:$0xf0]  ;;  %v7892_v44 = vld [vmem:[%s12325_s3 + $0x90] sm:$0xf0] }
 0x185   :  { %4577 = vmatpush.bf16.msrb.mxu1 %v7083_v1  ;;  %8226 = vtanh.f32 %v2216_v17  ;;  %v6416_v1 = vld [vmem:[%s12325_s3 + $0x174] sm:$0xf0]  ;;  %v6943_v9 = vor.u32 %v8049_v21, %v6940_v5  ;;  %v6918_v17 = vld [vmem:[%s12325_s3 + $0x548] sm:$0xf] }
 0x186   :  { %4646 = vmatpush.bf16.msra.mxu2 %v6891_v15  ;;  %v7058_v15 = vld [vmem:[%s12325_s3 + $0x660] sm:$0xf]  ;;  %v6419_v0 = vor.u32 %v7917_v61, %v6416_v1 }
 0x187   :  { %4660 = vmatpush.bf16.msra.mxu3 %v7115_v50  ;;  %v7059_v52 = vor.u32 %v8081_v8, %v7058_v15  ;;  %v6912_v8 = vld [vmem:[%s12325_s3 + $0x55c] sm:$0xf0] }
 0x188   :  { %v2203_v11 = vpop.f32.mrf.mxu0  ;;  %v2229_v4 = vpop.f32.mrf.mxu2  ;;  %v6276_v61 = vld [vmem:[%s12325_s3 + $0x5c] sm:$0xf0] }
 0x189   :  { %4578 = vmatpush.bf16.msrb.mxu1 %v7055_v46  ;;  %v2204_v30 = vadd.f32 %v2203_v11, %v2190_v55  ;;  %v2217_v33 = vpop.f32.mrf.mxu1  ;;  %v8042_v46 = vld [vmem:[%s12325_s3 + $0x544] sm:$0xf]  ;;  %v6388_v55 = vld [vmem:[%s12325_s3 + $0x13c] sm:$0xf0]  ;;  %v6387_v11 = vor.u32 %v7913_v18, %v6386_v14  ;;  %v7875_v14 = vld [vmem:[%s12325_s3 + $0xc] sm:$0xf] }
 0x18a   :  { %4647 = vmatpush.bf16.msra.mxu2 %v6863_v31  ;;  %v6722_v31 = vld [vmem:[%s12325_s3 + $0x3c0] sm:$0xf]  ;;  %v2243_v3 = vpop.f32.mrf.mxu3  ;;  %v6248_v18 = vld [vmem:[%s12325_s3 + $0x24] sm:$0xf0] }
 0x18b   :  { %4661 = vmatpush.bf16.msra.mxu3 %v7087_v7  ;;  %v2218_v19 = vadd.f32 %v2217_v33, %v2204_v30  ;;  %v6723_v41 = vor.u32 %v7997_v22, %v6722_v31  ;;  %v8227_v50 = vpop.eup %8226  ;;  %v6946_v7 = vld [vmem:[%s12325_s3 + $0x580] sm:$0xf]  ;;  %v6391_v31 = vor.u32 %v7910_v53, %v6388_v55  ;;  %v6358_v22 = vld [vmem:[%s12325_s3 + $0xe8] sm:$0xf]  ;;  %v2230_v33 = vadd.f32 %v2229_v4, %v323_v25  ;;  %v7340_v55 = vld [vmem:[%s12325_s3 + $0x8ac] sm:$0xf0] }
 0x18c   :  { %v6360_v30 = vld [vmem:[%s12325_s3 + $0x104] sm:$0xf0]  ;;  %v6274_v4 = vld [vmem:[%s12325_s3 + $0x40] sm:$0xf]  ;;  %v6251_v24 = vor.u32 %v7875_v14, %v6248_v18  ;;  %v7962_v14 = vld [vmem:[%s12325_s3 + $0x2c0] sm:$0xf0] }
 0x18d   :  { %4579 = vmatpush.bf16.msrb.mxu1 %v7027_v23  ;;  %8228 = vtanh.f32 %v2218_v19  ;;  %v7906_v23 = vld [vmem:[%s12325_s3 + $0x100] sm:$0xf0]  ;;  %v6363_v35 = vor.u32 %v7903_v28, %v6360_v30  ;;  %v7312_v28 = vld [vmem:[%s12325_s3 + $0x874] sm:$0xf0] }
 0x18e   :  { %4648 = vmatpush.bf16.msra.mxu2 %v6835_v27  ;;  %v7003_v27 = vor.u32 %v8067_v63, %v7002_v39  ;;  %v6359_v10 = vor.u32 %v7906_v23, %v6358_v22  ;;  %v6330_v39 = vld [vmem:[%s12325_s3 + $0xb0] sm:$0xf]  ;;  %v2244_v63 = vadd.f32 %v2243_v3, %v2230_v33  ;;  %v8144_v22 = vld [vmem:[%s12325_s3 + $0x870] sm:$0xf0]  ;;  %v8141_v23 = vld [vmem:[%s12325_s3 + $0x85c] sm:$0xf] }
 0x18f   :  { %4662 = vmatpush.bf16.msra.mxu3 %v7059_v52  ;;  %v6915_v52 = vor.u32 %v8042_v46, %v6912_v8  ;;  %v8151_v46 = vld [vmem:[%s12325_s3 + $0x8a8] sm:$0xf0]  ;;  %v8148_v8 = vld [vmem:[%s12325_s3 + $0x894] sm:$0xf]  ;;  %v7315_v33 = vor.u32 %v8141_v23, %v7312_v28  ;;  %v7170_v23 = vld [vmem:[%s12325_s3 + $0x740] sm:$0xf] }
 0x190   :  { %v8109_v28 = vld [vmem:[%s12325_s3 + $0x758] sm:$0xf0] }
 0x191   :  { %4580 = vmatpush.bf16.msrb.mxu1 %v6999_v60  ;;  %v6332_v60 = vld [vmem:[%s12325_s3 + $0xcc] sm:$0xf0] }
 0x192   :  { %4649 = vmatpush.bf16.msra.mxu2 %v6807_v56  ;;  %v7920_v56 = vld [vmem:[%s12325_s3 + $0x170] sm:$0xf0]  ;;  %v2245_v19 = vpop.f32.mrf.mxu3  ;;  %v6335_v40 = vor.u32 %v7896_v29, %v6332_v60  ;;  %v7284_v29 = vld [vmem:[%s12325_s3 + $0x83c] sm:$0xf0] }
 0x193   :  { %4663 = vmatpush.bf16.msra.mxu3 %v7031_v57  ;;  %v8229_v43 = vpop.eup %8228  ;;  %v6415_v15 = vor.u32 %v7920_v56, %v6414_v54  ;;  %v2231_v57 = vpop.f32.mrf.mxu2  ;;  %v6303_v56 = vor.u32 %v7892_v44, %v6302_v42 }
 0x194   :  { %v10854_v2 = vpack.c.bf16 %v8229_v43, %v8227_v50  ;;  %v2232_v37 = vadd.f32 %v2231_v57, %v323_v25  ;;  %v6307_v43 = vor.u32 %v7889_v49, %v6304_v62  ;;  %v6666_v57 = vld [vmem:[%s12325_s3 + $0x350] sm:$0xf]  ;;  %v7973_v49 = vld [vmem:[%s12325_s3 + $0x31c] sm:$0xf]  ;;  %v6640_v62 = vld [vmem:[%s12325_s3 + $0x334] sm:$0xf0] }
 0x195   :  { %4581 = vmatpush.bf16.msrb.mxu1 %v6971_v48 }
 0x196   :  { %4650 = vmatpush.bf16.msra.mxu2 %v6779_v13  ;;  %v6947_v13 = vor.u32 %v8053_v59, %v6946_v7  ;;  %4514 = vmatmul.bf16.vlgmr.msra.gmra.mxu0 %v10854_v2  ;;  %v2246_v50 = vadd.f32 %v2245_v19, %v2232_v37  ;;  %v6246_v59 = vld [vmem:[%s12325_s3 + $0x8] sm:$0xf]  ;;  %v7983_v19 = vld [vmem:[%s12325_s3 + $0x368] sm:$0xf0] }
 0x197   :  { %4664 = vmatpush.bf16.msra.mxu3 %v7003_v27  ;;  %4598 = vmatmul.bf16.vlgmr.msrb.gmra.mxu2 %v10854_v2 }
 0x198   :  { %4618 = vmatpush.bf16.msra.mxu0 %v6443_v47  ;;  %v7885_v47 = vld [vmem:[%s12325_s3 + $0x58] sm:$0xf0] }
 0x199   :  { %4582 = vmatpush.bf16.msrb.mxu1 %v6943_v9  ;;  %v6275_v5 = vor.u32 %v7885_v47, %v6274_v4  ;;  %v7878_v9 = vld [vmem:[%s12325_s3 + $0x20] sm:$0xf0]  ;;  %v7969_v4 = vld [vmem:[%s12325_s3 + $0x2f8] sm:$0xf0] }
 0x19a   :  { %4651 = vmatpush.bf16.msra.mxu2 %v6751_v20  ;;  %v8046_v20 = vld [vmem:[%s12325_s3 + $0x560] sm:$0xf0] }
 0x19b   :  { %4665 = vmatpush.bf16.msra.mxu3 %v6975_v51  ;;  %v6919_v26 = vor.u32 %v8046_v20, %v6918_v17  ;;  %v6247_v20 = vor.u32 %v7878_v9, %v6246_v59 }
 0x19c   :  { %4619 = vmatpush.bf16.msra.mxu0 %v6415_v15  ;;  %v7338_v15 = vld [vmem:[%s12325_s3 + $0x890] sm:$0xf] }
 0x19d   :  { %4583 = vmatpush.bf16.msrb.mxu1 %v6915_v52 }
 0x19e   :  { %4652 = vmatpush.bf16.msra.mxu2 %v6723_v41 }
 0x19f   :  { %4666 = vmatpush.bf16.msra.mxu3 %v6947_v13 }
 0x1a0   :  { %v2257_v41 = vpop.f32.mrf.mxu0  ;;  %4620 = vmatpush.bf16.msra.mxu0 %v6387_v11  ;;  %v7343_v11 = vor.u32 %v8148_v8, %v7340_v55  ;;  %v8116_v8 = vld [vmem:[%s12325_s3 + $0x790] sm:$0xf0]  ;;  %v8113_v55 = vld [vmem:[%s12325_s3 + $0x77c] sm:$0xf] }
 0x1a1   :  { %v2271_v27 = vpop.f32.mrf.mxu1  ;;  %v2258_v6 = vadd.f32 %v2257_v41, %v2244_v63  ;;  %v7980_v41 = vld [vmem:[%s12325_s3 + $0x354] sm:$0xf] }
 0x1a2   :  { %4653 = vmatpush.bf16.msra.mxu2 %v6695_v38  ;;  %v6331_v38 = vor.u32 %v7899_v36, %v6330_v39  ;;  %v8137_v39 = vld [vmem:[%s12325_s3 + $0x838] sm:$0xf0]  ;;  %v8134_v36 = vld [vmem:[%s12325_s3 + $0x824] sm:$0xf] }
 0x1a3   :  { %4667 = vmatpush.bf16.msra.mxu3 %v6919_v26  ;;  %v2272_v54 = vadd.f32 %v2271_v27, %v2258_v6  ;;  %v7339_v26 = vor.u32 %v8151_v46, %v7338_v15  ;;  %v6667_v27 = vor.u32 %v7983_v19, %v6666_v57  ;;  %v6638_v6 = vld [vmem:[%s12325_s3 + $0x318] sm:$0xf]  ;;  %v7287_v44 = vor.u32 %v8134_v36, %v7284_v29 }
 0x1a4   :  { %4621 = vmatpush.bf16.msra.mxu0 %v6359_v10  ;;  %v6668_v10 = vld [vmem:[%s12325_s3 + $0x36c] sm:$0xf0]  ;;  %v7198_v46 = vld [vmem:[%s12325_s3 + $0x778] sm:$0xf] }
 0x1a5   :  { %v6671_v37 = vor.u32 %v7980_v41, %v6668_v10  ;;  %v6526_v41 = vld [vmem:[%s12325_s3 + $0x238] sm:$0xf]  ;;  %v7948_v10 = vld [vmem:[%s12325_s3 + $0x250] sm:$0xf0] }
 0x1a6   :  { %4702 = vmatpush.bf16.msrb.mxu2 %v6447_v58  ;;  %4570 = vmatmul.bf16.vlgmr.msrb.gmra.mxu0 %v10373_v45  ;;  %v7882_v58 = vld [vmem:[%s12325_s3 + $0x44] sm:$0xf]  ;;  %v6528_v29 = vld [vmem:[%s12325_s3 + $0x254] sm:$0xf0] }
 0x1a7   :  { %4654 = vmatmul.bf16.vlgmr.msra.gmra.mxu2 %v10373_v45  ;;  %v6279_v7 = vor.u32 %v7882_v58, %v6276_v61  ;;  %v7966_v58 = vld [vmem:[%s12325_s3 + $0x2e4] sm:$0xf]  ;;  %v6612_v61 = vld [vmem:[%s12325_s3 + $0x2fc] sm:$0xf0] }
 0x1a8   :  { %v2285_v48 = vpop.f32.mrf.mxu2  ;;  %v2259_v51 = vpop.f32.mrf.mxu0  ;;  %4622 = vmatpush.bf16.msra.mxu0 %v6331_v38  ;;  %v7976_v38 = vld [vmem:[%s12325_s3 + $0x330] sm:$0xf0]  ;;  %v6615_v9 = vor.u32 %v7966_v58, %v6612_v61  ;;  %v6870_v58 = vld [vmem:[%s12325_s3 + $0x4e0] sm:$0xf]  ;;  %v8033_v61 = vld [vmem:[%s12325_s3 + $0x4f8] sm:$0xf0] }
 0x1a9   :  { %v2299_v34 = vpop.f32.mrf.mxu3  ;;  %v2260_v3 = vadd.f32 %v2259_v51, %v2246_v50  ;;  %v2286_v1 = vadd.f32 %v2285_v48, %v2272_v54  ;;  %v2273_v21 = vpop.f32.mrf.mxu1  ;;  %v7254_v48 = vld [vmem:[%s12325_s3 + $0x7e8] sm:$0xf]  ;;  %v8127_v50 = vld [vmem:[%s12325_s3 + $0x7ec] sm:$0xf]  ;;  %v6639_v54 = vor.u32 %v7976_v38, %v6638_v6  ;;  %v8036_v6 = vld [vmem:[%s12325_s3 + $0x514] sm:$0xf] }
 0x1aa   :  { %4703 = vmatpush.bf16.msrb.mxu2 %v6419_v0  ;;  %v7256_v51 = vld [vmem:[%s12325_s3 + $0x804] sm:$0xf0]  ;;  %v6892_v38 = vld [vmem:[%s12325_s3 + $0x52c] sm:$0xf0] }
 0x1ab   :  { %v2274_v13 = vadd.f32 %v2273_v21, %v2260_v3  ;;  %v2300_v0 = vadd.f32 %v2299_v34, %v2286_v1  ;;  %v8130_v34 = vld [vmem:[%s12325_s3 + $0x800] sm:$0xf0]  ;;  %v7259_v47 = vor.u32 %v8127_v50, %v7256_v51  ;;  %v7226_v1 = vld [vmem:[%s12325_s3 + $0x7b0] sm:$0xf]  ;;  %v8123_v21 = vld [vmem:[%s12325_s3 + $0x7c8] sm:$0xf0] }
 0x1ac   :  { %4623 = vmatpush.bf16.msra.mxu0 %v6303_v56  ;;  %v6643_v56 = vor.u32 %v7973_v49, %v6640_v62  ;;  %v7255_v3 = vor.u32 %v8130_v34, %v7254_v48  ;;  %v7227_v18 = vor.u32 %v8123_v21, %v7226_v1  ;;  %v6527_v49 = vor.u32 %v7948_v10, %v6526_v41  ;;  %v6498_v48 = vld [vmem:[%s12325_s3 + $0x200] sm:$0xf]  ;;  %v7941_v51 = vld [vmem:[%s12325_s3 + $0x218] sm:$0xf0] }
 0x1ad   :  { %8230 = vtanh.f32 %v2300_v0  ;;  %v7959_v0 = vld [vmem:[%s12325_s3 + $0x2ac] sm:$0xf]  ;;  %v6499_v1 = vor.u32 %v7941_v51, %v6498_v48  ;;  %v7480_v51 = vld [vmem:[%s12325_s3 + $0x9c4] sm:$0xf0] }
 0x1ae   :  { %4704 = vmatpush.bf16.msrb.mxu2 %v6391_v31  ;;  %v7310_v31 = vld [vmem:[%s12325_s3 + $0x858] sm:$0xf] }
 0x1af   :  { %v7311_v30 = vor.u32 %v8144_v22, %v7310_v31  ;;  %v7952_v31 = vld [vmem:[%s12325_s3 + $0x274] sm:$0xf]  ;;  %v6556_v22 = vld [vmem:[%s12325_s3 + $0x28c] sm:$0xf0] }
 0x1b0   :  { %v2287_v53 = vpop.f32.mrf.mxu2  ;;  %4624 = vmatpush.bf16.msra.mxu0 %v6275_v5  ;;  %v8120_v5 = vld [vmem:[%s12325_s3 + $0x7b4] sm:$0xf]  ;;  %v6559_v19 = vor.u32 %v7952_v31, %v6556_v22 }
 0x1b1   :  { %v2288_v52 = vadd.f32 %v2287_v53, %v2274_v13  ;;  %v2301_v17 = vpop.f32.mrf.mxu3  ;;  %v6582_v13 = vld [vmem:[%s12325_s3 + $0x2a8] sm:$0xf] }
 0x1b2   :  { %4705 = vmatpush.bf16.msrb.mxu2 %v6363_v35  ;;  %v7282_v35 = vld [vmem:[%s12325_s3 + $0x820] sm:$0xf]  ;;  %v6584_v53 = vld [vmem:[%s12325_s3 + $0x2c4] sm:$0xf0] }
 0x1b3   :  { %v2302_v25 = vadd.f32 %v2301_v17, %v2288_v52  ;;  %v8231_v60 = vpop.eup %8230  ;;  %v7283_v42 = vor.u32 %v8137_v39, %v7282_v35  ;;  %v7200_v52 = vld [vmem:[%s12325_s3 + $0x794] sm:$0xf0]  ;;  %v6583_v17 = vor.u32 %v7962_v14, %v6582_v13  ;;  %v7945_v35 = vld [vmem:[%s12325_s3 + $0x23c] sm:$0xf]  ;;  %v7171_v39 = vor.u32 %v8109_v28, %v7170_v23  ;;  %v7562_v13 = vld [vmem:[%s12325_s3 + $0xa50] sm:$0xf] }
 0x1b4   :  { %4625 = vmatpush.bf16.msra.mxu0 %v6247_v20  ;;  %v6587_v20 = vor.u32 %v7959_v0, %v6584_v53  ;;  %v6531_v62 = vor.u32 %v7945_v35, %v6528_v29  ;;  %v8207_v14 = vld [vmem:[%s12325_s3 + $0xa68] sm:$0xf0]  ;;  %v8204_v0 = vld [vmem:[%s12325_s3 + $0xa54] sm:$0xf]  ;;  %v7564_v53 = vld [vmem:[%s12325_s3 + $0xa6c] sm:$0xf0] }
 0x1b5   :  { %8232 = vtanh.f32 %v2302_v25  ;;  %v7955_v25 = vld [vmem:[%s12325_s3 + $0x288] sm:$0xf0]  ;;  %v8197_v23 = vld [vmem:[%s12325_s3 + $0xa1c] sm:$0xf]  ;;  %v7536_v28 = vld [vmem:[%s12325_s3 + $0xa34] sm:$0xf0] }
 0x1b6   :  { %4706 = vmatpush.bf16.msrb.mxu2 %v6335_v40  ;;  %v7539_v10 = vor.u32 %v8197_v23, %v7536_v28  ;;  %v7506_v35 = vld [vmem:[%s12325_s3 + $0x9e0] sm:$0xf] }
 0x1b7   :  { %4626 = vmatmul.bf16.vlgmr.msra.gmra.mxu0 %v10382_v16 }
 0x1b8   :  { %4674 = vmatpush.bf16.msrb.mxu0 %v7339_v26  ;;  %v7199_v26 = vor.u32 %v8116_v8, %v7198_v46  ;;  %v8022_v46 = vld [vmem:[%s12325_s3 + $0x4a4] sm:$0xf]  ;;  %v6836_v8 = vld [vmem:[%s12325_s3 + $0x4bc] sm:$0xf0] }
 0x1b9   :  { %v6839_v31 = vor.u32 %v8022_v46, %v6836_v8  ;;  %v8169_v46 = vld [vmem:[%s12325_s3 + $0x93c] sm:$0xf] }
 0x1ba   :  { %4707 = vmatpush.bf16.msrb.mxu2 %v6307_v43  ;;  %v6610_v43 = vld [vmem:[%s12325_s3 + $0x2e0] sm:$0xf] }
 0x1bb   :  { %v8233_v63 = vpop.eup %8232  ;;  %v6611_v59 = vor.u32 %v7969_v4, %v6610_v43  ;;  %v6895_v43 = vor.u32 %v8036_v6, %v6892_v38  ;;  %v6786_v6 = vld [vmem:[%s12325_s3 + $0x438] sm:$0xf]  ;;  %v8012_v38 = vld [vmem:[%s12325_s3 + $0x450] sm:$0xf0] }
 0x1bc   :  { %4675 = vmatpush.bf16.msrb.mxu0 %v7311_v30  ;;  %v11012_v40 = vpack.c.bf16 %v8233_v63, %v8231_v60  ;;  %v8106_v30 = vld [vmem:[%s12325_s3 + $0x744] sm:$0xf]  ;;  %v7142_v60 = vld [vmem:[%s12325_s3 + $0x708] sm:$0xf] }
 0x1bd   :  { %v8102_v63 = vld [vmem:[%s12325_s3 + $0x720] sm:$0xf0] }
 0x1be   :  { %4708 = vmatpush.bf16.msrb.mxu2 %v6279_v7  ;;  %4528 = vmatmul.bf16.vlgmr.msra.gmra.mxu1 %v11012_v40  ;;  %v7228_v7 = vld [vmem:[%s12325_s3 + $0x7cc] sm:$0xf0]  ;;  %v7143_v34 = vor.u32 %v8102_v63, %v7142_v60  ;;  %v8190_v60 = vld [vmem:[%s12325_s3 + $0x9e4] sm:$0xf]  ;;  %v7508_v63 = vld [vmem:[%s12325_s3 + $0x9fc] sm:$0xf0] }
 0x1bf   :  { %4612 = vmatmul.bf16.vlgmr.msrb.gmra.mxu3 %v11012_v40  ;;  %4632 = vmatpush.bf16.msra.mxu1 %v6667_v27  ;;  %v7231_v15 = vor.u32 %v8120_v5, %v7228_v7  ;;  %v8099_v27 = vld [vmem:[%s12325_s3 + $0x70c] sm:$0xf]  ;;  %v6470_v5 = vld [vmem:[%s12325_s3 + $0x1c8] sm:$0xf]  ;;  %v7934_v7 = vld [vmem:[%s12325_s3 + $0x1e0] sm:$0xf0] }
 0x1c0   :  { %4716 = vmatpush.bf16.msrb.mxu3 %v6671_v37  ;;  %4676 = vmatpush.bf16.msrb.mxu0 %v7283_v42  ;;  %v7144_v37 = vld [vmem:[%s12325_s3 + $0x724] sm:$0xf0]  ;;  %v6898_v42 = vld [vmem:[%s12325_s3 + $0x518] sm:$0xf] }
 0x1c1   :  { %v7147_v50 = vor.u32 %v8099_v27, %v7144_v37  ;;  %v8008_v27 = vld [vmem:[%s12325_s3 + $0x434] sm:$0xf]  ;;  %v6780_v37 = vld [vmem:[%s12325_s3 + $0x44c] sm:$0xf0] }
 0x1c2   :  { %4709 = vmatpush.bf16.msrb.mxu2 %v6251_v24  ;;  %v6554_v24 = vld [vmem:[%s12325_s3 + $0x270] sm:$0xf]  ;;  %v6783_v48 = vor.u32 %v8008_v27, %v6780_v37 }
 0x1c3   :  { %4633 = vmatpush.bf16.msra.mxu1 %v6639_v54  ;;  %v6555_v57 = vor.u32 %v7955_v25, %v6554_v24  ;;  %v7938_v54 = vld [vmem:[%s12325_s3 + $0x204] sm:$0xf]  ;;  %v7563_v24 = vor.u32 %v8207_v14, %v7562_v13  ;;  %v7567_v25 = vor.u32 %v8204_v0, %v7564_v53  ;;  %v6730_v13 = vld [vmem:[%s12325_s3 + $0x3c8] sm:$0xf]  ;;  %v7422_v0 = vld [vmem:[%s12325_s3 + $0x938] sm:$0xf] }
 0x1c4   :  { %4717 = vmatpush.bf16.msrb.mxu3 %v6643_v56  ;;  %4677 = vmatpush.bf16.msrb.mxu0 %v7255_v3  ;;  %v6500_v56 = vld [vmem:[%s12325_s3 + $0x21c] sm:$0xf0]  ;;  %v8029_v3 = vld [vmem:[%s12325_s3 + $0x4dc] sm:$0xf]  ;;  %v7998_v14 = vld [vmem:[%s12325_s3 + $0x3e0] sm:$0xf0] }
 0x1c5   :  { %4710 = vmatmul.bf16.vlgmr.msrb.gmra.mxu2 %v10382_v16  ;;  %v6503_v21 = vor.u32 %v7938_v54, %v6500_v56  ;;  %v8001_v54 = vld [vmem:[%s12325_s3 + $0x3fc] sm:$0xf]  ;;  %v6752_v56 = vld [vmem:[%s12325_s3 + $0x414] sm:$0xf0]  ;;  %v8172_v53 = vld [vmem:[%s12325_s3 + $0x950] sm:$0xf0] }
 0x1c6   :  { %4758 = vmatpush.bf16.msra.mxu2 %v7343_v11  ;;  %v7203_v11 = vor.u32 %v8113_v55, %v7200_v52  ;;  %v6842_v55 = vld [vmem:[%s12325_s3 + $0x4a8] sm:$0xf]  ;;  %v8026_v52 = vld [vmem:[%s12325_s3 + $0x4c0] sm:$0xf0]  ;;  %v7423_v23 = vor.u32 %v8172_v53, %v7422_v0 }
 0x1c7   :  { %4634 = vmatpush.bf16.msra.mxu1 %v6611_v59  ;;  %v7931_v59 = vld [vmem:[%s12325_s3 + $0x1cc] sm:$0xf]  ;;  %v6843_v22 = vor.u32 %v8026_v52, %v6842_v55  ;;  %v6731_v55 = vor.u32 %v7998_v14, %v6730_v13  ;;  %v7424_v52 = vld [vmem:[%s12325_s3 + $0x954] sm:$0xf0]  ;;  %v6366_v13 = vld [vmem:[%s12325_s3 + $0xf0] sm:$0xf] }
 0x1c8   :  { %4718 = vmatpush.bf16.msrb.mxu3 %v6615_v9  ;;  %4678 = vmatpush.bf16.msrb.mxu0 %v7227_v18  ;;  %v6472_v9 = vld [vmem:[%s12325_s3 + $0x1e4] sm:$0xf0]  ;;  %v7427_v28 = vor.u32 %v8169_v46, %v7424_v52  ;;  %v7907_v14 = vld [vmem:[%s12325_s3 + $0x108] sm:$0xf0]  ;;  %v8078_v46 = vld [vmem:[%s12325_s3 + $0x664] sm:$0xf] }
 0x1ca   :  { %4759 = vmatpush.bf16.msra.mxu2 %v7315_v33  ;;  %v7172_v33 = vld [vmem:[%s12325_s3 + $0x75c] sm:$0xf0] }
 0x1cb   :  { %4635 = vmatpush.bf16.msra.mxu1 %v6583_v17  ;;  %v7175_v36 = vor.u32 %v8106_v30, %v7172_v33  ;;  %v6471_v17 = vor.u32 %v7934_v7, %v6470_v5  ;;  %v8015_v30 = vld [vmem:[%s12325_s3 + $0x46c] sm:$0xf]  ;;  %v6808_v33 = vld [vmem:[%s12325_s3 + $0x484] sm:$0xf0]  ;;  %v8176_v5 = vld [vmem:[%s12325_s3 + $0x974] sm:$0xf] }
 0x1cc   :  { %4719 = vmatpush.bf16.msrb.mxu3 %v6587_v20  ;;  %4679 = vmatpush.bf16.msrb.mxu0 %v7199_v26  ;;  %v6475_v20 = vor.u32 %v7931_v59, %v6472_v9  ;;  %v7534_v26 = vld [vmem:[%s12325_s3 + $0xa18] sm:$0xf]  ;;  %v7452_v7 = vld [vmem:[%s12325_s3 + $0x98c] sm:$0xf0]  ;;  %v7994_v59 = vld [vmem:[%s12325_s3 + $0x3c4] sm:$0xf] }
 0x1cd   :  { %v6724_v9 = vld [vmem:[%s12325_s3 + $0x3dc] sm:$0xf0] }
 0x1ce   :  { %4760 = vmatpush.bf16.msra.mxu2 %v7287_v44  ;;  %4584 = vmatmul.bf16.vlgmr.msrb.gmra.mxu1 %v10552_v12  ;;  %v8040_v44 = vld [vmem:[%s12325_s3 + $0x530] sm:$0xf0]  ;;  %v6727_v8 = vor.u32 %v7994_v59, %v6724_v9  ;;  %v7094_v59 = vld [vmem:[%s12325_s3 + $0x6a0] sm:$0xf]  ;;  %v8089_v9 = vld [vmem:[%s12325_s3 + $0x6b8] sm:$0xf0] }
 0x1cf   :  { %4668 = vmatmul.bf16.vlgmr.msra.gmra.mxu3 %v10552_v12  ;;  %4636 = vmatpush.bf16.msra.mxu1 %v6555_v57  ;;  %v6899_v4 = vor.u32 %v8040_v44, %v6898_v42  ;;  %v6814_v57 = vld [vmem:[%s12325_s3 + $0x470] sm:$0xf]  ;;  %v7511_v44 = vor.u32 %v8190_v60, %v7508_v63  ;;  %v7918_v60 = vld [vmem:[%s12325_s3 + $0x164] sm:$0xf]  ;;  %v6424_v63 = vld [vmem:[%s12325_s3 + $0x17c] sm:$0xf0]  ;;  %v7095_v53 = vor.u32 %v8089_v9, %v7094_v59 }
 0x1d0   :  { %4720 = vmatpush.bf16.msrb.mxu3 %v6559_v19  ;;  %4680 = vmatpush.bf16.msrb.mxu0 %v7171_v39  ;;  %v8019_v19 = vld [vmem:[%s12325_s3 + $0x488] sm:$0xf0]  ;;  %v8193_v39 = vld [vmem:[%s12325_s3 + $0x9f8] sm:$0xf0] }
 0x1d1   :  { %v6815_v29 = vor.u32 %v8019_v19, %v6814_v57  ;;  %v7507_v42 = vor.u32 %v8193_v39, %v7506_v35  ;;  %v8165_v19 = vld [vmem:[%s12325_s3 + $0x918] sm:$0xf0] }
 0x1d2   :  { %4761 = vmatpush.bf16.msra.mxu2 %v7259_v47  ;;  %v6864_v47 = vld [vmem:[%s12325_s3 + $0x4f4] sm:$0xf0] }
 0x1d3   :  { %4637 = vmatpush.bf16.msra.mxu1 %v6527_v49  ;;  %v6867_v18 = vor.u32 %v8029_v3, %v6864_v47  ;;  %v7478_v49 = vld [vmem:[%s12325_s3 + $0x9a8] sm:$0xf] }
 0x1d4   :  { %4721 = vmatpush.bf16.msrb.mxu3 %v6531_v62  ;;  %4681 = vmatpush.bf16.msrb.mxu0 %v7143_v34  ;;  %v8186_v62 = vld [vmem:[%s12325_s3 + $0x9c0] sm:$0xf0]  ;;  %v6787_v34 = vor.u32 %v8012_v38, %v6786_v6  ;;  %v7366_v6 = vld [vmem:[%s12325_s3 + $0x8c8] sm:$0xf] }
 0x1d5   :  { %v7479_v3 = vor.u32 %v8186_v62, %v7478_v49  ;;  %v8158_v38 = vld [vmem:[%s12325_s3 + $0x8e0] sm:$0xf0]  ;;  %v8092_v49 = vld [vmem:[%s12325_s3 + $0x6d4] sm:$0xf]  ;;  %v7116_v62 = vld [vmem:[%s12325_s3 + $0x6ec] sm:$0xf0] }
 0x1d6   :  { %4762 = vmatpush.bf16.msra.mxu2 %v7231_v15  ;;  %v6871_v15 = vor.u32 %v8033_v61, %v6870_v58  ;;  %v7450_v58 = vld [vmem:[%s12325_s3 + $0x970] sm:$0xf]  ;;  %v8179_v61 = vld [vmem:[%s12325_s3 + $0x988] sm:$0xf0] }
 0x1d7   :  { %4638 = vmatpush.bf16.msra.mxu1 %v6499_v1  ;;  %4682 = vmatmul.bf16.vlgmr.msrb.gmra.mxu0 %v10854_v2  ;;  %v6755_v1 = vor.u32 %v8001_v54, %v6752_v56  ;;  %v6394_v54 = vld [vmem:[%s12325_s3 + $0x128] sm:$0xf]  ;;  %v7914_v56 = vld [vmem:[%s12325_s3 + $0x140] sm:$0xf0] }
 0x1d8   :  { %4730 = vmatpush.bf16.msra.mxu0 %v6895_v43  ;;  %4722 = vmatpush.bf16.msrb.mxu3 %v6503_v21  ;;  %v6758_v43 = vld [vmem:[%s12325_s3 + $0x400] sm:$0xf] }
 0x1da   :  { %4763 = vmatpush.bf16.msra.mxu2 %v7203_v11  ;;  %v8200_v11 = vld [vmem:[%s12325_s3 + $0xa30] sm:$0xf0] }
 0x1db   :  { %4639 = vmatpush.bf16.msra.mxu1 %v6471_v17  ;;  %v7535_v41 = vor.u32 %v8200_v11, %v7534_v26  ;;  %v7987_v17 = vld [vmem:[%s12325_s3 + $0x38c] sm:$0xf]  ;;  %v6450_v26 = vld [vmem:[%s12325_s3 + $0x198] sm:$0xf]  ;;  %v7928_v11 = vld [vmem:[%s12325_s3 + $0x1b0] sm:$0xf0] }
 0x1dc   :  { %4731 = vmatpush.bf16.msra.mxu0 %v6867_v18  ;;  %4723 = vmatpush.bf16.msrb.mxu3 %v6475_v20  ;;  %v7451_v18 = vor.u32 %v8179_v61, %v7450_v58  ;;  %v6696_v20 = vld [vmem:[%s12325_s3 + $0x3a4] sm:$0xf0]  ;;  %v6451_v35 = vor.u32 %v7928_v11, %v6450_v26  ;;  %v7119_v58 = vor.u32 %v8092_v49, %v7116_v62  ;;  %v7897_v26 = vld [vmem:[%s12325_s3 + $0xbc] sm:$0xf]  ;;  %v6340_v11 = vld [vmem:[%s12325_s3 + $0xd4] sm:$0xf0] }
 0x1dd   :  { %v7883_v49 = vld [vmem:[%s12325_s3 + $0x4c] sm:$0xf]  ;;  %v6284_v62 = vld [vmem:[%s12325_s3 + $0x64] sm:$0xf0] }
 0x1de   :  { %4764 = vmatpush.bf16.msra.mxu2 %v7175_v36  ;;  %v6811_v36 = vor.u32 %v8015_v30, %v6808_v33  ;;  %4640 = vmatmul.bf16.vlgmr.msra.gmra.mxu1 %v10384_v32  ;;  %v7394_v30 = vld [vmem:[%s12325_s3 + $0x900] sm:$0xf]  ;;  %v6699_v33 = vor.u32 %v7987_v17, %v6696_v20  ;;  %v7066_v17 = vld [vmem:[%s12325_s3 + $0x668] sm:$0xf]  ;;  %v8082_v20 = vld [vmem:[%s12325_s3 + $0x680] sm:$0xf0] }
 0x1df   :  { %4688 = vmatpush.bf16.msrb.mxu1 %v7563_v24  ;;  %4724 = vmatmul.bf16.vlgmr.msrb.gmra.mxu3 %v10384_v32  ;;  %v6702_v24 = vld [vmem:[%s12325_s3 + $0x390] sm:$0xf]  ;;  %v7395_v27 = vor.u32 %v8165_v19, %v7394_v30  ;;  %v8075_v19 = vld [vmem:[%s12325_s3 + $0x648] sm:$0xf0] }
 0x1e0   :  { %4772 = vmatpush.bf16.msra.mxu3 %v7567_v25  ;;  %4732 = vmatpush.bf16.msra.mxu0 %v6839_v31  ;;  %v7991_v25 = vld [vmem:[%s12325_s3 + $0x3a8] sm:$0xf0]  ;;  %v7925_v31 = vld [vmem:[%s12325_s3 + $0x19c] sm:$0xf] }
 0x1e1   :  { %v6703_v57 = vor.u32 %v7991_v25, %v6702_v24  ;;  %v6338_v24 = vld [vmem:[%s12325_s3 + $0xb8] sm:$0xf]  ;;  %v7900_v25 = vld [vmem:[%s12325_s3 + $0xd0] sm:$0xf0] }
 0x1e2   :  { %4765 = vmatpush.bf16.msra.mxu2 %v7147_v50  ;;  %v8183_v50 = vld [vmem:[%s12325_s3 + $0x9ac] sm:$0xf]  ;;  %v6339_v30 = vor.u32 %v7900_v25, %v6338_v24 }
 0x1e3   :  { %4689 = vmatpush.bf16.msrb.mxu1 %v7535_v41  ;;  %v7483_v47 = vor.u32 %v8183_v50, %v7480_v51  ;;  %v8162_v41 = vld [vmem:[%s12325_s3 + $0x904] sm:$0xf]  ;;  %v7122_v50 = vld [vmem:[%s12325_s3 + $0x6d8] sm:$0xf]  ;;  %v8096_v51 = vld [vmem:[%s12325_s3 + $0x6f0] sm:$0xf0] }
 0x1e4   :  { %4773 = vmatpush.bf16.msra.mxu3 %v7539_v10  ;;  %4733 = vmatpush.bf16.msra.mxu0 %v6811_v36  ;;  %v7396_v10 = vld [vmem:[%s12325_s3 + $0x91c] sm:$0xf0]  ;;  %v7123_v61 = vor.u32 %v8096_v51, %v7122_v50  ;;  %v8057_v50 = vld [vmem:[%s12325_s3 + $0x5bc] sm:$0xf]  ;;  %v6976_v51 = vld [vmem:[%s12325_s3 + $0x5d4] sm:$0xf0] }
 0x1e5   :  { %4766 = vmatmul.bf16.vlgmr.msra.gmra.mxu2 %v10854_v2  ;;  %v6422_v36 = vld [vmem:[%s12325_s3 + $0x160] sm:$0xf]  ;;  %v7399_v37 = vor.u32 %v8162_v41, %v7396_v10  ;;  %v7893_v10 = vld [vmem:[%s12325_s3 + $0x98] sm:$0xf0]  ;;  %v6979_v59 = vor.u32 %v8057_v50, %v6976_v51 }
 0x1e6   :  { %4814 = vmatpush.bf16.msrb.mxu2 %v6899_v4  ;;  %v8005_v4 = vld [vmem:[%s12325_s3 + $0x418] sm:$0xf0]  ;;  %v6310_v41 = vld [vmem:[%s12325_s3 + $0x80] sm:$0xf] }
 0x1e7   :  { %4690 = vmatpush.bf16.msrb.mxu1 %v7507_v42  ;;  %v6759_v21 = vor.u32 %v8005_v4, %v6758_v43  ;;  %v8155_v42 = vld [vmem:[%s12325_s3 + $0x8cc] sm:$0xf]  ;;  %v6396_v4 = vld [vmem:[%s12325_s3 + $0x144] sm:$0xf0] }
 0x1e8   :  { %4774 = vmatpush.bf16.msra.mxu3 %v7511_v44  ;;  %4734 = vmatpush.bf16.msra.mxu0 %v6783_v48  ;;  %v7368_v44 = vld [vmem:[%s12325_s3 + $0x8e4] sm:$0xf0]  ;;  %v7911_v43 = vld [vmem:[%s12325_s3 + $0x12c] sm:$0xf] }
 0x1ea   :  { %4815 = vmatpush.bf16.msrb.mxu2 %v6871_v15  ;;  %v7455_v15 = vor.u32 %v8176_v5, %v7452_v7  ;;  %v6395_v5 = vor.u32 %v7914_v56, %v6394_v54  ;;  %v6399_v7 = vor.u32 %v7911_v43, %v6396_v4  ;;  %v6982_v54 = vld [vmem:[%s12325_s3 + $0x5c0] sm:$0xf]  ;;  %v6287_v43 = vor.u32 %v7883_v49, %v6284_v62  ;;  %v8061_v4 = vld [vmem:[%s12325_s3 + $0x5d8] sm:$0xf0]  ;;  %v7262_v49 = vld [vmem:[%s12325_s3 + $0x7f0] sm:$0xf] }
 0x1eb   :  { %4691 = vmatpush.bf16.msrb.mxu1 %v7479_v3  ;;  %v7367_v3 = vor.u32 %v8158_v38, %v7366_v6  ;;  %v7010_v6 = vld [vmem:[%s12325_s3 + $0x5f8] sm:$0xf]  ;;  %v8068_v38 = vld [vmem:[%s12325_s3 + $0x610] sm:$0xf0]  ;;  %v6983_v9 = vor.u32 %v8061_v4, %v6982_v54  ;;  %v8131_v62 = vld [vmem:[%s12325_s3 + $0x808] sm:$0xf0] }
 0x1ec   :  { %4775 = vmatpush.bf16.msra.mxu3 %v7483_v47  ;;  %4735 = vmatpush.bf16.msra.mxu0 %v6755_v1  ;;  %v7371_v47 = vor.u32 %v8155_v42, %v7368_v44  ;;  %v8085_v1 = vld [vmem:[%s12325_s3 + $0x69c] sm:$0xf]  ;;  %v6282_v42 = vld [vmem:[%s12325_s3 + $0x48] sm:$0xf]  ;;  %v7886_v44 = vld [vmem:[%s12325_s3 + $0x60] sm:$0xf0] }
 0x1ed   :  { %v6283_v56 = vor.u32 %v7886_v44, %v6282_v42  ;;  %v7974_v42 = vld [vmem:[%s12325_s3 + $0x324] sm:$0xf]  ;;  %v6648_v44 = vld [vmem:[%s12325_s3 + $0x33c] sm:$0xf0]  ;;  %v6618_v54 = vld [vmem:[%s12325_s3 + $0x2e8] sm:$0xf] }
 0x1ee   :  { %4816 = vmatpush.bf16.msrb.mxu2 %v6843_v22  ;;  %v6452_v22 = vld [vmem:[%s12325_s3 + $0x1b4] sm:$0xf0]  ;;  %v6651_v51 = vor.u32 %v7974_v42, %v6648_v44  ;;  %v6906_v42 = vld [vmem:[%s12325_s3 + $0x520] sm:$0xf]  ;;  %v8041_v44 = vld [vmem:[%s12325_s3 + $0x538] sm:$0xf0] }
 0x1ef   :  { %4692 = vmatpush.bf16.msrb.mxu1 %v7451_v18  ;;  %v6455_v39 = vor.u32 %v7925_v31, %v6452_v22  ;;  %v7904_v18 = vld [vmem:[%s12325_s3 + $0xf4] sm:$0xf]  ;;  %v7067_v22 = vor.u32 %v8082_v20, %v7066_v17  ;;  %v8142_v17 = vld [vmem:[%s12325_s3 + $0x864] sm:$0xf]  ;;  %v7320_v20 = vld [vmem:[%s12325_s3 + $0x87c] sm:$0xf0] }
 0x1f0   :  { %4776 = vmatpush.bf16.msra.mxu3 %v7455_v15  ;;  %4736 = vmatpush.bf16.msra.mxu0 %v6727_v8  ;;  %v6368_v15 = vld [vmem:[%s12325_s3 + $0x10c] sm:$0xf0]  ;;  %v7060_v8 = vld [vmem:[%s12325_s3 + $0x67c] sm:$0xf0] }
 0x1f1   :  { %v6371_v52 = vor.u32 %v7904_v18, %v6368_v15  ;;  %v7063_v31 = vor.u32 %v8078_v46, %v7060_v8  ;;  %v6948_v15 = vld [vmem:[%s12325_s3 + $0x59c] sm:$0xf0] }
 0x1f2   :  { %4817 = vmatpush.bf16.msrb.mxu2 %v6815_v29  ;;  %v7921_v29 = vld [vmem:[%s12325_s3 + $0x178] sm:$0xf0] }
 0x1f3   :  { %4693 = vmatpush.bf16.msrb.mxu1 %v7423_v23  ;;  %v6423_v48 = vor.u32 %v7921_v29, %v6422_v36  ;;  %v8071_v23 = vld [vmem:[%s12325_s3 + $0x62c] sm:$0xf] }
 0x1f4   :  { %4777 = vmatpush.bf16.msra.mxu3 %v7427_v28  ;;  %4737 = vmatpush.bf16.msra.mxu0 %v6699_v33  ;;  %v7032_v28 = vld [vmem:[%s12325_s3 + $0x644] sm:$0xf0]  ;;  %v6343_v33 = vor.u32 %v7897_v26, %v6340_v11  ;;  %v8043_v26 = vld [vmem:[%s12325_s3 + $0x54c] sm:$0xf] }
 0x1f5   :  { %v7035_v36 = vor.u32 %v8071_v23, %v7032_v28  ;;  %v6920_v11 = vld [vmem:[%s12325_s3 + $0x564] sm:$0xf0]  ;;  %v6674_v23 = vld [vmem:[%s12325_s3 + $0x358] sm:$0xf]  ;;  %v7984_v28 = vld [vmem:[%s12325_s3 + $0x370] sm:$0xf0] }
 0x1f6   :  { %4818 = vmatpush.bf16.msrb.mxu2 %v6787_v34  ;;  %v6427_v34 = vor.u32 %v7918_v60, %v6424_v63  ;;  %v8064_v60 = vld [vmem:[%s12325_s3 + $0x5f4] sm:$0xf]  ;;  %v7004_v63 = vld [vmem:[%s12325_s3 + $0x60c] sm:$0xf0] }
 0x1f7   :  { %4694 = vmatpush.bf16.msrb.mxu1 %v7395_v27  ;;  %4738 = vmatmul.bf16.vlgmr.msra.gmra.mxu0 %v10373_v45  ;;  %v6311_v27 = vor.u32 %v7893_v10, %v6310_v41  ;;  %v7290_v41 = vld [vmem:[%s12325_s3 + $0x828] sm:$0xf]  ;;  %v8138_v10 = vld [vmem:[%s12325_s3 + $0x840] sm:$0xf0] }
 0x1f8   :  { %4786 = vmatpush.bf16.msrb.mxu0 %v6451_v35  ;;  %4778 = vmatpush.bf16.msra.mxu3 %v7399_v37  ;;  %v7890_v35 = vld [vmem:[%s12325_s3 + $0x84] sm:$0xf] }
 0x1fa   :  { %4819 = vmatpush.bf16.msrb.mxu2 %v6759_v21  ;;  %v7088_v21 = vld [vmem:[%s12325_s3 + $0x6b4] sm:$0xf0] }
 0x1fb   :  { %4695 = vmatpush.bf16.msrb.mxu1 %v7367_v3  ;;  %v7091_v0 = vor.u32 %v8085_v1, %v7088_v21  ;;  %v6254_v3 = vld [vmem:[%s12325_s3 + $0x10] sm:$0xf]  ;;  %v7346_v1 = vld [vmem:[%s12325_s3 + $0x898] sm:$0xf]  ;;  %v8152_v21 = vld [vmem:[%s12325_s3 + $0x8b0] sm:$0xf0] }
 0x1fc   :  { %4787 = vmatpush.bf16.msrb.mxu0 %v6423_v48  ;;  %4779 = vmatpush.bf16.msra.mxu3 %v7371_v47  ;;  %v7007_v48 = vor.u32 %v8064_v60, %v7004_v63  ;;  %v7879_v47 = vld [vmem:[%s12325_s3 + $0x28] sm:$0xf0]  ;;  %v7347_v46 = vor.u32 %v8152_v21, %v7346_v1  ;;  %v6675_v60 = vor.u32 %v7984_v28, %v6674_v23  ;;  %v8121_v1 = vld [vmem:[%s12325_s3 + $0x7bc] sm:$0xf]  ;;  %v7236_v21 = vld [vmem:[%s12325_s3 + $0x7d4] sm:$0xf0] }
 0x1fd   :  { %v8110_v23 = vld [vmem:[%s12325_s3 + $0x760] sm:$0xf0]  ;;  %v8107_v28 = vld [vmem:[%s12325_s3 + $0x74c] sm:$0xf] }
 0x1fe   :  { %4820 = vmatpush.bf16.msrb.mxu2 %v6731_v55  ;;  %v6367_v55 = vor.u32 %v7907_v14, %v6366_v13  ;;  %4696 = vmatmul.bf16.vlgmr.msrb.gmra.mxu1 %v11012_v40  ;;  %v8050_v13 = vld [vmem:[%s12325_s3 + $0x584] sm:$0xf]  ;;  %v6255_v14 = vor.u32 %v7879_v47, %v6254_v3  ;;  %v7967_v3 = vld [vmem:[%s12325_s3 + $0x2ec] sm:$0xf]  ;;  %v6620_v47 = vld [vmem:[%s12325_s3 + $0x304] sm:$0xf0] }
 0x1ff   :  { %4744 = vmatpush.bf16.msra.mxu1 %v7119_v58  ;;  %4780 = vmatmul.bf16.vlgmr.msra.gmra.mxu3 %v11012_v40  ;;  %v7876_v58 = vld [vmem:[%s12325_s3 + $0x14] sm:$0xf]  ;;  %v6951_v24 = vor.u32 %v8050_v13, %v6948_v15  ;;  %v6592_v15 = vld [vmem:[%s12325_s3 + $0x2cc] sm:$0xf0] }
 0x200   :  { %4828 = vmatpush.bf16.msrb.mxu3 %v7123_v61  ;;  %4788 = vmatpush.bf16.msrb.mxu0 %v6395_v5  ;;  %v6256_v61 = vld [vmem:[%s12325_s3 + $0x2c] sm:$0xf0]  ;;  %v8149_v5 = vld [vmem:[%s12325_s3 + $0x89c] sm:$0xf] }
 0x201   :  { %v6259_v18 = vor.u32 %v7876_v58, %v6256_v61  ;;  %v7234_v58 = vld [vmem:[%s12325_s3 + $0x7b8] sm:$0xf]  ;;  %v8124_v61 = vld [vmem:[%s12325_s3 + $0x7d0] sm:$0xf0] }
 0x202   :  { %4821 = vmatpush.bf16.msrb.mxu2 %v6703_v57  ;;  %v7038_v57 = vld [vmem:[%s12325_s3 + $0x630] sm:$0xf]  ;;  %v7235_v13 = vor.u32 %v8124_v61, %v7234_v58  ;;  %v6907_v58 = vor.u32 %v8041_v44, %v6906_v42  ;;  %v8030_v61 = vld [vmem:[%s12325_s3 + $0x4e4] sm:$0xf]  ;;  %v7514_v44 = vld [vmem:[%s12325_s3 + $0x9e8] sm:$0xf] }
 0x203   :  { %4745 = vmatpush.bf16.msra.mxu1 %v7091_v0  ;;  %v7039_v29 = vor.u32 %v8075_v19, %v7038_v57  ;;  %v6954_v0 = vld [vmem:[%s12325_s3 + $0x588] sm:$0xf]  ;;  %v7981_v57 = vld [vmem:[%s12325_s3 + $0x35c] sm:$0xf]  ;;  %v6676_v19 = vld [vmem:[%s12325_s3 + $0x374] sm:$0xf0] }
 0x204   :  { %4829 = vmatpush.bf16.msrb.mxu3 %v7095_v53  ;;  %4789 = vmatpush.bf16.msrb.mxu0 %v6367_v55  ;;  %v8054_v53 = vld [vmem:[%s12325_s3 + $0x5a0] sm:$0xf0]  ;;  %v7318_v55 = vld [vmem:[%s12325_s3 + $0x860] sm:$0xf]  ;;  %v6679_v63 = vor.u32 %v7981_v57, %v6676_v19 }
 0x205   :  { %4822 = vmatmul.bf16.vlgmr.msrb.gmra.mxu2 %v10373_v45  ;;  %v6955_v25 = vor.u32 %v8054_v53, %v6954_v0  ;;  %v7206_v0 = vld [vmem:[%s12325_s3 + $0x780] sm:$0xf]  ;;  %v8117_v53 = vld [vmem:[%s12325_s3 + $0x798] sm:$0xf0] }
 0x206   :  { %4870 = vmatpush.bf16.msra.mxu2 %v6455_v39  ;;  %v6312_v39 = vld [vmem:[%s12325_s3 + $0x9c] sm:$0xf0] }
 0x207   :  { %4746 = vmatpush.bf16.msra.mxu1 %v7063_v31  ;;  %v6315_v37 = vor.u32 %v7890_v35, %v6312_v39  ;;  %v6926_v31 = vld [vmem:[%s12325_s3 + $0x550] sm:$0xf]  ;;  %v8135_v35 = vld [vmem:[%s12325_s3 + $0x82c] sm:$0xf]  ;;  %v7292_v39 = vld [vmem:[%s12325_s3 + $0x844] sm:$0xf0] }
 0x208   :  { %4830 = vmatpush.bf16.msrb.mxu3 %v7067_v22  ;;  %4790 = vmatpush.bf16.msrb.mxu0 %v6339_v30  ;;  %v8047_v22 = vld [vmem:[%s12325_s3 + $0x568] sm:$0xf0]  ;;  %v6534_v19 = vld [vmem:[%s12325_s3 + $0x240] sm:$0xf] }
 0x20a   :  { %4871 = vmatpush.bf16.msra.mxu2 %v6427_v34  ;;  %v7011_v34 = vor.u32 %v8068_v38, %v7010_v6  ;;  %v7291_v6 = vor.u32 %v8138_v10, %v7290_v41  ;;  %v7295_v38 = vor.u32 %v8135_v35, %v7292_v39  ;;  %v7949_v41 = vld [vmem:[%s12325_s3 + $0x258] sm:$0xf0]  ;;  %v7946_v10 = vld [vmem:[%s12325_s3 + $0x244] sm:$0xf] }
 0x20b   :  { %4747 = vmatpush.bf16.msra.mxu1 %v7035_v36  ;;  %v6923_v36 = vor.u32 %v8043_v26, %v6920_v11  ;;  %v7953_v11 = vld [vmem:[%s12325_s3 + $0x27c] sm:$0xf]  ;;  %v11710_v35 = vld [vmem:[%s12326_s4] sm:$0xff] }
 0x20c   :  { %4831 = vmatpush.bf16.msrb.mxu3 %v7039_v29  ;;  %4791 = vmatpush.bf16.msrb.mxu0 %v6311_v27  ;;  %v6927_v29 = vor.u32 %v8047_v22, %v6926_v31  ;;  %v6646_v27 = vld [vmem:[%s12325_s3 + $0x320] sm:$0xf]  ;;  %v6564_v31 = vld [vmem:[%s12325_s3 + $0x294] sm:$0xf0]  ;;  %v7178_v22 = vld [vmem:[%s12325_s3 + $0x748] sm:$0xf] }
 0x20d   :  { %v6567_v57 = vor.u32 %v7953_v11, %v6564_v31  ;;  %v7179_v39 = vor.u32 %v8110_v23, %v7178_v22  ;;  %v8027_v11 = vld [vmem:[%s12325_s3 + $0x4c8] sm:$0xf0] }
 0x20e   :  { %4872 = vmatpush.bf16.msra.mxu2 %v6399_v7  ;;  %v7348_v7 = vld [vmem:[%s12325_s3 + $0x8b4] sm:$0xf0] }
 0x20f   :  { %4748 = vmatpush.bf16.msra.mxu1 %v7007_v48  ;;  %v7351_v8 = vor.u32 %v8149_v5, %v7348_v7  ;;  %v8128_v48 = vld [vmem:[%s12325_s3 + $0x7f4] sm:$0xf]  ;;  %v6623_v7 = vor.u32 %v7967_v3, %v6620_v47  ;;  %v2708_v3 = vperm.slane %v11710_v35, 0 }
 0x210   :  { %4832 = vmatpush.bf16.msrb.mxu3 %v7011_v34  ;;  %4792 = vmatpush.bf16.msrb.mxu0 %v6283_v56  ;;  %v7264_v34 = vld [vmem:[%s12325_s3 + $0x80c] sm:$0xf0]  ;;  %v7970_v56 = vld [vmem:[%s12325_s3 + $0x300] sm:$0xf0] }
 0x211   :  { %v7267_v4 = vor.u32 %v8128_v48, %v7264_v34  ;;  %v6619_v5 = vor.u32 %v7970_v56, %v6618_v54  ;;  %v6506_v34 = vld [vmem:[%s12325_s3 + $0x208] sm:$0xf]  ;;  %v7942_v56 = vld [vmem:[%s12325_s3 + $0x220] sm:$0xf0] }
 0x212   :  { %4873 = vmatpush.bf16.msra.mxu2 %v6371_v52  ;;  %v8145_v52 = vld [vmem:[%s12325_s3 + $0x878] sm:$0xf0] }
 0x213   :  { %4749 = vmatpush.bf16.msra.mxu1 %v6979_v59  ;;  %v7319_v30 = vor.u32 %v8145_v52, %v7318_v55  ;;  %v6590_v59 = vld [vmem:[%s12325_s3 + $0x2b0] sm:$0xf] }
 0x214   :  { %4833 = vmatpush.bf16.msrb.mxu3 %v6983_v9  ;;  %4793 = vmatpush.bf16.msrb.mxu0 %v6255_v14  ;;  %v7963_v9 = vld [vmem:[%s12325_s3 + $0x2c8] sm:$0xf0]  ;;  %v7239_v14 = vor.u32 %v8121_v1, %v7236_v21  ;;  %v4473_v1 = vpop.f32.mrf.mxu1 }
 0x215   :  { %v6591_v55 = vor.u32 %v7963_v9, %v6590_v59  ;;  %v8034_v59 = vld [vmem:[%s12325_s3 + $0x500] sm:$0xf0]  ;;  %v6507_v9 = vor.u32 %v7942_v56, %v6506_v34  ;;  %v7516_v56 = vld [vmem:[%s12325_s3 + $0xa04] sm:$0xf0] }
 0x216   :  { %4874 = vmatpush.bf16.msra.mxu2 %v6343_v33  ;;  %v7323_v33 = vor.u32 %v8142_v17, %v7320_v20  ;;  %v6562_v17 = vld [vmem:[%s12325_s3 + $0x278] sm:$0xf]  ;;  %v7956_v20 = vld [vmem:[%s12325_s3 + $0x290] sm:$0xf0] }
 0x217   :  { %4750 = vmatpush.bf16.msra.mxu1 %v6951_v24  ;;  %4794 = vmatmul.bf16.vlgmr.msrb.gmra.mxu0 %v10382_v16  ;;  %v11678_v24 = vpop.f32.mrf.mxu0 }
 0x218   :  { %4842 = vmatpush.bf16.msra.mxu0 %v7347_v46  ;;  %4834 = vmatpush.bf16.msrb.mxu3 %v6955_v25  ;;  %v8114_v46 = vld [vmem:[%s12325_s3 + $0x784] sm:$0xf]  ;;  %v7207_v25 = vor.u32 %v8117_v53, %v7206_v0  ;;  %v6480_v0 = vld [vmem:[%s12325_s3 + $0x1ec] sm:$0xf0]  ;;  %v7570_v53 = vld [vmem:[%s12325_s3 + $0xa58] sm:$0xf] }
 0x21a   :  { %4875 = vmatpush.bf16.msra.mxu2 %v6315_v37  ;;  %v7977_v37 = vld [vmem:[%s12325_s3 + $0x338] sm:$0xf0] }
 0x21b   :  { %4751 = vmatpush.bf16.msra.mxu1 %v6923_v36  ;;  %v6647_v50 = vor.u32 %v7977_v37, %v6646_v27  ;;  %v8100_v27 = vld [vmem:[%s12325_s3 + $0x714] sm:$0xf]  ;;  %v7152_v37 = vld [vmem:[%s12325_s3 + $0x72c] sm:$0xf0] }
 0x21c   :  { %4843 = vmatpush.bf16.msra.mxu0 %v7319_v30  ;;  %4835 = vmatpush.bf16.msrb.mxu3 %v6927_v29  ;;  %v7180_v30 = vld [vmem:[%s12325_s3 + $0x764] sm:$0xf0]  ;;  %v6536_v29 = vld [vmem:[%s12325_s3 + $0x25c] sm:$0xf0]  ;;  %v7155_v54 = vor.u32 %v8100_v27, %v7152_v37  ;;  %v6822_v27 = vld [vmem:[%s12325_s3 + $0x478] sm:$0xf] }
 0x21d   :  { %v7183_v36 = vor.u32 %v8107_v28, %v7180_v30  ;;  %v6539_v48 = vor.u32 %v7946_v10, %v6536_v29  ;;  %v7542_v30 = vld [vmem:[%s12325_s3 + $0xa20] sm:$0xf]  ;;  %v8016_v29 = vld [vmem:[%s12325_s3 + $0x474] sm:$0xf] }
 0x21e   :  { %4876 = vmatpush.bf16.msra.mxu2 %v6287_v43  ;;  %v7263_v43 = vor.u32 %v8131_v62, %v7262_v49  ;;  %4752 = vmatmul.bf16.vlgmr.msra.gmra.mxu1 %v10552_v12  ;;  %v11739_v49 = vpop.f32.mrf.mxu3  ;;  %v6535_v62 = vor.u32 %v7949_v41, %v6534_v19  ;;  %v8020_v37 = vld [vmem:[%s12325_s3 + $0x490] sm:$0xf0] }
 0x21f   :  { %4800 = vmatpush.bf16.msrb.mxu1 %v6675_v60  ;;  %4836 = vmatmul.bf16.vlgmr.msrb.gmra.mxu3 %v10552_v12  ;;  %v7150_v60 = vld [vmem:[%s12325_s3 + $0x710] sm:$0xf]  ;;  %v11759_v21 = vpop.f32.mrf.mxu0 }
 0x220   :  { %4884 = vmatpush.bf16.msra.mxu3 %v6679_v63  ;;  %4844 = vmatpush.bf16.msra.mxu0 %v7291_v6  ;;  %v8103_v63 = vld [vmem:[%s12325_s3 + $0x728] sm:$0xf0]  ;;  %v8037_v6 = vld [vmem:[%s12325_s3 + $0x51c] sm:$0xf] }
 0x222   :  { %4877 = vmatpush.bf16.msra.mxu2 %v6259_v18  ;;  %v7960_v18 = vld [vmem:[%s12325_s3 + $0x2b4] sm:$0xf] }
 0x223   :  { %4801 = vmatpush.bf16.msrb.mxu1 %v6647_v50  ;;  %v6595_v52 = vor.u32 %v7960_v18, %v6592_v15  ;;  %v11744_v50 = vpop.f32.mrf.mxu2  ;;  %v7935_v18 = vld [vmem:[%s12325_s3 + $0x1e8] sm:$0xf0]  ;;  %v7932_v15 = vld [vmem:[%s12325_s3 + $0x1d4] sm:$0xf] }
 0x224   :  { %4885 = vmatpush.bf16.msra.mxu3 %v6651_v51  ;;  %4845 = vmatpush.bf16.msra.mxu0 %v7263_v43  ;;  %v7151_v51 = vor.u32 %v8103_v63, %v7150_v60  ;;  %v7939_v43 = vld [vmem:[%s12325_s3 + $0x20c] sm:$0xf]  ;;  %v6483_v22 = vor.u32 %v7932_v15, %v6480_v0  ;;  %v6816_v63 = vld [vmem:[%s12325_s3 + $0x48c] sm:$0xf0]  ;;  %v6766_v0 = vld [vmem:[%s12325_s3 + $0x408] sm:$0xf] }
 0x225   :  { %4878 = vmatmul.bf16.vlgmr.msra.gmra.mxu2 %v10382_v16  ;;  %v6819_v34 = vor.u32 %v8016_v29, %v6816_v63  ;;  %v8173_v63 = vld [vmem:[%s12325_s3 + $0x958] sm:$0xf0] }
 0x226   :  { %4926 = vmatpush.bf16.msrb.mxu2 %v7351_v8  ;;  %v7208_v8 = vld [vmem:[%s12325_s3 + $0x79c] sm:$0xf0]  ;;  %v11817_v19 = vpop.f32.mrf.mxu3 }
 0x227   :  { %4802 = vmatpush.bf16.msrb.mxu1 %v6619_v5  ;;  %v7211_v26 = vor.u32 %v8114_v46, %v7208_v8  ;;  %v6872_v5 = vld [vmem:[%s12325_s3 + $0x4fc] sm:$0xf0]  ;;  %v8208_v46 = vld [vmem:[%s12325_s3 + $0xa70] sm:$0xf0] }
 0x228   :  { %4886 = vmatpush.bf16.msra.mxu3 %v6623_v7  ;;  %4846 = vmatpush.bf16.msra.mxu0 %v7235_v13  ;;  %v6878_v7 = vld [vmem:[%s12325_s3 + $0x4e8] sm:$0xf]  ;;  %v6875_v8 = vor.u32 %v8030_v61, %v6872_v5  ;;  %v7571_v23 = vor.u32 %v8208_v46, %v7570_v53  ;;  %v8006_v53 = vld [vmem:[%s12325_s3 + $0x420] sm:$0xf0] }
 0x22a   :  { %4927 = vmatpush.bf16.msrb.mxu2 %v7323_v33  ;;  %v6563_v33 = vor.u32 %v7956_v20, %v6562_v17  ;;  %v7572_v17 = vld [vmem:[%s12325_s3 + $0xa74] sm:$0xf0]  ;;  %v8023_v20 = vld [vmem:[%s12325_s3 + $0x4ac] sm:$0xf] }
 0x22b   :  { %4803 = vmatpush.bf16.msrb.mxu1 %v6591_v55  ;;  %v6879_v55 = vor.u32 %v8034_v59, %v6878_v7  ;;  %v11828_v60 = vpop.f32.mrf.mxu2  ;;  %v7486_v59 = vld [vmem:[%s12325_s3 + $0x9b0] sm:$0xf] }
 0x22c   :  { %4887 = vmatpush.bf16.msra.mxu3 %v6595_v52  ;;  %4847 = vmatpush.bf16.msra.mxu0 %v7207_v25  ;;  %v8205_v52 = vld [vmem:[%s12325_s3 + $0xa5c] sm:$0xf]  ;;  %v6844_v25 = vld [vmem:[%s12325_s3 + $0x4c4] sm:$0xf0] }
 0x22d   :  { %v7575_v28 = vor.u32 %v8205_v52, %v7572_v17  ;;  %v6847_v41 = vor.u32 %v8023_v20, %v6844_v25 }
 0x22e   :  { %4928 = vmatpush.bf16.msrb.mxu2 %v7295_v38  ;;  %v6900_v38 = vld [vmem:[%s12325_s3 + $0x534] sm:$0xf0]  ;;  %v11896_v46 = vpop.f32.mrf.mxu3 }
 0x22f   :  { %4804 = vmatpush.bf16.msrb.mxu1 %v6563_v33  ;;  %v6903_v47 = vor.u32 %v8037_v6, %v6900_v38  ;;  %v8201_v33 = vld [vmem:[%s12325_s3 + $0xa38] sm:$0xf0]  ;;  %v4475_v6 = vpop.f32.mrf.mxu1 }
 0x230   :  { %4888 = vmatpush.bf16.msra.mxu3 %v6567_v57  ;;  %4848 = vmatpush.bf16.msra.mxu0 %v7179_v39  ;;  %v4460_v57 = vadd.f32 %v11678_v24, %v2708_v3  ;;  %v8198_v39 = vld [vmem:[%s12325_s3 + $0xa24] sm:$0xf]  ;;  %v4515_v24 = vpop.f32.mrf.mxu0  ;;  %v7543_v38 = vor.u32 %v8201_v33, %v7542_v30  ;;  %v7460_v30 = vld [vmem:[%s12325_s3 + $0x994] sm:$0xf0]  ;;  %v7995_v33 = vld [vmem:[%s12325_s3 + $0x3cc] sm:$0xf] }
 0x232   :  { %4929 = vmatpush.bf16.msrb.mxu2 %v7267_v4  ;;  %v6508_v4 = vld [vmem:[%s12325_s3 + $0x224] sm:$0xf0] }
 0x233   :  { %4805 = vmatpush.bf16.msrb.mxu1 %v6535_v62  ;;  %v6511_v13 = vor.u32 %v7939_v43, %v6508_v4  ;;  %v8194_v62 = vld [vmem:[%s12325_s3 + $0xa00] sm:$0xf0]  ;;  %v8009_v43 = vld [vmem:[%s12325_s3 + $0x43c] sm:$0xf]  ;;  %v6788_v4 = vld [vmem:[%s12325_s3 + $0x454] sm:$0xf0]  ;;  %v11885_v15 = vpop.f32.mrf.mxu2 }
 0x234   :  { %4889 = vmatpush.bf16.msra.mxu3 %v6539_v48  ;;  %4849 = vmatpush.bf16.msra.mxu0 %v7151_v51  ;;  %v4474_v48 = vadd.f32 %v4473_v1, %v4460_v57  ;;  %v6823_v51 = vor.u32 %v8020_v37, %v6822_v27  ;;  %v4462_v1 = vadd.f32 %v11759_v21, %v2708_v3  ;;  %v8184_v3 = vld [vmem:[%s12325_s3 + $0x9b4] sm:$0xf]  ;;  %v7488_v21 = vld [vmem:[%s12325_s3 + $0x9cc] sm:$0xf0]  ;;  %v6732_v57 = vld [vmem:[%s12325_s3 + $0x3e4] sm:$0xf0] }
 0x235   :  { %v7515_v5 = vor.u32 %v8194_v62, %v7514_v44  ;;  %v7491_v25 = vor.u32 %v8184_v3, %v7488_v21  ;;  %v6710_v44 = vld [vmem:[%s12325_s3 + $0x398] sm:$0xf]  ;;  %v7992_v62 = vld [vmem:[%s12325_s3 + $0x3b0] sm:$0xf0]  ;;  %v6430_v21 = vld [vmem:[%s12325_s3 + $0x168] sm:$0xf] }
 0x236   :  { %4930 = vmatpush.bf16.msrb.mxu2 %v7239_v14  ;;  %v6478_v14 = vld [vmem:[%s12325_s3 + $0x1d0] sm:$0xf]  ;;  %v4488_v61 = vadd.f32 %v11744_v50, %v4474_v48  ;;  %v6791_v50 = vor.u32 %v8009_v43, %v6788_v4  ;;  %v2709_v48 = vperm.slane %v11710_v35, 1 }
 0x237   :  { %4806 = vmatpush.bf16.msrb.mxu1 %v6507_v9  ;;  %v6479_v31 = vor.u32 %v7935_v18, %v6478_v14  ;;  %4850 = vmatmul.bf16.vlgmr.msra.gmra.mxu0 %v10854_v2  ;;  %v8187_v9 = vld [vmem:[%s12325_s3 + $0x9c8] sm:$0xf0]  ;;  %v8002_v18 = vld [vmem:[%s12325_s3 + $0x404] sm:$0xf] }
 0x238   :  { %4898 = vmatpush.bf16.msrb.mxu0 %v6903_v47  ;;  %4890 = vmatpush.bf16.msra.mxu3 %v6511_v13  ;;  %v6794_v47 = vld [vmem:[%s12325_s3 + $0x440] sm:$0xf]  ;;  %v4502_v13 = vadd.f32 %v11739_v49, %v4488_v61  ;;  %v4517_v52 = vpop.f32.mrf.mxu0  ;;  %v7487_v20 = vor.u32 %v8187_v9, %v7486_v59  ;;  %v8163_v59 = vld [vmem:[%s12325_s3 + $0x90c] sm:$0xf]  ;;  %v7404_v9 = vld [vmem:[%s12325_s3 + $0x924] sm:$0xf0]  ;;  %v4544_v3 = vadd.f32 %v11885_v15, %v2709_v48 }
 0x239   :  { %v6760_v49 = vld [vmem:[%s12325_s3 + $0x41c] sm:$0xf0]  ;;  %v7374_v15 = vld [vmem:[%s12325_s3 + $0x8d0] sm:$0xf] }
 0x23a   :  { %4931 = vmatpush.bf16.msrb.mxu2 %v7211_v26  ;;  %v6850_v26 = vld [vmem:[%s12325_s3 + $0x4b0] sm:$0xf] }
 0x23b   :  { %v6851_v10 = vor.u32 %v8027_v11, %v6850_v26  ;;  %4807 = vmatpush.bf16.msrb.mxu1 %v6479_v31  ;;  %v4529_v17 = vpop.f32.mrf.mxu1  ;;  %v7458_v26 = vld [vmem:[%s12325_s3 + $0x978] sm:$0xf]  ;;  %v8180_v11 = vld [vmem:[%s12325_s3 + $0x990] sm:$0xf0] }
 0x23c   :  { %4899 = vmatpush.bf16.msrb.mxu0 %v6875_v8  ;;  %4891 = vmatpush.bf16.msra.mxu3 %v6483_v22  ;;  %v4516_v8 = vadd.f32 %v4515_v24, %v4502_v13  ;;  %v6763_v22 = vor.u32 %v8002_v18, %v6760_v49  ;;  %v7430_v24 = vld [vmem:[%s12325_s3 + $0x940] sm:$0xf]  ;;  %v4559_v13 = vpop.f32.mrf.mxu3  ;;  %v7922_v18 = vld [vmem:[%s12325_s3 + $0x180] sm:$0xf0] }
 0x23d   :  { %v7431_v4 = vor.u32 %v8173_v63, %v7430_v24  ;;  %v7096_v63 = vld [vmem:[%s12325_s3 + $0x6bc] sm:$0xf0] }
 0x23e   :  { %4932 = vmatpush.bf16.msrb.mxu2 %v7183_v36  ;;  %v7544_v36 = vld [vmem:[%s12325_s3 + $0xa3c] sm:$0xf0]  ;;  %4808 = vmatmul.bf16.vlgmr.msrb.gmra.mxu1 %v10384_v32  ;;  %v4530_v31 = vadd.f32 %v4529_v17, %v4516_v8  ;;  %v4558_v8 = vadd.f32 %v11896_v46, %v4544_v3  ;;  %v8093_v17 = vld [vmem:[%s12325_s3 + $0x6dc] sm:$0xf]  ;;  %v7124_v46 = vld [vmem:[%s12325_s3 + $0x6f4] sm:$0xf0] }
 0x23f   :  { %4856 = vmatpush.bf16.msra.mxu1 %v7571_v23  ;;  %v7547_v42 = vor.u32 %v8198_v39, %v7544_v36  ;;  %4892 = vmatmul.bf16.vlgmr.msra.gmra.mxu3 %v10384_v32  ;;  %v6767_v23 = vor.u32 %v8006_v53, %v6766_v0  ;;  %v7459_v36 = vor.u32 %v8180_v11, %v7458_v26  ;;  %v8159_v53 = vld [vmem:[%s12325_s3 + $0x8e8] sm:$0xf0]  ;;  %v8097_v26 = vld [vmem:[%s12325_s3 + $0x6f8] sm:$0xf0] }
 0x240   :  { %4940 = vmatpush.bf16.msrb.mxu3 %v7575_v28  ;;  %4900 = vmatpush.bf16.msrb.mxu0 %v6847_v41  ;;  %v8177_v28 = vld [vmem:[%s12325_s3 + $0x97c] sm:$0xf]  ;;  %v6738_v41 = vld [vmem:[%s12325_s3 + $0x3d0] sm:$0xf]  ;;  %5038 = vst [vmem:[%s12327_s5] sm:$0xff] %v4530_v31  ;;  %v7407_v0 = vor.u32 %v8163_v59, %v7404_v9 }
 0x241   :  { %v7463_v29 = vor.u32 %v8177_v28, %v7460_v30  ;;  %v6402_v31 = vld [vmem:[%s12325_s3 + $0x130] sm:$0xf]  ;;  %v7375_v30 = vor.u32 %v8159_v53, %v7374_v15 }
 0x242   :  { %4933 = vmatpush.bf16.msrb.mxu2 %v7155_v54  ;;  %v8191_v54 = vld [vmem:[%s12325_s3 + $0x9ec] sm:$0xf] }
 0x243   :  { %4857 = vmatpush.bf16.msra.mxu1 %v7543_v38  ;;  %v7519_v7 = vor.u32 %v8191_v54, %v7516_v56  ;;  %v7432_v38 = vld [vmem:[%s12325_s3 + $0x95c] sm:$0xf0]  ;;  %v7929_v54 = vld [vmem:[%s12325_s3 + $0x1b8] sm:$0xf0]  ;;  %v4545_v56 = vpop.f32.mrf.mxu2  ;;  %v4531_v43 = vpop.f32.mrf.mxu1 }
 0x244   :  { %4941 = vmatpush.bf16.msrb.mxu3 %v7547_v42  ;;  %4901 = vmatpush.bf16.msrb.mxu0 %v6819_v34  ;;  %v7988_v42 = vld [vmem:[%s12325_s3 + $0x394] sm:$0xf] }
 0x245   :  { %4934 = vmatmul.bf16.vlgmr.msrb.gmra.mxu2 %v10854_v2 }
 0x246   :  { %4982 = vmatpush.bf16.msra.mxu2 %v6907_v58  ;;  %v8013_v58 = vld [vmem:[%s12325_s3 + $0x458] sm:$0xf0] }
 0x247   :  { %v6795_v14 = vor.u32 %v8013_v58, %v6794_v47  ;;  %4858 = vmatpush.bf16.msra.mxu1 %v7515_v5  ;;  %v7402_v58 = vld [vmem:[%s12325_s3 + $0x908] sm:$0xf]  ;;  %v6711_v5 = vor.u32 %v7992_v62, %v6710_v44 }
 0x248   :  { %4942 = vmatpush.bf16.msrb.mxu3 %v7519_v7  ;;  %4902 = vmatpush.bf16.msrb.mxu0 %v6791_v50  ;;  %v8166_v7 = vld [vmem:[%s12325_s3 + $0x920] sm:$0xf0]  ;;  %v4571_v50 = vpop.f32.mrf.mxu0 }
 0x249   :  { %v7403_v49 = vor.u32 %v8166_v7, %v7402_v58  ;;  %v4572_v11 = vadd.f32 %v4571_v50, %v4558_v8  ;;  %v8072_v7 = vld [vmem:[%s12325_s3 + $0x634] sm:$0xf]  ;;  %v7046_v50 = vld [vmem:[%s12325_s3 + $0x638] sm:$0xf]  ;;  %v8065_v8 = vld [vmem:[%s12325_s3 + $0x5fc] sm:$0xf] }
 0x24a   :  { %4983 = vmatpush.bf16.msra.mxu2 %v6879_v55  ;;  %v4476_v55 = vadd.f32 %v4475_v6, %v4462_v1  ;;  %v8170_v6 = vld [vmem:[%s12325_s3 + $0x944] sm:$0xf] }
 0x24b   :  { %4859 = vmatpush.bf16.msra.mxu1 %v7487_v20  ;;  %v7435_v47 = vor.u32 %v8170_v6, %v7432_v38  ;;  %v6431_v20 = vor.u32 %v7922_v18, %v6430_v21  ;;  %v4585_v28 = vpop.f32.mrf.mxu1  ;;  %v7908_v6 = vld [vmem:[%s12325_s3 + $0x110] sm:$0xf0]  ;;  %v6318_v21 = vld [vmem:[%s12325_s3 + $0x88] sm:$0xf]  ;;  %v7894_v18 = vld [vmem:[%s12325_s3 + $0xa0] sm:$0xf0] }
 0x24c   :  { %v4490_v39 = vadd.f32 %v11828_v60, %v4476_v55  ;;  %4943 = vmatpush.bf16.msrb.mxu3 %v7491_v25  ;;  %4903 = vmatpush.bf16.msrb.mxu0 %v6763_v22  ;;  %v6735_v60 = vor.u32 %v7995_v33, %v6732_v57  ;;  %v8156_v55 = vld [vmem:[%s12325_s3 + $0x8d4] sm:$0xf]  ;;  %v7130_v25 = vld [vmem:[%s12325_s3 + $0x6e0] sm:$0xf]  ;;  %v7915_v22 = vld [vmem:[%s12325_s3 + $0x148] sm:$0xf0]  ;;  %v4586_v57 = vadd.f32 %v4585_v28, %v4572_v11 }
 0x24d   :  { %v6403_v24 = vor.u32 %v7915_v22, %v6402_v31  ;;  %v8058_v31 = vld [vmem:[%s12325_s3 + $0x5c4] sm:$0xf]  ;;  %v6990_v28 = vld [vmem:[%s12325_s3 + $0x5c8] sm:$0xf] }
 0x24e   :  { %4984 = vmatpush.bf16.msra.mxu2 %v6851_v10  ;;  %v7999_v10 = vld [vmem:[%s12325_s3 + $0x3e8] sm:$0xf0]  ;;  %v4504_v27 = vadd.f32 %v11817_v19, %v4490_v39  ;;  %v6704_v19 = vld [vmem:[%s12325_s3 + $0x3ac] sm:$0xf0]  ;;  %v8086_v39 = vld [vmem:[%s12325_s3 + $0x6a4] sm:$0xf] }
 0x24f   :  { %v6739_v37 = vor.u32 %v7999_v10, %v6738_v41  ;;  %4860 = vmatpush.bf16.msra.mxu1 %v7459_v36  ;;  %v6707_v1 = vor.u32 %v7988_v42, %v6704_v19  ;;  %v7127_v41 = vor.u32 %v8093_v17, %v7124_v46  ;;  %v7131_v10 = vor.u32 %v8097_v26, %v7130_v25  ;;  %v7018_v17 = vld [vmem:[%s12325_s3 + $0x600] sm:$0xf]  ;;  %v6290_v46 = vld [vmem:[%s12325_s3 + $0x50] sm:$0xf]  ;;  %v7887_v25 = vld [vmem:[%s12325_s3 + $0x68] sm:$0xf0] }
 0x250   :  { %v4518_v34 = vadd.f32 %v4517_v52, %v4504_v27  ;;  %4944 = vmatpush.bf16.msrb.mxu3 %v7463_v29  ;;  %4904 = vmatpush.bf16.msrb.mxu0 %v6735_v60  ;;  %v7376_v52 = vld [vmem:[%s12325_s3 + $0x8ec] sm:$0xf0]  ;;  %v4546_v36 = vadd.f32 %v4545_v56, %v2709_v48  ;;  %v4613_v29 = vpop.f32.mrf.mxu3  ;;  %v7102_v27 = vld [vmem:[%s12325_s3 + $0x6a8] sm:$0xf]  ;;  %v4573_v42 = vpop.f32.mrf.mxu0  ;;  %v7099_v44 = vor.u32 %v8086_v39, %v7096_v63  ;;  %v8079_v48 = vld [vmem:[%s12325_s3 + $0x66c] sm:$0xf] }
 0x251   :  { %v7379_v33 = vor.u32 %v8156_v55, %v7376_v52  ;;  %v8083_v56 = vld [vmem:[%s12325_s3 + $0x688] sm:$0xf0]  ;;  %v6319_v55 = vor.u32 %v7894_v18, %v6318_v21  ;;  %v7012_v52 = vld [vmem:[%s12325_s3 + $0x614] sm:$0xf0]  ;;  %v6291_v22 = vor.u32 %v7887_v25, %v6290_v46  ;;  %v6956_v63 = vld [vmem:[%s12325_s3 + $0x5a4] sm:$0xf0] }
 0x252   :  { %4985 = vmatpush.bf16.msra.mxu2 %v6823_v51  ;;  %v6458_v51 = vld [vmem:[%s12325_s3 + $0x1a0] sm:$0xf]  ;;  %v4532_v61 = vadd.f32 %v4531_v43, %v4518_v34  ;;  %v4560_v38 = vadd.f32 %v4559_v13, %v4546_v36  ;;  %v7040_v13 = vld [vmem:[%s12325_s3 + $0x64c] sm:$0xf0]  ;;  %v7015_v26 = vor.u32 %v8065_v8, %v7012_v52 }
 0x253   :  { %4861 = vmatpush.bf16.msra.mxu1 %v7431_v4  ;;  %v6346_v4 = vld [vmem:[%s12325_s3 + $0xc0] sm:$0xf]  ;;  %v4587_v58 = vpop.f32.mrf.mxu1  ;;  %v7043_v15 = vor.u32 %v8072_v7, %v7040_v13  ;;  %v7978_v13 = vld [vmem:[%s12325_s3 + $0x340] sm:$0xf0] }
 0x254   :  { %5040 = vst [vmem:[%s12327_s5 + $0x10] sm:$0xff] %v4532_v61  ;;  %4945 = vmatpush.bf16.msrb.mxu3 %v7435_v47  ;;  %4905 = vmatpush.bf16.msrb.mxu0 %v6707_v1  ;;  %v4574_v43 = vadd.f32 %v4573_v42, %v4560_v38  ;;  %v7901_v47 = vld [vmem:[%s12325_s3 + $0xd8] sm:$0xf0]  ;;  %v8146_v38 = vld [vmem:[%s12325_s3 + $0x880] sm:$0xf0]  ;;  %v2710_v42 = vperm.slane %v11710_v35, 2 }
 0x255   :  { %v6347_v9 = vor.u32 %v7901_v47, %v6346_v4  ;;  %v7985_v4 = vld [vmem:[%s12325_s3 + $0x378] sm:$0xf0]  ;;  %v7298_v47 = vld [vmem:[%s12325_s3 + $0x830] sm:$0xf]  ;;  %v7242_v8 = vld [vmem:[%s12325_s3 + $0x7c0] sm:$0xf] }
 0x256   :  { %4986 = vmatpush.bf16.msra.mxu2 %v6795_v14  ;;  %v6459_v14 = vor.u32 %v7929_v54, %v6458_v51  ;;  %v7068_v51 = vld [vmem:[%s12325_s3 + $0x684] sm:$0xf0]  ;;  %v7074_v54 = vld [vmem:[%s12325_s3 + $0x670] sm:$0xf]  ;;  %v4588_v61 = vadd.f32 %v4587_v58, %v4574_v43  ;;  %v6682_v43 = vld [vmem:[%s12325_s3 + $0x360] sm:$0xf] }
 0x257   :  { %4862 = vmatpush.bf16.msra.mxu1 %v7403_v49  ;;  %4906 = vmatmul.bf16.vlgmr.msrb.gmra.mxu0 %v10373_v45  ;;  %v7071_v1 = vor.u32 %v8079_v48, %v7068_v51  ;;  %v6928_v48 = vld [vmem:[%s12325_s3 + $0x56c] sm:$0xf0]  ;;  %v8048_v51 = vld [vmem:[%s12325_s3 + $0x570] sm:$0xf0]  ;;  %v8139_v58 = vld [vmem:[%s12325_s3 + $0x848] sm:$0xf0]  ;;  %v6683_v7 = vor.u32 %v7985_v4, %v6682_v43 }
 0x258   :  { %4954 = vmatpush.bf16.msra.mxu0 %v6459_v14  ;;  %4946 = vmatpush.bf16.msrb.mxu3 %v7407_v0  ;;  %v8076_v14 = vld [vmem:[%s12325_s3 + $0x650] sm:$0xf0]  ;;  %v4615_v49 = vpop.f32.mrf.mxu3 }
 0x259   :  { %v7047_v53 = vor.u32 %v8076_v14, %v7046_v50  ;;  %v7270_v14 = vld [vmem:[%s12325_s3 + $0x7f8] sm:$0xf] }
 0x25a   :  { %4987 = vmatpush.bf16.msra.mxu2 %v6767_v23  ;;  %v4599_v23 = vpop.f32.mrf.mxu2 }
 0x25b   :  { %v4600_v60 = vadd.f32 %v4599_v23, %v4586_v57  ;;  %4863 = vmatpush.bf16.msra.mxu1 %v7375_v30  ;;  %v6984_v23 = vld [vmem:[%s12325_s3 + $0x5dc] sm:$0xf0]  ;;  %v8062_v30 = vld [vmem:[%s12325_s3 + $0x5e0] sm:$0xf0]  ;;  %v7880_v57 = vld [vmem:[%s12325_s3 + $0x30] sm:$0xf0] }
 0x25c   :  { %4955 = vmatpush.bf16.msra.mxu0 %v6431_v20  ;;  %4947 = vmatpush.bf16.msrb.mxu3 %v7379_v33  ;;  %v8069_v20 = vld [vmem:[%s12325_s3 + $0x618] sm:$0xf0]  ;;  %v6262_v33 = vld [vmem:[%s12325_s3 + $0x18] sm:$0xf]  ;;  %v6987_v39 = vor.u32 %v8058_v31, %v6984_v23  ;;  %v6991_v36 = vor.u32 %v8062_v30, %v6990_v28  ;;  %v8118_v23 = vld [vmem:[%s12325_s3 + $0x7a0] sm:$0xf0] }
 0x25d   :  { %v4614_v19 = vadd.f32 %v4613_v29, %v4600_v60  ;;  %v7019_v11 = vor.u32 %v8069_v20, %v7018_v17  ;;  %v8051_v29 = vld [vmem:[%s12325_s3 + $0x58c] sm:$0xf]  ;;  %v4627_v60 = vpop.f32.mrf.mxu0 }
 0x25e   :  { %4988 = vmatpush.bf16.msra.mxu2 %v6739_v37  ;;  %v6374_v37 = vld [vmem:[%s12325_s3 + $0xf8] sm:$0xf]  ;;  %4864 = vmatmul.bf16.vlgmr.msra.gmra.mxu1 %v11012_v40 }
 0x25f   :  { %4912 = vmatpush.bf16.msrb.mxu1 %v7127_v41  ;;  %v6375_v34 = vor.u32 %v7908_v6, %v6374_v37  ;;  %5039 = vst [vmem:[%s12327_s5 + $0x8] sm:$0xff] %v4614_v19  ;;  %4948 = vmatmul.bf16.vlgmr.msrb.gmra.mxu3 %v11012_v40  ;;  %v7354_v41 = vld [vmem:[%s12325_s3 + $0x8a0] sm:$0xf]  ;;  %v7326_v6 = vld [vmem:[%s12325_s3 + $0x868] sm:$0xf]  ;;  %v6959_v19 = vor.u32 %v8051_v29, %v6956_v63 }
 0x260   :  { %4996 = vmatpush.bf16.msra.mxu3 %v7131_v10  ;;  %4956 = vmatpush.bf16.msra.mxu0 %v6403_v24  ;;  %v8153_v10 = vld [vmem:[%s12325_s3 + $0x8b8] sm:$0xf0]  ;;  %v6263_v24 = vor.u32 %v7880_v57, %v6262_v33  ;;  %v4669_v52 = vpop.f32.mrf.mxu3  ;;  %v7186_v29 = vld [vmem:[%s12325_s3 + $0x750] sm:$0xf] }
 0x261   :  { %v7355_v37 = vor.u32 %v8153_v10, %v7354_v41  ;;  %v6570_v41 = vld [vmem:[%s12325_s3 + $0x280] sm:$0xf]  ;;  %v7957_v10 = vld [vmem:[%s12325_s3 + $0x298] sm:$0xf0] }
 0x262   :  { %4989 = vmatpush.bf16.msra.mxu2 %v6711_v5  ;;  %v7075_v5 = vor.u32 %v8083_v56, %v7074_v54  ;;  %v4601_v59 = vpop.f32.mrf.mxu2  ;;  %v4641_v54 = vpop.f32.mrf.mxu1  ;;  %v7327_v56 = vor.u32 %v8146_v38, %v7326_v6  ;;  %v6542_v6 = vld [vmem:[%s12325_s3 + $0x248] sm:$0xf]  ;;  %v7950_v38 = vld [vmem:[%s12325_s3 + $0x260] sm:$0xf0] }
 0x263   :  { %4913 = vmatpush.bf16.msrb.mxu1 %v7099_v44  ;;  %v4602_v3 = vadd.f32 %v4601_v59, %v4588_v61  ;;  %v7299_v59 = vor.u32 %v8139_v58, %v7298_v47  ;;  %v6486_v58 = vld [vmem:[%s12325_s3 + $0x1d8] sm:$0xf] }
 0x264   :  { %4957 = vmatpush.bf16.msra.mxu0 %v6375_v34  ;;  %v6934_v34 = vld [vmem:[%s12325_s3 + $0x558] sm:$0xf] }
 0x265   :  { %4990 = vmatmul.bf16.vlgmr.msra.gmra.mxu2 %v10373_v45  ;;  %v8090_v45 = vld [vmem:[%s12325_s3 + $0x6c0] sm:$0xf0]  ;;  %v4616_v0 = vadd.f32 %v4615_v49, %v4602_v3  ;;  %v4629_v21 = vpop.f32.mrf.mxu0 }
 0x266   :  { %v7103_v62 = vor.u32 %v8090_v45, %v7102_v27  ;;  %v6962_v27 = vld [vmem:[%s12325_s3 + $0x590] sm:$0xf]  ;;  %v8055_v45 = vld [vmem:[%s12325_s3 + $0x5a8] sm:$0xf0]  ;;  %v4630_v20 = vadd.f32 %v4629_v21, %v2710_v42  ;;  %v2711_v21 = vperm.slane %v11710_v35, 3 }
 0x267   :  { %4914 = vmatpush.bf16.msrb.mxu1 %v7071_v1  ;;  %5041 = vst [vmem:[%s12327_s5 + $0x18] sm:$0xff] %v4616_v0  ;;  %v6963_v44 = vor.u32 %v8055_v45, %v6962_v27  ;;  %v6935_v1 = vor.u32 %v8048_v51, %v6934_v34  ;;  %v6626_v0 = vld [vmem:[%s12325_s3 + $0x2f0] sm:$0xf]  ;;  %v6571_v45 = vor.u32 %v7957_v10, %v6570_v41 }
 0x268   :  { %4997 = vmatpush.bf16.msra.mxu3 %v7103_v62  ;;  %4958 = vmatpush.bf16.msra.mxu0 %v6347_v9  ;;  %v8044_v62 = vld [vmem:[%s12325_s3 + $0x554] sm:$0xf]  ;;  %v6654_v9 = vld [vmem:[%s12325_s3 + $0x328] sm:$0xf]  ;;  %v6514_v51 = vld [vmem:[%s12325_s3 + $0x210] sm:$0xf] }
 0x269   :  { %v6931_v61 = vor.u32 %v8044_v62, %v6928_v48  ;;  %v6655_v18 = vor.u32 %v7978_v13, %v6654_v9  ;;  %v6543_v62 = vor.u32 %v7950_v38, %v6542_v6 }
 0x26a   :  { %v4655_v3 = vpop.f32.mrf.mxu2  ;;  %v4643_v17 = vpop.f32.mrf.mxu1 }
 0x26b   :  { %4915 = vmatpush.bf16.msrb.mxu1 %v7043_v15  ;;  %v7971_v15 = vld [vmem:[%s12325_s3 + $0x308] sm:$0xf0] }
 0x26c   :  { %4998 = vmatpush.bf16.msra.mxu3 %v7075_v5  ;;  %4959 = vmatpush.bf16.msra.mxu0 %v6319_v55  ;;  %v4628_v5 = vadd.f32 %v4627_v60, %v2710_v42  ;;  %v8125_v55 = vld [vmem:[%s12325_s3 + $0x7d8] sm:$0xf0]  ;;  %v6627_v46 = vor.u32 %v7971_v15, %v6626_v0  ;;  %v4671_v60 = vpop.f32.mrf.mxu3 }
 0x26d   :  { %v7243_v25 = vor.u32 %v8125_v55, %v7242_v8  ;;  %v4683_v28 = vpop.f32.mrf.mxu0  ;;  %v8188_v8 = vld [vmem:[%s12325_s3 + $0x9d0] sm:$0xf0] }
 0x26e   :  { %v4642_v50 = vadd.f32 %v4641_v54, %v4628_v5  ;;  %v7943_v54 = vld [vmem:[%s12325_s3 + $0x228] sm:$0xf0]  ;;  %v7578_v5 = vld [vmem:[%s12325_s3 + $0xa60] sm:$0xf] }
 0x26f   :  { %4916 = vmatpush.bf16.msrb.mxu1 %v7015_v26  ;;  %v6598_v26 = vld [vmem:[%s12325_s3 + $0x2b8] sm:$0xf]  ;;  %v6515_v47 = vor.u32 %v7943_v54, %v6514_v51 }
 0x270   :  { %4999 = vmatpush.bf16.msra.mxu3 %v7047_v53  ;;  %4960 = vmatpush.bf16.msra.mxu0 %v6291_v22  ;;  %v4656_v53 = vadd.f32 %v4655_v3, %v4642_v50  ;;  %v7214_v22 = vld [vmem:[%s12325_s3 + $0x788] sm:$0xf]  ;;  %v7522_v3 = vld [vmem:[%s12325_s3 + $0x9f0] sm:$0xf] }
 0x271   :  { %v7215_v57 = vor.u32 %v8118_v23, %v7214_v22  ;;  %v7550_v50 = vld [vmem:[%s12325_s3 + $0xa28] sm:$0xf]  ;;  %v8174_v23 = vld [vmem:[%s12325_s3 + $0x960] sm:$0xf0] }
 0x272   :  { %v4670_v31 = vadd.f32 %v4669_v52, %v4656_v53  ;;  %v4657_v33 = vpop.f32.mrf.mxu2  ;;  %v7494_v53 = vld [vmem:[%s12325_s3 + $0x9b8] sm:$0xf]  ;;  %v7438_v22 = vld [vmem:[%s12325_s3 + $0x948] sm:$0xf] }
 0x273   :  { %4917 = vmatpush.bf16.msrb.mxu1 %v6987_v39  ;;  %v7439_v10 = vor.u32 %v8174_v23, %v7438_v22 }
 0x274   :  { %5000 = vmatpush.bf16.msra.mxu3 %v7019_v11  ;;  %4961 = vmatpush.bf16.msra.mxu0 %v6263_v24  ;;  %v4644_v11 = vadd.f32 %v4643_v17, %v4630_v20  ;;  %v8111_v24 = vld [vmem:[%s12325_s3 + $0x768] sm:$0xf0]  ;;  %v7495_v17 = vor.u32 %v8188_v8, %v7494_v53  ;;  %v8181_v20 = vld [vmem:[%s12325_s3 + $0x998] sm:$0xf0] }
 0x275   :  { %v4685_v48 = vpop.f32.mrf.mxu0 }
 0x276   :  { %v4658_v39 = vadd.f32 %v4657_v33, %v4644_v11 }
 0x277   :  { %4918 = vmatpush.bf16.msrb.mxu1 %v6959_v19  ;;  %4962 = vmatmul.bf16.vlgmr.msra.gmra.mxu0 %v10382_v16  ;;  %v8132_v16 = vld [vmem:[%s12325_s3 + $0x810] sm:$0xf0]  ;;  %v7158_v19 = vld [vmem:[%s12325_s3 + $0x718] sm:$0xf] }
 0x278   :  { %5001 = vmatpush.bf16.msra.mxu3 %v6991_v36  ;;  %5010 = vmatpush.bf16.msrb.mxu0 %v7355_v37  ;;  %v7271_v49 = vor.u32 %v8132_v16, %v7270_v14  ;;  %v4684_v36 = vadd.f32 %v4683_v28, %v4670_v31  ;;  %v7187_v37 = vor.u32 %v8111_v24, %v7186_v29  ;;  %v8202_v14 = vld [vmem:[%s12325_s3 + $0xa40] sm:$0xf0] }
 0x279   :  { %v4672_v42 = vadd.f32 %v4671_v60, %v4658_v39  ;;  %v7551_v16 = vor.u32 %v8202_v14, %v7550_v50  ;;  %v7410_v39 = vld [vmem:[%s12325_s3 + $0x910] sm:$0xf]  ;;  %v7382_v60 = vld [vmem:[%s12325_s3 + $0x8d8] sm:$0xf] }
 0x27b   :  { %4919 = vmatpush.bf16.msrb.mxu1 %v6931_v61  ;;  %v4697_v63 = vpop.f32.mrf.mxu1  ;;  %v7936_v61 = vld [vmem:[%s12325_s3 + $0x1f0] sm:$0xf0] }
 0x27c   :  { %5002 = vmatpush.bf16.msra.mxu3 %v6963_v44  ;;  %5011 = vmatpush.bf16.msrb.mxu0 %v7327_v56  ;;  %v4698_v27 = vadd.f32 %v4697_v63, %v4684_v36  ;;  %v8104_v44 = vld [vmem:[%s12325_s3 + $0x730] sm:$0xf0]  ;;  %v4686_v56 = vadd.f32 %v4685_v48, %v4672_v42  ;;  %v6487_v9 = vor.u32 %v7936_v61, %v6486_v58  ;;  %v8167_v36 = vld [vmem:[%s12325_s3 + $0x928] sm:$0xf0] }
 0x27d   :  { %v7159_v34 = vor.u32 %v8104_v44, %v7158_v19  ;;  %v4739_v15 = vpop.f32.mrf.mxu0 }
 0x27e   :  { %4920 = vmatmul.bf16.vlgmr.msrb.gmra.mxu1 %v10552_v12  ;;  %5042 = vst [vmem:[%s12328_s6] sm:$0xff] %v4698_v27  ;;  %v7411_v27 = vor.u32 %v8167_v36, %v7410_v39  ;;  %v8235_v39 = vld [vmem:[%s12326_s4] sm:$0xff] }
 0x27f   :  { %4968 = vmatpush.bf16.msra.mxu1 %v6683_v7  ;;  %v8209_v7 = vld [vmem:[%s12325_s3 + $0xa78] sm:$0xf0]  ;;  %v2714_v36 = vperm.slane %v8235_v39, 6 }
 0x280   :  { %5003 = vmatpush.bf16.msra.mxu3 %v6935_v1  ;;  %5012 = vmatpush.bf16.msrb.mxu0 %v7299_v59  ;;  %v4711_v1 = vpop.f32.mrf.mxu2  ;;  %v4725_v59 = vpop.f32.mrf.mxu3  ;;  %v7579_v13 = vor.u32 %v8209_v7, %v7578_v5 }
 0x281   :  { %v4712_v55 = vadd.f32 %v4711_v1, %v2711_v21 }
 0x283   :  { %5004 = vmatmul.bf16.vlgmr.msra.gmra.mxu3 %v10552_v12  ;;  %4969 = vmatpush.bf16.msra.mxu1 %v6655_v18  ;;  %v7964_v12 = vld [vmem:[%s12325_s3 + $0x2d0] sm:$0xf0]  ;;  %v4699_v43 = vpop.f32.mrf.mxu1  ;;  %v4726_v52 = vadd.f32 %v4725_v59, %v4712_v55 }
 0x284   :  { %5013 = vmatpush.bf16.msrb.mxu0 %v7271_v49  ;;  %v6599_v30 = vor.u32 %v7964_v12, %v6598_v26  ;;  %v4700_v4 = vadd.f32 %v4699_v43, %v4686_v56 }
 0x285   :  { %v4741_v33 = vpop.f32.mrf.mxu0 }
 0x286   :  { %5047 = vst [vmem:[%s12328_s6 + $0x28] sm:$0xff] %v4700_v4 }
 0x287   :  { %4970 = vmatpush.bf16.msra.mxu1 %v6627_v46  ;;  %v4740_v46 = vadd.f32 %v4739_v15, %v4726_v52 }
 0x288   :  { %5014 = vmatpush.bf16.msrb.mxu0 %v7243_v25  ;;  %v4713_v18 = vpop.f32.mrf.mxu2  ;;  %v4727_v0 = vpop.f32.mrf.mxu3 }
 0x289   :  { %v4714_v28 = vadd.f32 %v4713_v18, %v2711_v21 }
 0x28b   :  { %4971 = vmatpush.bf16.msra.mxu1 %v6599_v30 }
 0x28c   :  { %5015 = vmatpush.bf16.msrb.mxu0 %v7215_v57  ;;  %v4728_v57 = vadd.f32 %v4727_v0, %v4714_v28  ;;  %v2713_v0 = vperm.slane %v11710_v35, 5 }
 0x28e   :  { %v4742_v29 = vadd.f32 %v4741_v33, %v4728_v57 }
 0x28f   :  { %4972 = vmatpush.bf16.msra.mxu1 %v6571_v45 }
 0x290   :  { %5016 = vmatpush.bf16.msrb.mxu0 %v7187_v37  ;;  %v4767_v25 = vpop.f32.mrf.mxu2  ;;  %v4781_v31 = vpop.f32.mrf.mxu3  ;;  %v8160_v37 = vld [vmem:[%s12325_s3 + $0x8f0] sm:$0xf0] }
 0x291   :  { %v7383_v19 = vor.u32 %v8160_v37, %v7382_v60 }
 0x293   :  { %4973 = vmatpush.bf16.msra.mxu1 %v6543_v62  ;;  %v2712_v62 = vperm.slane %v11710_v35, 4 }
 0x294   :  { %5017 = vmatpush.bf16.msrb.mxu0 %v7159_v34  ;;  %v4795_v44 = vpop.f32.mrf.mxu0 }
 0x295   :  { %v4796_v34 = vadd.f32 %v4795_v44, %v2712_v62 }
 0x297   :  { %4974 = vmatpush.bf16.msra.mxu1 %v6515_v47  ;;  %5018 = vmatmul.bf16.vlgmr.msrb.gmra.mxu0 %v10854_v2  ;;  %v8195_v2 = vld [vmem:[%s12325_s3 + $0xa08] sm:$0xf0] }
 0x298   :  { %v7523_v49 = vor.u32 %v8195_v2, %v7522_v3  ;;  %v4769_v45 = vpop.f32.mrf.mxu2  ;;  %v4783_v38 = vpop.f32.mrf.mxu3 }
 0x29b   :  { %4975 = vmatpush.bf16.msra.mxu1 %v6487_v9  ;;  %v4753_v26 = vpop.f32.mrf.mxu1 }
 0x29c   :  { %v4754_v12 = vadd.f32 %v4753_v26, %v4740_v46  ;;  %v4797_v56 = vpop.f32.mrf.mxu0 }
 0x29d   :  { %v4798_v58 = vadd.f32 %v4797_v56, %v2712_v62 }
 0x29e   :  { %4976 = vmatmul.bf16.vlgmr.msra.gmra.mxu1 %v10384_v32  ;;  %v7466_v32 = vld [vmem:[%s12325_s3 + $0x980] sm:$0xf]  ;;  %v4768_v30 = vadd.f32 %v4767_v25, %v4754_v12 }
 0x29f   :  { %5024 = vmatpush.bf16.msrb.mxu1 %v7579_v13  ;;  %v7467_v11 = vor.u32 %v8181_v20, %v7466_v32 }
 0x2a0   :  { %v4782_v41 = vadd.f32 %v4781_v31, %v4768_v30  ;;  %v4823_v54 = vpop.f32.mrf.mxu2 }
 0x2a2   :  { %5043 = vst [vmem:[%s12328_s6 + $0x8] sm:$0xff] %v4782_v41  ;;  %v4837_v4 = vpop.f32.mrf.mxu3 }
 0x2a3   :  { %5025 = vmatpush.bf16.msrb.mxu1 %v7551_v16  ;;  %v4755_v24 = vpop.f32.mrf.mxu1 }
 0x2a4   :  { %v4756_v63 = vadd.f32 %v4755_v24, %v4742_v29 }
 0x2a6   :  { %v4770_v6 = vadd.f32 %v4769_v45, %v4756_v63 }
 0x2a7   :  { %5026 = vmatpush.bf16.msrb.mxu1 %v7523_v49 }
 0x2a8   :  { %v4784_v42 = vadd.f32 %v4783_v38, %v4770_v6  ;;  %v4825_v7 = vpop.f32.mrf.mxu2 }
 0x2aa   :  { %5048 = vst [vmem:[%s12328_s6 + $0x30] sm:$0xff] %v4784_v42  ;;  %v4839_v50 = vpop.f32.mrf.mxu3 }
 0x2ab   :  { %5027 = vmatpush.bf16.msrb.mxu1 %v7495_v17 }
 0x2af   :  { %5028 = vmatpush.bf16.msrb.mxu1 %v7467_v11 }
 0x2b0   :  { %v4879_v18 = vpop.f32.mrf.mxu2 }
 0x2b1   :  { %v4880_v55 = vadd.f32 %v4879_v18, %v2713_v0 }
 0x2b3   :  { %5029 = vmatpush.bf16.msrb.mxu1 %v7439_v10 }
 0x2b4   :  { %v4851_v5 = vpop.f32.mrf.mxu0 }
 0x2b7   :  { %5030 = vmatpush.bf16.msrb.mxu1 %v7411_v27 }
 0x2b8   :  { %v4881_v15 = vpop.f32.mrf.mxu2 }
 0x2b9   :  { %v4882_v26 = vadd.f32 %v4881_v15, %v2713_v0 }
 0x2bb   :  { %5031 = vmatpush.bf16.msrb.mxu1 %v7383_v19  ;;  %v4809_v48 = vpop.f32.mrf.mxu1 }
 0x2bc   :  { %v4810_v51 = vadd.f32 %v4809_v48, %v4796_v34  ;;  %v4853_v16 = vpop.f32.mrf.mxu0 }
 0x2be   :  { %5032 = vmatmul.bf16.vlgmr.msrb.gmra.mxu1 %v11012_v40  ;;  %v4824_v43 = vadd.f32 %v4823_v54, %v4810_v51 }
 0x2c0   :  { %v4838_v1 = vadd.f32 %v4837_v4, %v4824_v43 }
 0x2c2   :  { %v4852_v9 = vadd.f32 %v4851_v5, %v4838_v1  ;;  %v4893_v49 = vpop.f32.mrf.mxu3 }
 0x2c3   :  { %v4811_v47 = vpop.f32.mrf.mxu1  ;;  %v4894_v52 = vadd.f32 %v4893_v49, %v4880_v55 }
 0x2c4   :  { %v4812_v61 = vadd.f32 %v4811_v47, %v4798_v58 }
 0x2c6   :  { %v4826_v59 = vadd.f32 %v4825_v7, %v4812_v61 }
 0x2c8   :  { %v4840_v14 = vadd.f32 %v4839_v50, %v4826_v59  ;;  %v4935_v32 = vpop.f32.mrf.mxu2 }
 0x2ca   :  { %v4854_v3 = vadd.f32 %v4853_v16, %v4840_v14  ;;  %v4895_v53 = vpop.f32.mrf.mxu3 }
 0x2cb   :  { %v4896_v31 = vadd.f32 %v4895_v53, %v4882_v26 }
 0x2d0   :  { %v4937_v30 = vpop.f32.mrf.mxu2 }
 0x2d4   :  { %v4907_v8 = vpop.f32.mrf.mxu0 }
 0x2d5   :  { %v4908_v17 = vadd.f32 %v4907_v8, %v4894_v52 }
 0x2db   :  { %v4865_v13 = vpop.f32.mrf.mxu1 }
 0x2dc   :  { %v4866_v40 = vadd.f32 %v4865_v13, %v4852_v9  ;;  %v4909_v11 = vpop.f32.mrf.mxu0 }
 0x2dd   :  { %v4910_v23 = vadd.f32 %v4909_v11, %v4896_v31 }
 0x2de   :  { %5044 = vst [vmem:[%s12328_s6 + $0x10] sm:$0xff] %v4866_v40 }
 0x2e2   :  { %v4949_v25 = vpop.f32.mrf.mxu3 }
 0x2e3   :  { %v4867_v2 = vpop.f32.mrf.mxu1 }
 0x2e4   :  { %v4868_v21 = vadd.f32 %v4867_v2, %v4854_v3 }
 0x2e6   :  { %5049 = vst [vmem:[%s12328_s6 + $0x38] sm:$0xff] %v4868_v21 }
 0x2e8   :  { %v4991_v27 = vpop.f32.mrf.mxu2 }
 0x2ea   :  { %v4951_v57 = vpop.f32.mrf.mxu3 }
 0x2f0   :  { %v4993_v62 = vpop.f32.mrf.mxu2 }
 0x2f4   :  { %v4963_v10 = vpop.f32.mrf.mxu0 }
 0x2f5   :  { %v4964_v24 = vadd.f32 %v4963_v10, %v2714_v36 }
 0x2fb   :  { %v4921_v20 = vpop.f32.mrf.mxu1 }
 0x2fc   :  { %v4922_v46 = vadd.f32 %v4921_v20, %v4908_v17  ;;  %v4965_v45 = vpop.f32.mrf.mxu0 }
 0x2fd   :  { %v4966_v38 = vadd.f32 %v4965_v45, %v2714_v36 }
 0x2fe   :  { %v4936_v12 = vadd.f32 %v4935_v32, %v4922_v46 }
 0x300   :  { %v4950_v22 = vadd.f32 %v4949_v25, %v4936_v12 }
 0x302   :  { %5045 = vst [vmem:[%s12328_s6 + $0x18] sm:$0xff] %v4950_v22 }
 0x303   :  { %v4923_v35 = vpop.f32.mrf.mxu1 }
 0x304   :  { %v4924_v28 = vadd.f32 %v4923_v35, %v4910_v23 }
 0x306   :  { %v4938_v33 = vadd.f32 %v4937_v30, %v4924_v28  ;;  %v5005_v37 = vpop.f32.mrf.mxu3 }
 0x308   :  { %v4952_v41 = vadd.f32 %v4951_v57, %v4938_v33 }
 0x30a   :  { %5050 = vst [vmem:[%s12328_s6 + $0x40] sm:$0xff] %v4952_v41 }
 0x30e   :  { %v5007_v56 = vpop.f32.mrf.mxu3 }
 0x314   :  { %v5019_v44 = vpop.f32.mrf.mxu0 }
 0x31b   :  { %v4977_v29 = vpop.f32.mrf.mxu1 }
 0x31c   :  { %v4978_v63 = vadd.f32 %v4977_v29, %v4964_v24  ;;  %v5021_v4 = vpop.f32.mrf.mxu0 }
 0x31e   :  { %v4992_v60 = vadd.f32 %v4991_v27, %v4978_v63 }
 0x320   :  { %v5006_v19 = vadd.f32 %v5005_v37, %v4992_v60 }
 0x322   :  { %v5020_v34 = vadd.f32 %v5019_v44, %v5006_v19 }
 0x323   :  { %v4979_v6 = vpop.f32.mrf.mxu1 }
 0x324   :  { %v4980_v42 = vadd.f32 %v4979_v6, %v4966_v38 }
 0x326   :  { %v4994_v48 = vadd.f32 %v4993_v62, %v4980_v42 }
 0x328   :  { %v5008_v43 = vadd.f32 %v5007_v56, %v4994_v48 }
 0x32a   :  { %v5022_v47 = vadd.f32 %v5021_v4, %v5008_v43 }
 0x33b   :  { %v5033_v51 = vpop.f32.mrf.mxu1 }
 0x33c   :  { %v5034_v54 = vadd.f32 %v5033_v51, %v5020_v34 }
 0x33e   :  { %5046 = vst [vmem:[%s12328_s6 + $0x20] sm:$0xff] %v5034_v54 }
 0x343   :  { %v5035_v58 = vpop.f32.mrf.mxu1 }
 0x344   :  { %v5036_v61 = vadd.f32 %v5035_v58, %v5022_v47 }
 0x346   :  { %5051 = vst [vmem:[%s12328_s6 + $0x48] sm:$0xff] %v5036_v61 }

</bundles_post_ra>
